<compile_context>
chip_gen: v7x
topology: tpu7x:2x2x1
jax: 0.10.0
libtpu: 0.0.40
codegen_flags: <defaults>
</compile_context>

<pallas_src>
import numpy as np
import jax
import jax.numpy as jnp
from jax import lax
from jax.experimental import pallas as pl
from jax.experimental.pallas import tpu as pltpu


# ----------------------------------------------------------------------------
# Static helpers (host-side, compile-time constants)
# ----------------------------------------------------------------------------
def build_tap_masks(siz, B):
    """(B*P, 9) 0/1 mask, pixel-major rows: 1 iff source pixel of tap k valid."""
    P = siz * siz
    m = np.zeros((B * P, 9), np.float32)
    k = 0
    for dy in (-1, 0, 1):
        for dx in (-1, 0, 1):
            for y in range(siz):
                for x in range(siz):
                    if 0 <= y + dy < siz and 0 <= x + dx < siz:
                        p = y * siz + x
                        m[p * B:(p + 1) * B, k] = 1.0
            k += 1
    return jnp.asarray(m)


# ----------------------------------------------------------------------------
# Fused ConvLSTM + actor/critic head: ONE pallas_call, grid = (steps,)
# ----------------------------------------------------------------------------
def convlstm_a3c_fused(x_pm, W, bx, peep, masks, w1, b1, w2, b2, *,
                       cin, ch, siz, steps, B):
    P = siz * siz
    BP = B * P
    C = cin + ch
    KC = 9 * C
    pad = (siz + 1) * B          # max |(dy*siz + dx) * B|
    H2 = w1.shape[1]             # fused pi1|v1 hidden width (32)
    O = w2.shape[1]              # out_dim + 1

    def kernel(x_ref, w_ref, bx_ref, peep_ref, mask_ref,
               w1_ref, b1_ref, w2_ref, b2_ref,
               out_ref, xh_sc, z_sc, c_sc, feat_sc):
        t = pl.program_id(0)

        @pl.when(t == 0)
        def _init():
            xh_sc[...] = jnp.zeros_like(xh_sc)     # zero pads and h_0
            c_sc[...] = jnp.zeros_like(c_sc)

        # Current x into its home rows/lanes of the persistent padded x|h
        # staging buffer (the h lanes already hold h_{t-1}).
        xh_sc[pl.ds(pad, BP), pl.ds(0, cin)] = x_ref[0]

        # 9 conv taps: static sublane-shifted reads of the padded buffer,
        # boundary-masked, stored at static lane offsets into the z scratch.
        mvals = mask_ref[...]                       # (BP, 9) 0/1 f32
        k = 0
        for dy in (-1, 0, 1):
            for dx in (-1, 0, 1):
                s = (dy * siz + dx) * B
                src = xh_sc[pl.ds(pad + s, BP), :]                  # (BP, C)
                z_sc[:, pl.ds(k * C, C)] = src * mvals[:, k:k + 1]
                k += 1

        # Single fused gate matmul (bf16 MXU operands, f32 accumulation).
        gates = jnp.dot(z_sc[...].astype(jnp.bfloat16), w_ref[...],
                        preferred_element_type=jnp.float32) + bx_ref[...]

        c = c_sc[...]
        i_g = jax.nn.sigmoid(gates[:, 0 * ch:1 * ch] + c * peep_ref[0])
        f_g = jax.nn.sigmoid(gates[:, 1 * ch:2 * ch] + c * peep_ref[1])
        g_g = jnp.tanh(gates[:, 2 * ch:3 * ch])
        c_new = f_g * c + i_g * g_g
        o_g = jax.nn.sigmoid(gates[:, 3 * ch:4 * ch] + c_new * peep_ref[2])
        h_new = o_g * jnp.tanh(c_new)

        c_sc[...] = c_new
        # h state lives inside the padded staging buffer (read next step via
        # the taps) -> one (BP, ch) store per step, no separate h scratch.
        xh_sc[pl.ds(pad, BP), pl.ds(cin, ch)] = h_new

        # ------- fused actor/critic head (executes only at the last step) ----
        @pl.when(t == steps - 1)
        def _head():
            r = jnp.maximum(h_new, 0.0)                              # relu
            # torch's channel-major flatten is folded into w1's row order;
            # assemble the (B, P*ch) feature slab from the pixel-major rows.
            for p in range(P):
                feat_sc[:, pl.ds(p * ch, ch)] = r[p * B:(p + 1) * B, :]
            hid = jnp.tanh(
                jnp.dot(feat_sc[...], w1_ref[...],
                        preferred_element_type=jnp.float32) + b1_ref[...])
            out_ref[...] = (jnp.dot(hid, w2_ref[...],
                                    preferred_element_type=jnp.float32)
                            + b2_ref[...]).astype(out_ref.dtype)

    return pl.pallas_call(
        kernel,
        out_shape=jax.ShapeDtypeStruct((B, O), jnp.float32),
        grid=(steps,),
        in_specs=[
            pl.BlockSpec((1, BP, cin), lambda t: (t, 0, 0)),   # x_t (only per-step DMA)
            pl.BlockSpec((KC, 4 * ch), lambda t: (0, 0)),      # fused conv weights
            pl.BlockSpec((1, 4 * ch), lambda t: (0, 0)),       # conv bias
            pl.BlockSpec((3, BP, ch), lambda t: (0, 0, 0)),    # peephole Wci/Wcf/Wco
            pl.BlockSpec((BP, 9), lambda t: (0, 0)),           # boundary masks
            pl.BlockSpec((P * ch, H2), lambda t: (0, 0)),      # fused pi1|v1
            pl.BlockSpec((1, H2), lambda t: (0, 0)),
            pl.BlockSpec((H2, O), lambda t: (0, 0)),           # block-diag pi2|v2
            pl.BlockSpec((1, O), lambda t: (0, 0)),
        ],
        out_specs=pl.BlockSpec((B, O), lambda t: (0, 0)),
        scratch_shapes=[
            pltpu.VMEM((BP + 2 * pad, C), jnp.float32),  # padded x|h staging (+ h state)
            pltpu.VMEM((BP, KC), jnp.float32),           # gate-matmul LHS
            pltpu.VMEM((BP, ch), jnp.float32),           # cell state c
            pltpu.VMEM((B, P * ch), jnp.float32),        # head feature slab
        ],
        compiler_params=pltpu.CompilerParams(
            dimension_semantics=("arbitrary",)),
    )(x_pm, W, bx, peep, masks, w1, b1, w2, b2)


# ----------------------------------------------------------------------------
# Parameter construction / packing (glue, outside kernels)
# ----------------------------------------------------------------------------
def init_raw_params(key, cin, ch, siz, out_dim, ksz=3):
    F = ch * siz * siz
    ks = jax.random.split(key, 12)
    rnd = lambda k_, shape: (0.1 * jax.random.normal(k_, shape)).astype(jnp.float32)
    return dict(
        wx=rnd(ks[0], (4, ch, cin, ksz, ksz)),     # gate order: i, f, c~, o
        bx=rnd(ks[1], (4, ch)),
        wh=rnd(ks[2], (4, ch, ch, ksz, ksz)),
        peep=rnd(ks[3], (3, 1, ch, siz, siz)),     # Wci, Wcf, Wco
        pi1_w=rnd(ks[4], (16, F)), pi1_b=rnd(ks[5], (16,)),
        v1_w=rnd(ks[6], (16, F)), v1_b=rnd(ks[7], (16,)),
        pi2_w=rnd(ks[8], (out_dim, 16)), pi2_b=rnd(ks[9], (out_dim,)),
        v2_w=rnd(ks[10], (1, 16)), v2_b=rnd(ks[11], (1,)),
    )


def pack_kernel_params(raw, cin, ch, siz, out_dim):
    P = siz * siz

    # Fused conv weights: rows tap-major, within a tap (x rows, then h rows);
    # columns are gate-major blocks [i | f | c~ | o].
    def tap(ky, kx):
        wx_t = jnp.concatenate([raw['wx'][g][:, :, ky, kx].T for g in range(4)],
                               axis=-1)                          # (cin, 4*ch)
        wh_t = jnp.concatenate([raw['wh'][g][:, :, ky, kx].T for g in range(4)],
                               axis=-1)                          # (ch, 4*ch)
        return jnp.concatenate([wx_t, wh_t], axis=0)             # (cin+ch, 4*ch)

    W = jnp.concatenate([tap(ky, kx) for ky in range(3) for kx in range(3)],
                        axis=0)                                  # (9*(cin+ch), 4*ch)
    bx = raw['bx'].reshape(1, 4 * ch)
    peep = jnp.transpose(raw['peep'].reshape(3, ch, P), (0, 2, 1))    # (3, P, ch)

    # Head: fold the torch channel-major flatten (c*P + p) into the weight row
    # order (p*ch + c) so the kernel's pixel-major feature slab needs no
    # transpose, and fuse pi1|v1 / pi2|v2.
    def permute_rows(w):                      # (16, ch*P) -> (P*ch, 16)
        return jnp.transpose(w.reshape(-1, ch, P), (2, 1, 0)).reshape(P * ch, -1)

    hid = raw['pi1_w'].shape[0]               # 16
    w1 = jnp.concatenate([permute_rows(raw['pi1_w']),
                          permute_rows(raw['v1_w'])], axis=1)    # (P*ch, 32)
    b1 = jnp.concatenate([raw['pi1_b'], raw['v1_b']]).reshape(1, -1)
    w2 = jnp.zeros((2 * hid, out_dim + 1), jnp.float32)
    w2 = w2.at[:hid, :out_dim].set(raw['pi2_w'].T)               # pi2 block
    w2 = w2.at[hid:, out_dim:].set(raw['v2_w'].T)                # v2 block
    b2 = jnp.concatenate([raw['pi2_b'], raw['v2_b']]).reshape(1, -1)

    return dict(W=W.astype(jnp.bfloat16), bx=bx, peep=peep,
                w1=w1, b1=b1, w2=w2, b2=b2)


# ----------------------------------------------------------------------------
# Full forward (ConvLSTMA3C.forward)
# ----------------------------------------------------------------------------
def convlstm_a3c_forward(inp, kp, *, cin, ch, siz, steps, out_dim):
    P = siz * siz
    x = inp.reshape(-1, steps, cin, siz, siz).astype(jnp.float32)
    B = x.shape[0]

    # Pixel-major rows: row = (y*siz + x)*B + b  (conv taps never mix batches).
    x_pm = jnp.transpose(x, (1, 3, 4, 0, 2)).reshape(steps, B * P, cin)
    peep_pm = jnp.repeat(kp['peep'], B, axis=1)          # (3, B*P, ch)
    masks = build_tap_masks(siz, B)                      # (B*P, 9) const

    out = convlstm_a3c_fused(x_pm, kp['W'], kp['bx'], peep_pm, masks,
                             kp['w1'], kp['b1'], kp['w2'], kp['b2'],
                             cin=cin, ch=ch, siz=siz, steps=steps, B=B)
    return out[:, :out_dim], out[:, out_dim:]


# ----------------------------------------------------------------------------
# Pure-JAX reference (numerical check against the Pallas kernel)
# ----------------------------------------------------------------------------
def reference_forward(inp, raw, *, cin, ch, siz, steps):
    x = inp.reshape(-1, steps, cin, siz, siz).astype(jnp.float32)
    B = x.shape[0]
    h = jnp.zeros((B, ch, siz, siz), jnp.float32)
    c = jnp.zeros_like(h)

    def conv(a, w, b=None):
        out = lax.conv_general_dilated(a, w, (1, 1), [(1, 1), (1, 1)],
                                       dimension_numbers=('NCHW', 'OIHW', 'NCHW'),
                                       precision=lax.Precision.HIGHEST)
        return out if b is None else out + b[None, :, None, None]

    wci, wcf, wco = raw['peep'][0], raw['peep'][1], raw['peep'][2]
    for t in range(steps):
        xt = x[:, t]
        gi = conv(xt, raw['wx'][0], raw['bx'][0]) + conv(h, raw['wh'][0])
        gf = conv(xt, raw['wx'][1], raw['bx'][1]) + conv(h, raw['wh'][1])
        gc = conv(xt, raw['wx'][2], raw['bx'][2]) + conv(h, raw['wh'][2])
        go = conv(xt, raw['wx'][3], raw['bx'][3]) + conv(h, raw['wh'][3])
        i = jax.nn.sigmoid(gi + c * wci)
        f = jax.nn.sigmoid(gf + c * wcf)
        g = jnp.tanh(gc)
        c = f * c + i * g
        o = jax.nn.sigmoid(go + c * wco)
        h = o * jnp.tanh(c)

    feat = h.reshape(B, ch * siz * siz)
    xr = jax.nn.relu(feat)
    dot = lambda a, b: jnp.dot(a, b, precision=lax.Precision.HIGHEST)
    pi = jnp.tanh(dot(xr, raw['pi1_w'].T) + raw['pi1_b'])
    v = jnp.tanh(dot(xr, raw['v1_w'].T) + raw['v1_b'])
    pi = dot(pi, raw['pi2_w'].T) + raw['pi2_b']
    v = dot(v, raw['v2_w'].T) + raw['v2_b']
    return pi, v


if __name__ == "__main__":
    # Shapes consistent with the module defaults (input_channels=4,
    # hidden_channels=[8], kernel_size=3, siz=5, outputs=2); B=4 / steps=2
    # exercise the multi-batch block and the recurrent time loop.
    B, STEPS, CIN, SIZ, CH, OUTPUTS = 4, 2, 4, 5, 8, 2

    key = jax.random.PRNGKey(0)
    k_param, k_x = jax.random.split(key)
    raw = init_raw_params(k_param, CIN, CH, SIZ, OUTPUTS)
    kp = pack_kernel_params(raw, CIN, CH, SIZ, OUTPUTS)

    x = jax.random.normal(k_x, (B, STEPS, CIN, SIZ, SIZ), jnp.float32)

    fwd = jax.jit(lambda inp: convlstm_a3c_forward(
        inp, kp, cin=CIN, ch=CH, siz=SIZ, steps=STEPS, out_dim=OUTPUTS))
    pi, v = fwd(x)
    jax.block_until_ready((pi, v))

    pi_ref, v_ref = reference_forward(x, raw, cin=CIN, ch=CH, siz=SIZ, steps=STEPS)
    assert pi.shape == (B, OUTPUTS) and v.shape == (B, 1)
    # tolerance covers bf16 MXU operands vs. the f32 HIGHEST-precision reference
    assert np.allclose(np.asarray(pi), np.asarray(pi_ref), rtol=2e-2, atol=2e-2)
    assert np.allclose(np.asarray(v), np.asarray(v_ref), rtol=2e-2, atol=2e-2)

    print("KERNEL_OK")
</pallas_src>

<mosaic_0001>
module attributes {stable_mosaic.version = 11 : i64} {
  func.func @kernel(%arg0: i32, %arg1: memref<1x100x4xf32, #tpu.memory_space<vmem>>, %arg2: memref<108x32xbf16, #tpu.memory_space<vmem>>, %arg3: memref<1x32xf32, #tpu.memory_space<vmem>>, %arg4: memref<3x100x8xf32, #tpu.memory_space<vmem>>, %arg5: memref<100x9xf32, #tpu.memory_space<vmem>>, %arg6: memref<200x32xf32, #tpu.memory_space<vmem>>, %arg7: memref<1x32xf32, #tpu.memory_space<vmem>>, %arg8: memref<32x3xf32, #tpu.memory_space<vmem>>, %arg9: memref<1x3xf32, #tpu.memory_space<vmem>>, %arg10: memref<4x3xf32, #tpu.memory_space<vmem>>, %arg11: memref<148x12xf32, #tpu.memory_space<vmem>>, %arg12: memref<100x108xf32, #tpu.memory_space<vmem>>, %arg13: memref<100x8xf32, #tpu.memory_space<vmem>>, %arg14: memref<4x200xf32, #tpu.memory_space<vmem>>) attributes {dimension_semantics = [#tpu.dimension_semantics<arbitrary>], iteration_bounds = array<i64: 2>, scalar_prefetch = 0 : i64, scratch_operands = 4 : i64, tpu.core_type = #tpu.core_type<tc>, window_params = [{transform_indices = @transform_0, window_bounds = array<i64: 1, 100, 4>}, {pipeline_mode = #tpu.pipeline_mode<synchronous>, transform_indices = @transform_1, window_bounds = array<i64: 108, 32>}, {pipeline_mode = #tpu.pipeline_mode<synchronous>, transform_indices = @transform_2, window_bounds = array<i64: 1, 32>}, {pipeline_mode = #tpu.pipeline_mode<synchronous>, transform_indices = @transform_3, window_bounds = array<i64: 3, 100, 8>}, {pipeline_mode = #tpu.pipeline_mode<synchronous>, transform_indices = @transform_4, window_bounds = array<i64: 100, 9>}, {pipeline_mode = #tpu.pipeline_mode<synchronous>, transform_indices = @transform_5, window_bounds = array<i64: 200, 32>}, {pipeline_mode = #tpu.pipeline_mode<synchronous>, transform_indices = @transform_6, window_bounds = array<i64: 1, 32>}, {pipeline_mode = #tpu.pipeline_mode<synchronous>, transform_indices = @transform_7, window_bounds = array<i64: 32, 3>}, {pipeline_mode = #tpu.pipeline_mode<synchronous>, transform_indices = @transform_8, window_bounds = array<i64: 1, 3>}, {pipeline_mode = #tpu.pipeline_mode<synchronous>, transform_indices = @transform_9, window_bounds = array<i64: 4, 3>}]} {
    %c0_i32 = arith.constant 0 : i32
    %0 = arith.cmpi eq, %arg0, %c0_i32 : i32
    %1 = arith.extui %0 : i1 to i32
    %c0_i32_0 = arith.constant 0 : i32
    %2 = arith.cmpi ne, %1, %c0_i32_0 : i32
    scf.if %2 {
      %cst_52 = arith.constant 0.000000e+00 : f32
      %102 = vector.broadcast %cst_52 : f32 to vector<148x12xf32>
      %c0_53 = arith.constant 0 : index
      %c0_54 = arith.constant 0 : index
      %103 = vector.load %arg11[%c0_53, %c0_54] : memref<148x12xf32, #tpu.memory_space<vmem>>, vector<148x12xf32>
      tpu.vector_store %arg11[%c0_53, %c0_54], %102 {strides = array<i32>} : memref<148x12xf32, #tpu.memory_space<vmem>>, vector<148x12xf32>,
      %cst_55 = arith.constant 0.000000e+00 : f32
      %104 = vector.broadcast %cst_55 : f32 to vector<100x8xf32>
      %c0_56 = arith.constant 0 : index
      %c0_57 = arith.constant 0 : index
      %105 = vector.load %arg13[%c0_56, %c0_57] : memref<100x8xf32, #tpu.memory_space<vmem>>, vector<100x8xf32>
      tpu.vector_store %arg13[%c0_56, %c0_57], %104 {strides = array<i32>} : memref<100x8xf32, #tpu.memory_space<vmem>>, vector<100x8xf32>,
    } else {
    }
    %c0 = arith.constant 0 : index
    %c0_1 = arith.constant 0 : index
    %c0_2 = arith.constant 0 : index
    %3 = vector.load %arg1[%c0, %c0_1, %c0_2] : memref<1x100x4xf32, #tpu.memory_space<vmem>>, vector<1x100x4xf32>
    %4 = vector.shape_cast %3 : vector<1x100x4xf32> to vector<100x4xf32>
    %c24 = arith.constant 24 : index
    %c0_3 = arith.constant 0 : index
    %5 = vector.load %arg11[%c24, %c0_3] : memref<148x12xf32, #tpu.memory_space<vmem>>, vector<100x4xf32>
    tpu.vector_store %arg11[%c24, %c0_3], %4 {strides = array<i32>} : memref<148x12xf32, #tpu.memory_space<vmem>>, vector<100x4xf32>,
    %c0_4 = arith.constant 0 : index
    %c0_5 = arith.constant 0 : index
    %6 = vector.load %arg5[%c0_4, %c0_5] : memref<100x9xf32, #tpu.memory_space<vmem>>, vector<100x9xf32>
    %c0_6 = arith.constant 0 : index
    %c0_7 = arith.constant 0 : index
    %7 = vector.load %arg11[%c0_6, %c0_7] : memref<148x12xf32, #tpu.memory_space<vmem>>, vector<100x12xf32>
    %8 = vector.extract_strided_slice %6 {offsets = [0, 0], sizes = [100, 1], strides = [1, 1]} : vector<100x9xf32> to vector<100x1xf32>
    %9 = vector.broadcast %8 : vector<100x1xf32> to vector<100x12xf32>
    %10 = arith.mulf %7, %9 : vector<100x12xf32>
    %c0_8 = arith.constant 0 : index
    %c0_9 = arith.constant 0 : index
    %11 = vector.load %arg12[%c0_8, %c0_9] : memref<100x108xf32, #tpu.memory_space<vmem>>, vector<100x12xf32>
    tpu.vector_store %arg12[%c0_8, %c0_9], %10 {strides = array<i32>} : memref<100x108xf32, #tpu.memory_space<vmem>>, vector<100x12xf32>,
    %c4 = arith.constant 4 : index
    %c0_10 = arith.constant 0 : index
    %12 = vector.load %arg11[%c4, %c0_10] : memref<148x12xf32, #tpu.memory_space<vmem>>, vector<100x12xf32>
    %13 = vector.extract_strided_slice %6 {offsets = [0, 1], sizes = [100, 1], strides = [1, 1]} : vector<100x9xf32> to vector<100x1xf32>
    %14 = vector.broadcast %13 : vector<100x1xf32> to vector<100x12xf32>
    %15 = arith.mulf %12, %14 : vector<100x12xf32>
    %c0_11 = arith.constant 0 : index
    %c12 = arith.constant 12 : index
    %16 = vector.load %arg12[%c0_11, %c12] : memref<100x108xf32, #tpu.memory_space<vmem>>, vector<100x12xf32>
    tpu.vector_store %arg12[%c0_11, %c12], %15 {strides = array<i32>} : memref<100x108xf32, #tpu.memory_space<vmem>>, vector<100x12xf32>,
    %c8 = arith.constant 8 : index
    %c0_12 = arith.constant 0 : index
    %17 = vector.load %arg11[%c8, %c0_12] : memref<148x12xf32, #tpu.memory_space<vmem>>, vector<100x12xf32>
    %18 = vector.extract_strided_slice %6 {offsets = [0, 2], sizes = [100, 1], strides = [1, 1]} : vector<100x9xf32> to vector<100x1xf32>
    %19 = vector.broadcast %18 : vector<100x1xf32> to vector<100x12xf32>
    %20 = arith.mulf %17, %19 : vector<100x12xf32>
    %c0_13 = arith.constant 0 : index
    %c24_14 = arith.constant 24 : index
    %21 = vector.load %arg12[%c0_13, %c24_14] : memref<100x108xf32, #tpu.memory_space<vmem>>, vector<100x12xf32>
    tpu.vector_store %arg12[%c0_13, %c24_14], %20 {strides = array<i32>} : memref<100x108xf32, #tpu.memory_space<vmem>>, vector<100x12xf32>,
    %c20 = arith.constant 20 : index
    %c0_15 = arith.constant 0 : index
    %22 = vector.load %arg11[%c20, %c0_15] : memref<148x12xf32, #tpu.memory_space<vmem>>, vector<100x12xf32>
    %23 = vector.extract_strided_slice %6 {offsets = [0, 3], sizes = [100, 1], strides = [1, 1]} : vector<100x9xf32> to vector<100x1xf32>
    %24 = vector.broadcast %23 : vector<100x1xf32> to vector<100x12xf32>
    %25 = arith.mulf %22, %24 : vector<100x12xf32>
    %c0_16 = arith.constant 0 : index
    %c36 = arith.constant 36 : index
    %26 = vector.load %arg12[%c0_16, %c36] : memref<100x108xf32, #tpu.memory_space<vmem>>, vector<100x12xf32>
    tpu.vector_store %arg12[%c0_16, %c36], %25 {strides = array<i32>} : memref<100x108xf32, #tpu.memory_space<vmem>>, vector<100x12xf32>,
    %c24_17 = arith.constant 24 : index
    %c0_18 = arith.constant 0 : index
    %27 = vector.load %arg11[%c24_17, %c0_18] : memref<148x12xf32, #tpu.memory_space<vmem>>, vector<100x12xf32>
    %28 = vector.extract_strided_slice %6 {offsets = [0, 4], sizes = [100, 1], strides = [1, 1]} : vector<100x9xf32> to vector<100x1xf32>
    %29 = vector.broadcast %28 : vector<100x1xf32> to vector<100x12xf32>
    %30 = arith.mulf %27, %29 : vector<100x12xf32>
    %c0_19 = arith.constant 0 : index
    %c48 = arith.constant 48 : index
    %31 = vector.load %arg12[%c0_19, %c48] : memref<100x108xf32, #tpu.memory_space<vmem>>, vector<100x12xf32>
    tpu.vector_store %arg12[%c0_19, %c48], %30 {strides = array<i32>} : memref<100x108xf32, #tpu.memory_space<vmem>>, vector<100x12xf32>,
    %c28 = arith.constant 28 : index
    %c0_20 = arith.constant 0 : index
    %32 = vector.load %arg11[%c28, %c0_20] : memref<148x12xf32, #tpu.memory_space<vmem>>, vector<100x12xf32>
    %33 = vector.extract_strided_slice %6 {offsets = [0, 5], sizes = [100, 1], strides = [1, 1]} : vector<100x9xf32> to vector<100x1xf32>
    %34 = vector.broadcast %33 : vector<100x1xf32> to vector<100x12xf32>
    %35 = arith.mulf %32, %34 : vector<100x12xf32>
    %c0_21 = arith.constant 0 : index
    %c60 = arith.constant 60 : index
    %36 = vector.load %arg12[%c0_21, %c60] : memref<100x108xf32, #tpu.memory_space<vmem>>, vector<100x12xf32>
    tpu.vector_store %arg12[%c0_21, %c60], %35 {strides = array<i32>} : memref<100x108xf32, #tpu.memory_space<vmem>>, vector<100x12xf32>,
    %c40 = arith.constant 40 : index
    %c0_22 = arith.constant 0 : index
    %37 = vector.load %arg11[%c40, %c0_22] : memref<148x12xf32, #tpu.memory_space<vmem>>, vector<100x12xf32>
    %38 = vector.extract_strided_slice %6 {offsets = [0, 6], sizes = [100, 1], strides = [1, 1]} : vector<100x9xf32> to vector<100x1xf32>
    %39 = vector.broadcast %38 : vector<100x1xf32> to vector<100x12xf32>
    %40 = arith.mulf %37, %39 : vector<100x12xf32>
    %c0_23 = arith.constant 0 : index
    %c72 = arith.constant 72 : index
    %41 = vector.load %arg12[%c0_23, %c72] : memref<100x108xf32, #tpu.memory_space<vmem>>, vector<100x12xf32>
    tpu.vector_store %arg12[%c0_23, %c72], %40 {strides = array<i32>} : memref<100x108xf32, #tpu.memory_space<vmem>>, vector<100x12xf32>,
    %c44 = arith.constant 44 : index
    %c0_24 = arith.constant 0 : index
    %42 = vector.load %arg11[%c44, %c0_24] : memref<148x12xf32, #tpu.memory_space<vmem>>, vector<100x12xf32>
    %43 = vector.extract_strided_slice %6 {offsets = [0, 7], sizes = [100, 1], strides = [1, 1]} : vector<100x9xf32> to vector<100x1xf32>
    %44 = vector.broadcast %43 : vector<100x1xf32> to vector<100x12xf32>
    %45 = arith.mulf %42, %44 : vector<100x12xf32>
    %c0_25 = arith.constant 0 : index
    %c84 = arith.constant 84 : index
    %46 = vector.load %arg12[%c0_25, %c84] : memref<100x108xf32, #tpu.memory_space<vmem>>, vector<100x12xf32>
    tpu.vector_store %arg12[%c0_25, %c84], %45 {strides = array<i32>} : memref<100x108xf32, #tpu.memory_space<vmem>>, vector<100x12xf32>,
    %c48_26 = arith.constant 48 : index
    %c0_27 = arith.constant 0 : index
    %47 = vector.load %arg11[%c48_26, %c0_27] : memref<148x12xf32, #tpu.memory_space<vmem>>, vector<100x12xf32>
    %48 = vector.extract_strided_slice %6 {offsets = [0, 8], sizes = [100, 1], strides = [1, 1]} : vector<100x9xf32> to vector<100x1xf32>
    %49 = vector.broadcast %48 : vector<100x1xf32> to vector<100x12xf32>
    %50 = arith.mulf %47, %49 : vector<100x12xf32>
    %c0_28 = arith.constant 0 : index
    %c96 = arith.constant 96 : index
    %51 = vector.load %arg12[%c0_28, %c96] : memref<100x108xf32, #tpu.memory_space<vmem>>, vector<100x12xf32>
    tpu.vector_store %arg12[%c0_28, %c96], %50 {strides = array<i32>} : memref<100x108xf32, #tpu.memory_space<vmem>>, vector<100x12xf32>,
    %c0_29 = arith.constant 0 : index
    %c0_30 = arith.constant 0 : index
    %52 = vector.load %arg12[%c0_29, %c0_30] : memref<100x108xf32, #tpu.memory_space<vmem>>, vector<100x108xf32>
    %53 = arith.truncf %52 : vector<100x108xf32> to vector<100x108xbf16>
    %c0_31 = arith.constant 0 : index
    %c0_32 = arith.constant 0 : index
    %54 = vector.load %arg2[%c0_31, %c0_32] : memref<108x32xbf16, #tpu.memory_space<vmem>>, vector<108x32xbf16>
    %cst = arith.constant dense<0.000000e+00> : vector<100x32xf32>
    %55 = tpu.matmul %53, %54, %cst {dimension_numbers = #tpu.dot_dimension_numbers<[1], [0], [0], [1], [0, 0, 1, 1], [], []>} : vector<100x108xbf16>, vector<108x32xbf16>, vector<100x32xf32> -> vector<100x32xf32>
    %c0_33 = arith.constant 0 : index
    %c0_34 = arith.constant 0 : index
    %56 = vector.load %arg3[%c0_33, %c0_34] : memref<1x32xf32, #tpu.memory_space<vmem>>, vector<1x32xf32>
    %57 = vector.broadcast %56 : vector<1x32xf32> to vector<100x32xf32>
    %58 = arith.addf %55, %57 : vector<100x32xf32>
    %c0_35 = arith.constant 0 : index
    %c0_36 = arith.constant 0 : index
    %59 = vector.load %arg13[%c0_35, %c0_36] : memref<100x8xf32, #tpu.memory_space<vmem>>, vector<100x8xf32>
    %60 = vector.extract_strided_slice %58 {offsets = [0, 0], sizes = [100, 8], strides = [1, 1]} : vector<100x32xf32> to vector<100x8xf32>
    %c0_37 = arith.constant 0 : index
    %c0_38 = arith.constant 0 : index
    %c0_39 = arith.constant 0 : index
    %61 = vector.load %arg4[%c0_37, %c0_38, %c0_39] : memref<3x100x8xf32, #tpu.memory_space<vmem>>, vector<1x100x8xf32>
    %62 = vector.shape_cast %61 : vector<1x100x8xf32> to vector<100x8xf32>
    %63 = arith.mulf %59, %62 : vector<100x8xf32>
    %64 = arith.addf %60, %63 : vector<100x8xf32>
    %65 = arith.negf %64 : vector<100x8xf32>
    %66 = math.exp %65 : vector<100x8xf32>
    %cst_40 = arith.constant 1.000000e+00 : f32
    %67 = vector.broadcast %cst_40 : f32 to vector<100x8xf32>
    %68 = arith.addf %67, %66 : vector<100x8xf32>
    %69 = arith.divf %67, %68 : vector<100x8xf32>
    %70 = vector.extract_strided_slice %58 {offsets = [0, 8], sizes = [100, 8], strides = [1, 1]} : vector<100x32xf32> to vector<100x8xf32>
    %c1 = arith.constant 1 : index
    %c0_41 = arith.constant 0 : index
    %c0_42 = arith.constant 0 : index
    %71 = vector.load %arg4[%c1, %c0_41, %c0_42] : memref<3x100x8xf32, #tpu.memory_space<vmem>>, vector<1x100x8xf32>
    %72 = vector.shape_cast %71 : vector<1x100x8xf32> to vector<100x8xf32>
    %73 = arith.mulf %59, %72 : vector<100x8xf32>
    %74 = arith.addf %70, %73 : vector<100x8xf32>
    %75 = arith.negf %74 : vector<100x8xf32>
    %76 = math.exp %75 : vector<100x8xf32>
    %cst_43 = arith.constant 1.000000e+00 : f32
    %77 = vector.broadcast %cst_43 : f32 to vector<100x8xf32>
    %78 = arith.addf %77, %76 : vector<100x8xf32>
    %79 = arith.divf %77, %78 : vector<100x8xf32>
    %80 = vector.extract_strided_slice %58 {offsets = [0, 16], sizes = [100, 8], strides = [1, 1]} : vector<100x32xf32> to vector<100x8xf32>
    %81 = math.tanh %80 : vector<100x8xf32>
    %82 = arith.mulf %79, %59 : vector<100x8xf32>
    %83 = arith.mulf %69, %81 : vector<100x8xf32>
    %84 = arith.addf %82, %83 : vector<100x8xf32>
    %85 = vector.extract_strided_slice %58 {offsets = [0, 24], sizes = [100, 8], strides = [1, 1]} : vector<100x32xf32> to vector<100x8xf32>
    %c2 = arith.constant 2 : index
    %c0_44 = arith.constant 0 : index
    %c0_45 = arith.constant 0 : index
    %86 = vector.load %arg4[%c2, %c0_44, %c0_45] : memref<3x100x8xf32, #tpu.memory_space<vmem>>, vector<1x100x8xf32>
    %87 = vector.shape_cast %86 : vector<1x100x8xf32> to vector<100x8xf32>
    %88 = arith.mulf %84, %87 : vector<100x8xf32>
    %89 = arith.addf %85, %88 : vector<100x8xf32>
    %90 = arith.negf %89 : vector<100x8xf32>
    %91 = math.exp %90 : vector<100x8xf32>
    %cst_46 = arith.constant 1.000000e+00 : f32
    %92 = vector.broadcast %cst_46 : f32 to vector<100x8xf32>
    %93 = arith.addf %92, %91 : vector<100x8xf32>
    %94 = arith.divf %92, %93 : vector<100x8xf32>
    %95 = math.tanh %84 : vector<100x8xf32>
    %96 = arith.mulf %94, %95 : vector<100x8xf32>
    %c0_47 = arith.constant 0 : index
    %c0_48 = arith.constant 0 : index
    %97 = vector.load %arg13[%c0_47, %c0_48] : memref<100x8xf32, #tpu.memory_space<vmem>>, vector<100x8xf32>
    tpu.vector_store %arg13[%c0_47, %c0_48], %84 {strides = array<i32>} : memref<100x8xf32, #tpu.memory_space<vmem>>, vector<100x8xf32>,
    %c24_49 = arith.constant 24 : index
    %c4_50 = arith.constant 4 : index
    %98 = vector.load %arg11[%c24_49, %c4_50] : memref<148x12xf32, #tpu.memory_space<vmem>>, vector<100x8xf32>
    tpu.vector_store %arg11[%c24_49, %c4_50], %96 {strides = array<i32>} : memref<148x12xf32, #tpu.memory_space<vmem>>, vector<100x8xf32>,
    %c1_i32 = arith.constant 1 : i32
    %99 = arith.cmpi eq, %arg0, %c1_i32 : i32
    %100 = arith.extui %99 : i1 to i32
    %c0_i32_51 = arith.constant 0 : i32
    %101 = arith.cmpi ne, %100, %c0_i32_51 : i32
    scf.if %101 {
      %cst_52 = arith.constant 0.000000e+00 : f32
      %102 = vector.broadcast %cst_52 : f32 to vector<100x8xf32>
      %103 = arith.maximumf %96, %102 : vector<100x8xf32>
      %104 = vector.extract_strided_slice %103 {offsets = [0, 0], sizes = [4, 8], strides = [1, 1]} : vector<100x8xf32> to vector<4x8xf32>
      %c0_53 = arith.constant 0 : index
      %c0_54 = arith.constant 0 : index
      %105 = vector.load %arg14[%c0_53, %c0_54] : memref<4x200xf32, #tpu.memory_space<vmem>>, vector<4x8xf32>
      tpu.vector_store %arg14[%c0_53, %c0_54], %104 {strides = array<i32>} : memref<4x200xf32, #tpu.memory_space<vmem>>, vector<4x8xf32>,
      %106 = vector.extract_strided_slice %103 {offsets = [4, 0], sizes = [4, 8], strides = [1, 1]} : vector<100x8xf32> to vector<4x8xf32>
      %c0_55 = arith.constant 0 : index
      %c8_56 = arith.constant 8 : index
      %107 = vector.load %arg14[%c0_55, %c8_56] : memref<4x200xf32, #tpu.memory_space<vmem>>, vector<4x8xf32>
      tpu.vector_store %arg14[%c0_55, %c8_56], %106 {strides = array<i32>} : memref<4x200xf32, #tpu.memory_space<vmem>>, vector<4x8xf32>,
      %108 = vector.extract_strided_slice %103 {offsets = [8, 0], sizes = [4, 8], strides = [1, 1]} : vector<100x8xf32> to vector<4x8xf32>
      %c0_57 = arith.constant 0 : index
      %c16 = arith.constant 16 : index
      %109 = vector.load %arg14[%c0_57, %c16] : memref<4x200xf32, #tpu.memory_space<vmem>>, vector<4x8xf32>
      tpu.vector_store %arg14[%c0_57, %c16], %108 {strides = array<i32>} : memref<4x200xf32, #tpu.memory_space<vmem>>, vector<4x8xf32>,
      %110 = vector.extract_strided_slice %103 {offsets = [12, 0], sizes = [4, 8], strides = [1, 1]} : vector<100x8xf32> to vector<4x8xf32>
      %c0_58 = arith.constant 0 : index
      %c24_59 = arith.constant 24 : index
      %111 = vector.load %arg14[%c0_58, %c24_59] : memref<4x200xf32, #tpu.memory_space<vmem>>, vector<4x8xf32>
      tpu.vector_store %arg14[%c0_58, %c24_59], %110 {strides = array<i32>} : memref<4x200xf32, #tpu.memory_space<vmem>>, vector<4x8xf32>,
      %112 = vector.extract_strided_slice %103 {offsets = [16, 0], sizes = [4, 8], strides = [1, 1]} : vector<100x8xf32> to vector<4x8xf32>
      %c0_60 = arith.constant 0 : index
      %c32 = arith.constant 32 : index
      %113 = vector.load %arg14[%c0_60, %c32] : memref<4x200xf32, #tpu.memory_space<vmem>>, vector<4x8xf32>
      tpu.vector_store %arg14[%c0_60, %c32], %112 {strides = array<i32>} : memref<4x200xf32, #tpu.memory_space<vmem>>, vector<4x8xf32>,
      %114 = vector.extract_strided_slice %103 {offsets = [20, 0], sizes = [4, 8], strides = [1, 1]} : vector<100x8xf32> to vector<4x8xf32>
      %c0_61 = arith.constant 0 : index
      %c40_62 = arith.constant 40 : index
      %115 = vector.load %arg14[%c0_61, %c40_62] : memref<4x200xf32, #tpu.memory_space<vmem>>, vector<4x8xf32>
      tpu.vector_store %arg14[%c0_61, %c40_62], %114 {strides = array<i32>} : memref<4x200xf32, #tpu.memory_space<vmem>>, vector<4x8xf32>,
      %116 = vector.extract_strided_slice %103 {offsets = [24, 0], sizes = [4, 8], strides = [1, 1]} : vector<100x8xf32> to vector<4x8xf32>
      %c0_63 = arith.constant 0 : index
      %c48_64 = arith.constant 48 : index
      %117 = vector.load %arg14[%c0_63, %c48_64] : memref<4x200xf32, #tpu.memory_space<vmem>>, vector<4x8xf32>
      tpu.vector_store %arg14[%c0_63, %c48_64], %116 {strides = array<i32>} : memref<4x200xf32, #tpu.memory_space<vmem>>, vector<4x8xf32>,
      %118 = vector.extract_strided_slice %103 {offsets = [28, 0], sizes = [4, 8], strides = [1, 1]} : vector<100x8xf32> to vector<4x8xf32>
      %c0_65 = arith.constant 0 : index
      %c56 = arith.constant 56 : index
      %119 = vector.load %arg14[%c0_65, %c56] : memref<4x200xf32, #tpu.memory_space<vmem>>, vector<4x8xf32>
      tpu.vector_store %arg14[%c0_65, %c56], %118 {strides = array<i32>} : memref<4x200xf32, #tpu.memory_space<vmem>>, vector<4x8xf32>,
      %120 = vector.extract_strided_slice %103 {offsets = [32, 0], sizes = [4, 8], strides = [1, 1]} : vector<100x8xf32> to vector<4x8xf32>
      %c0_66 = arith.constant 0 : index
      %c64 = arith.constant 64 : index
      %121 = vector.load %arg14[%c0_66, %c64] : memref<4x200xf32, #tpu.memory_space<vmem>>, vector<4x8xf32>
      tpu.vector_store %arg14[%c0_66, %c64], %120 {strides = array<i32>} : memref<4x200xf32, #tpu.memory_space<vmem>>, vector<4x8xf32>,
      %122 = vector.extract_strided_slice %103 {offsets = [36, 0], sizes = [4, 8], strides = [1, 1]} : vector<100x8xf32> to vector<4x8xf32>
      %c0_67 = arith.constant 0 : index
      %c72_68 = arith.constant 72 : index
      %123 = vector.load %arg14[%c0_67, %c72_68] : memref<4x200xf32, #tpu.memory_space<vmem>>, vector<4x8xf32>
      tpu.vector_store %arg14[%c0_67, %c72_68], %122 {strides = array<i32>} : memref<4x200xf32, #tpu.memory_space<vmem>>, vector<4x8xf32>,
      %124 = vector.extract_strided_slice %103 {offsets = [40, 0], sizes = [4, 8], strides = [1, 1]} : vector<100x8xf32> to vector<4x8xf32>
      %c0_69 = arith.constant 0 : index
      %c80 = arith.constant 80 : index
      %125 = vector.load %arg14[%c0_69, %c80] : memref<4x200xf32, #tpu.memory_space<vmem>>, vector<4x8xf32>
      tpu.vector_store %arg14[%c0_69, %c80], %124 {strides = array<i32>} : memref<4x200xf32, #tpu.memory_space<vmem>>, vector<4x8xf32>,
      %126 = vector.extract_strided_slice %103 {offsets = [44, 0], sizes = [4, 8], strides = [1, 1]} : vector<100x8xf32> to vector<4x8xf32>
      %c0_70 = arith.constant 0 : index
      %c88 = arith.constant 88 : index
      %127 = vector.load %arg14[%c0_70, %c88] : memref<4x200xf32, #tpu.memory_space<vmem>>, vector<4x8xf32>
      tpu.vector_store %arg14[%c0_70, %c88], %126 {strides = array<i32>} : memref<4x200xf32, #tpu.memory_space<vmem>>, vector<4x8xf32>,
      %128 = vector.extract_strided_slice %103 {offsets = [48, 0], sizes = [4, 8], strides = [1, 1]} : vector<100x8xf32> to vector<4x8xf32>
      %c0_71 = arith.constant 0 : index
      %c96_72 = arith.constant 96 : index
      %129 = vector.load %arg14[%c0_71, %c96_72] : memref<4x200xf32, #tpu.memory_space<vmem>>, vector<4x8xf32>
      tpu.vector_store %arg14[%c0_71, %c96_72], %128 {strides = array<i32>} : memref<4x200xf32, #tpu.memory_space<vmem>>, vector<4x8xf32>,
      %130 = vector.extract_strided_slice %103 {offsets = [52, 0], sizes = [4, 8], strides = [1, 1]} : vector<100x8xf32> to vector<4x8xf32>
      %c0_73 = arith.constant 0 : index
      %c104 = arith.constant 104 : index
      %131 = vector.load %arg14[%c0_73, %c104] : memref<4x200xf32, #tpu.memory_space<vmem>>, vector<4x8xf32>
      tpu.vector_store %arg14[%c0_73, %c104], %130 {strides = array<i32>} : memref<4x200xf32, #tpu.memory_space<vmem>>, vector<4x8xf32>,
      %132 = vector.extract_strided_slice %103 {offsets = [56, 0], sizes = [4, 8], strides = [1, 1]} : vector<100x8xf32> to vector<4x8xf32>
      %c0_74 = arith.constant 0 : index
      %c112 = arith.constant 112 : index
      %133 = vector.load %arg14[%c0_74, %c112] : memref<4x200xf32, #tpu.memory_space<vmem>>, vector<4x8xf32>
      tpu.vector_store %arg14[%c0_74, %c112], %132 {strides = array<i32>} : memref<4x200xf32, #tpu.memory_space<vmem>>, vector<4x8xf32>,
      %134 = vector.extract_strided_slice %103 {offsets = [60, 0], sizes = [4, 8], strides = [1, 1]} : vector<100x8xf32> to vector<4x8xf32>
      %c0_75 = arith.constant 0 : index
      %c120 = arith.constant 120 : index
      %135 = vector.load %arg14[%c0_75, %c120] : memref<4x200xf32, #tpu.memory_space<vmem>>, vector<4x8xf32>
      tpu.vector_store %arg14[%c0_75, %c120], %134 {strides = array<i32>} : memref<4x200xf32, #tpu.memory_space<vmem>>, vector<4x8xf32>,
      %136 = vector.extract_strided_slice %103 {offsets = [64, 0], sizes = [4, 8], strides = [1, 1]} : vector<100x8xf32> to vector<4x8xf32>
      %c0_76 = arith.constant 0 : index
      %c128 = arith.constant 128 : index
      %137 = vector.load %arg14[%c0_76, %c128] : memref<4x200xf32, #tpu.memory_space<vmem>>, vector<4x8xf32>
      tpu.vector_store %arg14[%c0_76, %c128], %136 {strides = array<i32>} : memref<4x200xf32, #tpu.memory_space<vmem>>, vector<4x8xf32>,
      %138 = vector.extract_strided_slice %103 {offsets = [68, 0], sizes = [4, 8], strides = [1, 1]} : vector<100x8xf32> to vector<4x8xf32>
      %c0_77 = arith.constant 0 : index
      %c136 = arith.constant 136 : index
      %139 = vector.load %arg14[%c0_77, %c136] : memref<4x200xf32, #tpu.memory_space<vmem>>, vector<4x8xf32>
      tpu.vector_store %arg14[%c0_77, %c136], %138 {strides = array<i32>} : memref<4x200xf32, #tpu.memory_space<vmem>>, vector<4x8xf32>,
      %140 = vector.extract_strided_slice %103 {offsets = [72, 0], sizes = [4, 8], strides = [1, 1]} : vector<100x8xf32> to vector<4x8xf32>
      %c0_78 = arith.constant 0 : index
      %c144 = arith.constant 144 : index
      %141 = vector.load %arg14[%c0_78, %c144] : memref<4x200xf32, #tpu.memory_space<vmem>>, vector<4x8xf32>
      tpu.vector_store %arg14[%c0_78, %c144], %140 {strides = array<i32>} : memref<4x200xf32, #tpu.memory_space<vmem>>, vector<4x8xf32>,
      %142 = vector.extract_strided_slice %103 {offsets = [76, 0], sizes = [4, 8], strides = [1, 1]} : vector<100x8xf32> to vector<4x8xf32>
      %c0_79 = arith.constant 0 : index
      %c152 = arith.constant 152 : index
      %143 = vector.load %arg14[%c0_79, %c152] : memref<4x200xf32, #tpu.memory_space<vmem>>, vector<4x8xf32>
      tpu.vector_store %arg14[%c0_79, %c152], %142 {strides = array<i32>} : memref<4x200xf32, #tpu.memory_space<vmem>>, vector<4x8xf32>,
      %144 = vector.extract_strided_slice %103 {offsets = [80, 0], sizes = [4, 8], strides = [1, 1]} : vector<100x8xf32> to vector<4x8xf32>
      %c0_80 = arith.constant 0 : index
      %c160 = arith.constant 160 : index
      %145 = vector.load %arg14[%c0_80, %c160] : memref<4x200xf32, #tpu.memory_space<vmem>>, vector<4x8xf32>
      tpu.vector_store %arg14[%c0_80, %c160], %144 {strides = array<i32>} : memref<4x200xf32, #tpu.memory_space<vmem>>, vector<4x8xf32>,
      %146 = vector.extract_strided_slice %103 {offsets = [84, 0], sizes = [4, 8], strides = [1, 1]} : vector<100x8xf32> to vector<4x8xf32>
      %c0_81 = arith.constant 0 : index
      %c168 = arith.constant 168 : index
      %147 = vector.load %arg14[%c0_81, %c168] : memref<4x200xf32, #tpu.memory_space<vmem>>, vector<4x8xf32>
      tpu.vector_store %arg14[%c0_81, %c168], %146 {strides = array<i32>} : memref<4x200xf32, #tpu.memory_space<vmem>>, vector<4x8xf32>,
      %148 = vector.extract_strided_slice %103 {offsets = [88, 0], sizes = [4, 8], strides = [1, 1]} : vector<100x8xf32> to vector<4x8xf32>
      %c0_82 = arith.constant 0 : index
      %c176 = arith.constant 176 : index
      %149 = vector.load %arg14[%c0_82, %c176] : memref<4x200xf32, #tpu.memory_space<vmem>>, vector<4x8xf32>
      tpu.vector_store %arg14[%c0_82, %c176], %148 {strides = array<i32>} : memref<4x200xf32, #tpu.memory_space<vmem>>, vector<4x8xf32>,
      %150 = vector.extract_strided_slice %103 {offsets = [92, 0], sizes = [4, 8], strides = [1, 1]} : vector<100x8xf32> to vector<4x8xf32>
      %c0_83 = arith.constant 0 : index
      %c184 = arith.constant 184 : index
      %151 = vector.load %arg14[%c0_83, %c184] : memref<4x200xf32, #tpu.memory_space<vmem>>, vector<4x8xf32>
      tpu.vector_store %arg14[%c0_83, %c184], %150 {strides = array<i32>} : memref<4x200xf32, #tpu.memory_space<vmem>>, vector<4x8xf32>,
      %152 = vector.extract_strided_slice %103 {offsets = [96, 0], sizes = [4, 8], strides = [1, 1]} : vector<100x8xf32> to vector<4x8xf32>
      %c0_84 = arith.constant 0 : index
      %c192 = arith.constant 192 : index
      %153 = vector.load %arg14[%c0_84, %c192] : memref<4x200xf32, #tpu.memory_space<vmem>>, vector<4x8xf32>
      tpu.vector_store %arg14[%c0_84, %c192], %152 {strides = array<i32>} : memref<4x200xf32, #tpu.memory_space<vmem>>, vector<4x8xf32>,
      %c0_85 = arith.constant 0 : index
      %c0_86 = arith.constant 0 : index
      %154 = vector.load %arg14[%c0_85, %c0_86] : memref<4x200xf32, #tpu.memory_space<vmem>>, vector<4x200xf32>
      %c0_87 = arith.constant 0 : index
      %c0_88 = arith.constant 0 : index
      %155 = vector.load %arg6[%c0_87, %c0_88] : memref<200x32xf32, #tpu.memory_space<vmem>>, vector<200x32xf32>
      %cst_89 = arith.constant dense<0.000000e+00> : vector<4x32xf32>
      %156 = tpu.matmul %154, %155, %cst_89 {dimension_numbers = #tpu.dot_dimension_numbers<[1], [0], [0], [1], [0, 0, 1, 1], [], []>} : vector<4x200xf32>, vector<200x32xf32>, vector<4x32xf32> -> vector<4x32xf32>
      %c0_90 = arith.constant 0 : index
      %c0_91 = arith.constant 0 : index
      %157 = vector.load %arg7[%c0_90, %c0_91] : memref<1x32xf32, #tpu.memory_space<vmem>>, vector<1x32xf32>
      %158 = vector.broadcast %157 : vector<1x32xf32> to vector<4x32xf32>
      %159 = arith.addf %156, %158 : vector<4x32xf32>
      %160 = math.tanh %159 : vector<4x32xf32>
      %c0_92 = arith.constant 0 : index
      %c0_93 = arith.constant 0 : index
      %161 = vector.load %arg8[%c0_92, %c0_93] : memref<32x3xf32, #tpu.memory_space<vmem>>, vector<32x3xf32>
      %cst_94 = arith.constant dense<0.000000e+00> : vector<4x3xf32>
      %162 = tpu.matmul %160, %161, %cst_94 {dimension_numbers = #tpu.dot_dimension_numbers<[1], [0], [0], [1], [0, 0, 1, 1], [], []>} : vector<4x32xf32>, vector<32x3xf32>, vector<4x3xf32> -> vector<4x3xf32>
      %c0_95 = arith.constant 0 : index
      %c0_96 = arith.constant 0 : index
      %163 = vector.load %arg9[%c0_95, %c0_96] : memref<1x3xf32, #tpu.memory_space<vmem>>, vector<1x3xf32>
      %164 = vector.broadcast %163 : vector<1x3xf32> to vector<4x3xf32>
      %165 = arith.addf %162, %164 : vector<4x3xf32>
      %c0_97 = arith.constant 0 : index
      %c0_98 = arith.constant 0 : index
      %166 = vector.load %arg10[%c0_97, %c0_98] : memref<4x3xf32, #tpu.memory_space<vmem>>, vector<4x3xf32>
      tpu.vector_store %arg10[%c0_97, %c0_98], %165 {strides = array<i32>} : memref<4x3xf32, #tpu.memory_space<vmem>>, vector<4x3xf32>,
    } else {
    }
    return
  }
  func.func @transform_0(%arg0: i32) -> (i32, i32, i32) {
    %c0_i32 = arith.constant 0 : i32
    %c0_i32_0 = arith.constant 0 : i32
    %c0_i32_1 = arith.constant 0 : i32
    return %arg0, %c0_i32, %c0_i32_0 : i32, i32, i32
  }
  func.func @transform_1(%arg0: i32) -> (i32, i32) {
    %c0_i32 = arith.constant 0 : i32
    %c0_i32_0 = arith.constant 0 : i32
    %c0_i32_1 = arith.constant 0 : i32
    return %c0_i32, %c0_i32_0 : i32, i32
  }
  func.func @transform_2(%arg0: i32) -> (i32, i32) {
    %c0_i32 = arith.constant 0 : i32
    %c0_i32_0 = arith.constant 0 : i32
    %c0_i32_1 = arith.constant 0 : i32
    return %c0_i32, %c0_i32_0 : i32, i32
  }
  func.func @transform_3(%arg0: i32) -> (i32, i32, i32) {
    %c0_i32 = arith.constant 0 : i32
    %c0_i32_0 = arith.constant 0 : i32
    %c0_i32_1 = arith.constant 0 : i32
    %c0_i32_2 = arith.constant 0 : i32
    return %c0_i32, %c0_i32_0, %c0_i32_1 : i32, i32, i32
  }
  func.func @transform_4(%arg0: i32) -> (i32, i32) {
    %c0_i32 = arith.constant 0 : i32
    %c0_i32_0 = arith.constant 0 : i32
    %c0_i32_1 = arith.constant 0 : i32
    return %c0_i32, %c0_i32_0 : i32, i32
  }
  func.func @transform_5(%arg0: i32) -> (i32, i32) {
    %c0_i32 = arith.constant 0 : i32
    %c0_i32_0 = arith.constant 0 : i32
    %c0_i32_1 = arith.constant 0 : i32
    return %c0_i32, %c0_i32_0 : i32, i32
  }
  func.func @transform_6(%arg0: i32) -> (i32, i32) {
    %c0_i32 = arith.constant 0 : i32
    %c0_i32_0 = arith.constant 0 : i32
    %c0_i32_1 = arith.constant 0 : i32
    return %c0_i32, %c0_i32_0 : i32, i32
  }
  func.func @transform_7(%arg0: i32) -> (i32, i32) {
    %c0_i32 = arith.constant 0 : i32
    %c0_i32_0 = arith.constant 0 : i32
    %c0_i32_1 = arith.constant 0 : i32
    return %c0_i32, %c0_i32_0 : i32, i32
  }
  func.func @transform_8(%arg0: i32) -> (i32, i32) {
    %c0_i32 = arith.constant 0 : i32
    %c0_i32_0 = arith.constant 0 : i32
    %c0_i32_1 = arith.constant 0 : i32
    return %c0_i32, %c0_i32_0 : i32, i32
  }
  func.func @transform_9(%arg0: i32) -> (i32, i32) {
    %c0_i32 = arith.constant 0 : i32
    %c0_i32_0 = arith.constant 0 : i32
    %c0_i32_1 = arith.constant 0 : i32
    return %c0_i32, %c0_i32_0 : i32, i32
  }
}

</mosaic_0001>

<bundles_post_ra>
// kernel: _lambda_.1
= control target key start
LH: loop header
LB: loop body
LE: loop exit
PB: predicated region body
PF: predicated region fallthrough
CT: control target
= control target key end

     0   :  { %s3828_s30 = smov 0   ;;  %s5402_s0 = inlined_call_operand.vmem [shape: f32[2,100,4], index: 0, kind: input, shape index: {}]   ;;  %s5403_s1 = inlined_call_operand.vmem [shape: bf16[108,32], index: 1, kind: input, shape index: {}]   ;;  %s5404_s2 = inlined_call_operand.vmem [shape: f32[1,32], index: 2, kind: input, shape index: {}]   ;;  %s5405_s3 = inlined_call_operand.vmem [shape: f32[3,100,8], index: 3, kind: input, shape index: {}]   ;;  %s5406_s4 = inlined_call_operand.vmem [shape: f32[100,9], index: 4, kind: input, shape index: {}]   ;;  %s5407_s5 = inlined_call_operand.vmem [shape: f32[200,32], index: 5, kind: input, shape index: {}]   ;;  %s5408_s6 = inlined_call_operand.vmem [shape: f32[1,32], index: 6, kind: input, shape index: {}]   ;;  %s5409_s7 = inlined_call_operand.vmem [shape: f32[32,3], index: 7, kind: input, shape index: {}]   ;;  %s5410_s8 = inlined_call_operand.vmem [shape: f32[1,3], index: 8, kind: input, shape index: {}]   ;;  %s5411_s9 = inlined_call_operand.vmem [shape: f32[4,3], index: 9, kind: output, shape index: {}]  }
   0x1 LB: > { %s3834_s10 = sadd.s32 4294967295, %s3733_s30   ;;  %p3184_p0 = scmp.ge.s32.totalorder %s3733_s30, 1  ;;  %s3733_s30 = sphi %s3828_s30, %s19_s30  }
   0x2   : > { %p282_p1 = scmp.lt.s32.totalorder %s3733_s30, 3 }
   0x4   : > { %p283_p2 = pnand %p3184_p0, %p282_p1 }
   0x6   : > { %286 = sbr.rel (%p283_p2) target bundleno = 2061 (0x80d), region = 56 }
   0xd   : > { %p313_p3 = scmp.lt.s32.totalorder %s3834_s10, 1  ;;  %p3186_p4 = scmp.ne.s32.totalorder %s3834_s10, 0 }
   0xe   : > { %vm323_vm0 = vcmask (!%p3186_p4), 97280   ;;  %vm342_vm1 = vcmask (!%p3186_p4), 93184   ;;  %vm344_vm2 = vcmask (!%p3186_p4), 64512   ;;  %v3735_v0 = vmov (!%p3186_p4), 0.0  }
   0xf   : > { %s314_s11 = scalar_select %p313_p3, %s3834_s10, 1 }
  0x10   : > { %322 = sbr.rel (%p3186_p4) target bundleno = 33 (0x21), region = 60  ;;  %324 = vst.msk [vmem:[#allocation2] sm:$0xff] (!%p3186_p4), %vm323_vm0, %v3735_v0  ;;  %325 = vst.msk [vmem:[#allocation2 + $0x8] sm:$0xff] (!%p3186_p4), %vm323_vm0, %v3735_v0  ;;  %vm357_vm3 = vcmask (!%p3186_p4), 60416  }
  0x11   : > { %s3402_s12 = smul.u32 104, %s314_s11  ;;  %326 = vst.msk [vmem:[#allocation2 + $0x10] sm:$0xff] (!%p3186_p4), %vm323_vm0, %v3735_v0  ;;  %327 = vst.msk [vmem:[#allocation2 + $0x18] sm:$0xff] (!%p3186_p4), %vm323_vm0, %v3735_v0 }
  0x12   : > { %328 = vst.msk [vmem:[#allocation2 + $0x20] sm:$0xff] (!%p3186_p4), %vm323_vm0, %v3735_v0  ;;  %329 = vst.msk [vmem:[#allocation2 + $0x28] sm:$0xff] (!%p3186_p4), %vm323_vm0, %v3735_v0 }
  0x13   : > { %s3843_s15 = scalar_lea.vmem %s5402_s0, %s3402_s12  ;;  %330 = vst.msk [vmem:[#allocation2 + $0x30] sm:$0xff] (!%p3186_p4), %vm323_vm0, %v3735_v0  ;;  %331 = vst.msk [vmem:[#allocation2 + $0x38] sm:$0xff] (!%p3186_p4), %vm323_vm0, %v3735_v0 }
  0x14   : > { %332 = vst.msk [vmem:[#allocation2 + $0x40] sm:$0xff] (!%p3186_p4), %vm323_vm0, %v3735_v0  ;;  %333 = vst.msk [vmem:[#allocation2 + $0x48] sm:$0xff] (!%p3186_p4), %vm323_vm0, %v3735_v0 }
  0x15   : > { %334 = vst.msk [vmem:[#allocation2 + $0x50] sm:$0xff] (!%p3186_p4), %vm323_vm0, %v3735_v0  ;;  %335 = vst.msk [vmem:[#allocation2 + $0x58] sm:$0xff] (!%p3186_p4), %vm323_vm0, %v3735_v0 }
  0x16   : > { %336 = vst.msk [vmem:[#allocation2 + $0x60] sm:$0xff] (!%p3186_p4), %vm323_vm0, %v3735_v0  ;;  %337 = vst.msk [vmem:[#allocation2 + $0x68] sm:$0xff] (!%p3186_p4), %vm323_vm0, %v3735_v0 }
  0x17   : > { %338 = vst.msk [vmem:[#allocation2 + $0x70] sm:$0xff] %vm323_vm0, %v3735_v0  ;;  %339 = vst.msk [vmem:[#allocation2 + $0x78] sm:$0xff] %vm323_vm0, %v3735_v0 }
  0x18   : > { %340 = vst.msk [vmem:[#allocation2 + $0x80] sm:$0xff] %vm323_vm0, %v3735_v0  ;;  %341 = vst.msk [vmem:[#allocation2 + $0x88] sm:$0xff] %vm323_vm0, %v3735_v0 }
  0x19   : > { %343 = vst.msk [vmem:[#allocation2 + $0x90] sm:$0xf] %vm342_vm1, %v3735_v0 }
  0x1a   : > { %345 = vst.msk [vmem:[#allocation4] sm:$0xff] %vm344_vm2, %v3735_v0  ;;  %346 = vst.msk [vmem:[#allocation4 + $0x8] sm:$0xff] %vm344_vm2, %v3735_v0 }
  0x1b   : > { %347 = vst.msk [vmem:[#allocation4 + $0x10] sm:$0xff] %vm344_vm2, %v3735_v0  ;;  %348 = vst.msk [vmem:[#allocation4 + $0x18] sm:$0xff] %vm344_vm2, %v3735_v0 }
  0x1c   : > { %349 = vst.msk [vmem:[#allocation4 + $0x20] sm:$0xff] %vm344_vm2, %v3735_v0  ;;  %350 = vst.msk [vmem:[#allocation4 + $0x28] sm:$0xff] %vm344_vm2, %v3735_v0 }
  0x1d   : > { %351 = vst.msk [vmem:[#allocation4 + $0x30] sm:$0xff] %vm344_vm2, %v3735_v0  ;;  %352 = vst.msk [vmem:[#allocation4 + $0x38] sm:$0xff] %vm344_vm2, %v3735_v0 }
  0x1e   : > { %353 = vst.msk [vmem:[#allocation4 + $0x40] sm:$0xff] %vm344_vm2, %v3735_v0  ;;  %354 = vst.msk [vmem:[#allocation4 + $0x48] sm:$0xff] %vm344_vm2, %v3735_v0 }
  0x1f   : > { %355 = vst.msk [vmem:[#allocation4 + $0x50] sm:$0xff] %vm344_vm2, %v3735_v0  ;;  %356 = vst.msk [vmem:[#allocation4 + $0x58] sm:$0xff] %vm344_vm2, %v3735_v0 }
  0x20   : > { %358 = vst.msk [vmem:[#allocation4 + $0x60] sm:$0xf] %vm357_vm3, %v3735_v0 }
  0x21 PF: > { %v3880_v1 = vld [vmem:[%s5406_s4 + $0x10] sm:$0xff]  ;;  %v3885_v2 = vld [vmem:[%s5406_s4] sm:$0xff]  ;;  %v3736_v3 = vmov 0   ;;  %v3892_v4 = vld [vmem:[%s5406_s4 + $0x18] sm:$0xff]  ;;  %vm372_vm4 = vcmask 31744   ;;  %v3737_v25 = vmov 1  }
  0x22   : > { %3455 = vset.pattern.permute.xlu1 %v3736_v3  ;;  %3454 = vset.pattern.permute.xlu0 %v3736_v3  ;;  %v3897_v5 = vld [vmem:[%s5406_s4 + $0x8] sm:$0xff]  ;;  %v3907_v7 = vld [vmem:[%s5406_s4 + $0x20] sm:$0xff]  ;;  %v361_v9 = vld [vmem:[%s3843_s15 + $0x10] sm:$0xff]  ;;  %v3738_v26 = vmov 2   ;;  %v3739_v28 = vmov 3   ;;  %vm491_vm5 = vcmask 97280  }
  0x23   : > { %425 = vperm.xlu1 %3455, %v3880_v1   ;;  %415 = vperm.xlu0 %3454, %v3885_v2   ;;  %v3902_v6 = vld [vmem:[%s5406_s4 + $0x28] sm:$0xff]  ;;  %v359_v8 = vld [vmem:[%s3843_s15] sm:$0xff]  ;;  %375 = vst.msk [vmem:[#allocation2 + $0x28] sm:$0xff] %vm372_vm4, %v361_v9  ;;  %v362_v12 = vld [vmem:[%s3843_s15 + $0x18] sm:$0xff]  ;;  %vm504_vm6 = vcmask 93184   ;;  %s3740_s24 = smov 12  }
  0x24   : > { %373 = vst.msk [vmem:[#allocation2 + $0x18] sm:$0xff] %vm372_vm4, %v359_v8  ;;  %v360_v10 = vld [vmem:[%s3843_s15 + $0x8] sm:$0xff]  ;;  %v363_v11 = vld [vmem:[%s3843_s15 + $0x20] sm:$0xff]  ;;  %376 = vst.msk [vmem:[#allocation2 + $0x30] sm:$0xff] %vm372_vm4, %v362_v12  ;;  %s3741_s25 = smov 24   ;;  %vm636_vm7 = vcmask 195680  }
  0x25   : > { %374 = vst.msk [vmem:[#allocation2 + $0x20] sm:$0xff] %vm372_vm4, %v360_v10  ;;  %377 = vst.msk [vmem:[#allocation2 + $0x38] sm:$0xff] %vm372_vm4, %v363_v11  ;;  %v3924_v13 = vld [vmem:[%s5406_s4 + $0x38] sm:$0xff]  ;;  %v365_v14 = vld [vmem:[%s3843_s15 + $0x30] sm:$0xff]  ;;  %vm649_vm8 = vcmask 191584   ;;  %vm781_vm9 = vcmask 294080  }
  0x26   : > { %v364_v15 = vld [vmem:[%s3843_s15 + $0x28] sm:$0xff]  ;;  %v3933_v16 = vld [vmem:[%s5406_s4 + $0x30] sm:$0xff]  ;;  %379 = vst.msk [vmem:[#allocation2 + $0x48] sm:$0xff] %vm372_vm4, %v365_v14  ;;  %v367_v17 = vld [vmem:[%s3843_s15 + $0x40] sm:$0xff]  ;;  %vm385_vm10 = vcmask 27648   ;;  %vm794_vm11 = vcmask 289984  }
  0x27   : > { %430 = vperm.xlu1 %3455, %v3892_v4   ;;  %420 = vperm.xlu0 %3454, %v3897_v5   ;;  %378 = vst.msk [vmem:[#allocation2 + $0x40] sm:$0xff] %vm372_vm4, %v364_v15  ;;  %381 = vst.msk [vmem:[#allocation2 + $0x58] sm:$0xff] %vm372_vm4, %v367_v17  ;;  %v3944_v18 = vld [vmem:[%s5406_s4 + $0x48] sm:$0xff]  ;;  %v3949_v19 = vld [vmem:[%s5406_s4 + $0x40] sm:$0xff]  ;;  %s3748_s26 = smov 48   ;;  %s3749_s27 = smov 60  }
  0x28   : > { %v366_v20 = vld [vmem:[%s3843_s15 + $0x38] sm:$0xff]  ;;  %v368_v21 = vld [vmem:[%s3843_s15 + $0x48] sm:$0xff]  ;;  %v3965_v23 = vld [vmem:[%s5406_s4 + $0x50] sm:$0xff]  ;;  %s3750_s28 = smov 72   ;;  %s3751_s29 = smov 84   ;;  %vm926_vm12 = vcmask 392480  }
  0x29   : > { %380 = vst.msk [vmem:[#allocation2 + $0x50] sm:$0xff] %vm372_vm4, %v366_v20  ;;  %382 = vst.msk [vmem:[#allocation2 + $0x60] sm:$0xff] %vm372_vm4, %v368_v21  ;;  %v3960_v22 = vld [vmem:[%s5406_s4 + $0x58] sm:$0xff]  ;;  %v3972_v24 = vld [vmem:[%s5406_s4 + $0x60] sm:$0xf]  ;;  %s3752_s11 = smov 96  }
  0x2a   : > { %v369_v27 = vld [vmem:[%s3843_s15 + $0x50] sm:$0xff]  ;;  %v400_v30 = vld [vmem:[#allocation2] sm:$0xff]  ;;  %v4011_v36 = vld [vmem:[#allocation2 + $0x8] sm:$0xff]  ;;  %vm1770_vm13 = vcmask 1045504   ;;  %vm3754_vm14 = vmmov 0   ;;  %vm1071_vm15 = vcmask 490880  }
  0x2b   : > { %440 = vperm.xlu1 %3455, %v3902_v6   ;;  %435 = vperm.xlu0 %3454, %v3907_v7   ;;  %383 = vst.msk [vmem:[#allocation2 + $0x68] sm:$0xff] %vm372_vm4, %v369_v27  ;;  %v4006_v29 = vld [vmem:[#allocation2 + $0x10] sm:$0xff]  ;;  %v4009_v35 = vld [vmem:[#allocation2 + $0x18] sm:$0xff]  ;;  %v4017_v41 = vld [vmem:[#allocation2 + $0x28] sm:$0xff]  ;;  %vm1216_vm0 = vcmask 589280   ;;  %vm1361_vm1 = vcmask 687680  }
  0x2c   : > { %v4019_v42 = vld [vmem:[#allocation2 + $0x20] sm:$0xff]  ;;  %v4025_v47 = vld [vmem:[#allocation2 + $0x38] sm:$0xff]  ;;  %v4027_v48 = vld [vmem:[#allocation2 + $0x30] sm:$0xff]  ;;  %vm1506_vm2 = vcmask 786080   ;;  %vm1651_vm3 = vcmask 884480   ;;  %s3756_s14 = smov 8  }
  0x2d   : > { %v4033_v53 = vld [vmem:[#allocation2 + $0x48] sm:$0xff]  ;;  %v4051_v14 = vld [vmem:[#allocation2 + $0x14] sm:$0xff]  ;;  %s3758_s18 = smov 120   ;;  %s3759_s19 = smov 108  }
  0x2e   : > { %v4035_v54 = vld [vmem:[#allocation2 + $0x40] sm:$0xff]  ;;  %v4041_v59 = vld [vmem:[#allocation2 + $0x58] sm:$0xff]  ;;  %v507_v15 = vld [vmem:[#allocation2 + $0xc] sm:$0xff]  ;;  %p3267_p5 = scmp.ne.s32.totalorder %s3834_s10, 1 }
  0x2f   : > { %450 = vperm.xlu1 %3455, %v3924_v13   ;;  %445 = vperm.xlu0 %3454, %v3933_v16   ;;  %v506_v8 = vld [vmem:[#allocation2 + $0x4] sm:$0xff]  ;;  %s3760_s20 = smov (!%p3267_p5), 104   ;;  %s3761_s21 = smov (!%p3267_p5), 120  }
  0x30   : > { %v4043_v60 = vld [vmem:[#allocation2 + $0x50] sm:$0xff]  ;;  %v412_v3 = vld [vmem:[#allocation2 + $0x60] sm:$0xf]  ;;  %v4057_v27 = vld [vmem:[#allocation2 + $0x24] sm:$0xff]  ;;  %s3765_s17 = smov (!%p3267_p5), 16   ;;  %s3767_s10 = smov (!%p3267_p5), 32  }
  0x31   : > { %s3769_s16 = smov (!%p3267_p5), 48   ;;  %s3770_s23 = smov (!%p3267_p5), 56  }
  0x32   : > { %s3775_s12 = smov (!%p3267_p5), 96  }
  0x33   : > { %460 = vperm.xlu1 %3455, %v3944_v18   ;;  %455 = vperm.xlu0 %3454, %v3949_v19  }
  0x37   : > { %470 = vperm.xlu1 %3455, %v3960_v22   ;;  %465 = vperm.xlu0 %3454, %v3965_v23  }
  0x3b   : > { %3456 = vset.pattern.permute.xlu1 %v3737_v25  ;;  %475 = vperm.xlu0 %3454, %v3972_v24  }
  0x3c   : > { %520 = vperm.xlu1 %3456, %v3885_v2  }
  0x3f   : > { %3457 = vset.pattern.permute.xlu0 %v3737_v25 }
  0x40   : > { %528 = vperm.xlu1 %3456, %v3880_v1   ;;  %524 = vperm.xlu0 %3457, %v3897_v5  }
  0x44   : > { %532 = vperm.xlu1 %3456, %v3892_v4   ;;  %536 = vperm.xlu0 %3457, %v3907_v7  }
  0x48   : > { %540 = vperm.xlu1 %3456, %v3902_v6   ;;  %544 = vperm.xlu0 %3457, %v3933_v16  }
  0x4c   : > { %548 = vperm.xlu1 %3456, %v3924_v13   ;;  %552 = vperm.xlu0 %3457, %v3949_v19  }
  0x50   : > { %556 = vperm.xlu1 %3456, %v3944_v18   ;;  %560 = vperm.xlu0 %3457, %v3965_v23  }
  0x54   : > { %564 = vperm.xlu1 %3456, %v3960_v22   ;;  %568 = vperm.xlu0 %3457, %v3972_v24  }
  0x58   : > { %3459 = vset.pattern.permute.xlu1 %v3738_v26  ;;  %3458 = vset.pattern.permute.xlu0 %v3738_v26  ;;  %v4055_v26 = vld [vmem:[#allocation2 + $0x1c] sm:$0xff] }
  0x59   : > { %669 = vperm.xlu1 %3459, %v3897_v5   ;;  %665 = vperm.xlu0 %3458, %v3885_v2  }
  0x5d   : > { %673 = vperm.xlu1 %3459, %v3880_v1   ;;  %677 = vperm.xlu0 %3458, %v3892_v4  }
  0x61   : > { %681 = vperm.xlu1 %3459, %v3907_v7   ;;  %685 = vperm.xlu0 %3458, %v3902_v6  }
  0x65   : > { %689 = vperm.xlu1 %3459, %v3933_v16   ;;  %693 = vperm.xlu0 %3458, %v3924_v13  }
  0x69   : > { %697 = vperm.xlu1 %3459, %v3949_v19   ;;  %701 = vperm.xlu0 %3458, %v3944_v18  }
  0x6d   : > { %705 = vperm.xlu1 %3459, %v3965_v23   ;;  %709 = vperm.xlu0 %3458, %v3960_v22  }
  0x71   : > { %713 = vperm.xlu1 %3459, %v3972_v24   ;;  %3461 = vset.pattern.permute.xlu0 %v3739_v28 }
  0x75   : > { %3460 = vset.pattern.permute.xlu1 %v3739_v28 }
  0x76   : > { %810 = vperm.xlu1 %3460, %v3885_v2  }
  0xa2   : > { %v426_v31 = vpop.permute.xlu1 %425  ;;  %v416_v32 = vpop.permute.xlu0 %415 }
  0xa3   : > { %v480_v33 = vmul.f32 %v426_v31, %v4006_v29  ;;  %v478_v34 = vmul.f32 %v416_v32, %v400_v30 }
  0xa5   : > { %494 = vst.msk [vmem:[#allocation3 + $0x10] sm:$0xff] %vm491_vm5, %v480_v33  ;;  %492 = vst.msk [vmem:[#allocation3] sm:$0xff] %vm491_vm5, %v478_v34  ;;  %v4063_v34 = vld [vmem:[#allocation2 + $0x2c] sm:$0xff] }
  0xa6   : > { %v431_v37 = vpop.permute.xlu1 %430  ;;  %v421_v38 = vpop.permute.xlu0 %420 }
  0xa7   : > { %v481_v39 = vmul.f32 %v431_v37, %v4009_v35  ;;  %v479_v40 = vmul.f32 %v421_v38, %v4011_v36  ;;  %v4065_v37 = vld [vmem:[#allocation2 + $0x34] sm:$0xff] }
  0xa9   : > { %495 = vst.msk [vmem:[#allocation3 + $0x18] sm:$0xff] %vm491_vm5, %v481_v39  ;;  %493 = vst.msk [vmem:[#allocation3 + $0x8] sm:$0xff] %vm491_vm5, %v479_v40 }
  0xaa   : > { %v441_v43 = vpop.permute.xlu1 %440  ;;  %v436_v44 = vpop.permute.xlu0 %435 }
  0xab   : > { %v483_v45 = vmul.f32 %v441_v43, %v4017_v41  ;;  %v482_v46 = vmul.f32 %v436_v44, %v4019_v42  ;;  %v4071_v44 = vld [vmem:[#allocation2 + $0x3c] sm:$0xff] }
  0xad   : > { %497 = vst.msk [vmem:[#allocation3 + $0x28] sm:$0xff] %vm491_vm5, %v483_v45  ;;  %496 = vst.msk [vmem:[#allocation3 + $0x20] sm:$0xff] %vm491_vm5, %v482_v46  ;;  %v4073_v45 = vld [vmem:[#allocation2 + $0x44] sm:$0xff] }
  0xae   : > { %v451_v49 = vpop.permute.xlu1 %450  ;;  %v446_v50 = vpop.permute.xlu0 %445 }
  0xaf   : > { %v485_v51 = vmul.f32 %v451_v49, %v4025_v47  ;;  %v484_v52 = vmul.f32 %v446_v50, %v4027_v48 }
  0xb1   : > { %499 = vst.msk [vmem:[#allocation3 + $0x38] sm:$0xff] %vm491_vm5, %v485_v51  ;;  %498 = vst.msk [vmem:[#allocation3 + $0x30] sm:$0xff] %vm491_vm5, %v484_v52  ;;  %v4079_v52 = vld [vmem:[#allocation2 + $0x4c] sm:$0xff] }
  0xb2   : > { %v461_v55 = vpop.permute.xlu1 %460  ;;  %v456_v56 = vpop.permute.xlu0 %455 }
  0xb3   : > { %v487_v57 = vmul.f32 %v461_v55, %v4033_v53  ;;  %v486_v58 = vmul.f32 %v456_v56, %v4035_v54  ;;  %v4081_v55 = vld [vmem:[#allocation2 + $0x54] sm:$0xff] }
  0xb5   : > { %501 = vst.msk [vmem:[#allocation3 + $0x48] sm:$0xff] %vm491_vm5, %v487_v57  ;;  %500 = vst.msk [vmem:[#allocation3 + $0x40] sm:$0xff] %vm491_vm5, %v486_v58 }
  0xb6   : > { %v471_v61 = vpop.permute.xlu1 %470  ;;  %v466_v62 = vpop.permute.xlu0 %465 }
  0xb7   : > { %v489_v63 = vmul.f32 %v471_v61, %v4041_v59  ;;  %v488_v0 = vmul.f32 %v466_v62, %v4043_v60  ;;  %v4087_v62 = vld [vmem:[#allocation2 + $0x5c] sm:$0xff] }
  0xb9   : > { %503 = vst.msk [vmem:[#allocation3 + $0x58] sm:$0xff] %vm491_vm5, %v489_v63  ;;  %502 = vst.msk [vmem:[#allocation3 + $0x50] sm:$0xff] %vm491_vm5, %v488_v0  ;;  %v518_v63 = vld [vmem:[#allocation2 + $0x64] sm:$0xf]  ;;  %vm939_vm5 = vcmask 388384  }
  0xba   : > { %v476_v9 = vpop.permute.xlu0 %475 }
  0xbb   : > { %v490_v10 = vmul.f32 %v476_v9, %v412_v3  ;;  %v521_v11 = vpop.permute.xlu1 %520 }
  0xbc   : > { %v571_v12 = vmul.f32 %v521_v11, %v506_v8 }
  0xbd   : > { %505 = vst.msk [vmem:[#allocation3 + $0x60] sm:$0xf] %vm504_vm6, %v490_v10  ;;  %vm1084_vm6 = vcmask 486784  }
  0xbe   : > { %597 = vrot.lane.b32.xlu1 %v571_v12, %s3740_s24 }
  0xbf   : > { %v529_v17 = vpop.permute.xlu1 %528  ;;  %v525_v20 = vpop.permute.xlu0 %524 }
  0xc0   : > { %v573_v21 = vmul.f32 %v529_v17, %v4051_v14  ;;  %v572_v25 = vmul.f32 %v525_v20, %v507_v15 }
  0xc2   : > { %599 = vrot.lane.b32.xlu0 %v572_v25, %s3740_s24  ;;  %601 = vrot.lane.b32.xlu1 %v573_v21, %s3740_s24 }
  0xc3   : > { %v533_v30 = vpop.permute.xlu1 %532  ;;  %v537_v31 = vpop.permute.xlu0 %536 }
  0xc4   : > { %v574_v32 = vmul.f32 %v533_v30, %v4055_v26  ;;  %v575_v33 = vmul.f32 %v537_v31, %v4057_v27 }
  0xc6   : > { %603 = vrot.lane.b32.xlu0 %v574_v32, %s3740_s24  ;;  %605 = vrot.lane.b32.xlu1 %v575_v33, %s3740_s24 }
  0xc7   : > { %v541_v38 = vpop.permute.xlu1 %540  ;;  %v545_v39 = vpop.permute.xlu0 %544 }
  0xc8   : > { %v576_v40 = vmul.f32 %v541_v38, %v4063_v34  ;;  %v577_v43 = vmul.f32 %v545_v39, %v4065_v37 }
  0xca   : > { %607 = vrot.lane.b32.xlu0 %v576_v40, %s3740_s24  ;;  %609 = vrot.lane.b32.xlu1 %v577_v43, %s3740_s24 }
  0xcb   : > { %v549_v46 = vpop.permute.xlu1 %548  ;;  %v553_v49 = vpop.permute.xlu0 %552 }
  0xcc   : > { %v578_v50 = vmul.f32 %v549_v46, %v4071_v44  ;;  %v579_v51 = vmul.f32 %v553_v49, %v4073_v45 }
  0xce   : > { %611 = vrot.lane.b32.xlu0 %v578_v50, %s3740_s24  ;;  %613 = vrot.lane.b32.xlu1 %v579_v51, %s3740_s24  ;;  %v4112_v50 = vld [vmem:[#allocation2 + $0x60] sm:$0xff] }
  0xcf   : > { %v557_v56 = vpop.permute.xlu1 %556  ;;  %v561_v57 = vpop.permute.xlu0 %560 }
  0xd0   : > { %v580_v58 = vmul.f32 %v557_v56, %v4079_v52  ;;  %v581_v61 = vmul.f32 %v561_v57, %v4081_v55 }
  0xd2   : > { %615 = vrot.lane.b32.xlu0 %v580_v58, %s3740_s24  ;;  %617 = vrot.lane.b32.xlu1 %v581_v61, %s3740_s24  ;;  %v663_v61 = vld [vmem:[#allocation2 + $0x68] sm:$0xf] }
  0xd3   : > { %v565_v0 = vpop.permute.xlu1 %564  ;;  %v569_v3 = vpop.permute.xlu0 %568 }
  0xd4   : > { %v582_v8 = vmul.f32 %v565_v0, %v4087_v62  ;;  %v583_v9 = vmul.f32 %v569_v3, %v518_v63  ;;  %v3743_v3 = vmov 5  }
  0xd6   : > { %619 = vrot.lane.b32.xlu0 %v582_v8, %s3740_s24  ;;  %621 = vrot.lane.b32.xlu1 %v583_v9, %s3740_s24  ;;  %v3744_v8 = vmov 6   ;;  %v370_v9 = vld [vmem:[%s3843_s15 + $0x58] sm:$0xff]  ;;  %s3771_s24 = smov (!%p3267_p5), 64  }
  0xd7   : > { %384 = vst.msk [vmem:[#allocation2 + $0x70] sm:$0xff] %vm372_vm4, %v370_v9  ;;  %vm1748_vm4 = vcmask 883712  }
  0xd8   : > { %v670_v10 = vpop.permute.xlu1 %669  ;;  %v666_v11 = vpop.permute.xlu0 %665 }
  0xd9   : > { %v717_v12 = vmul.f32 %v670_v10, %v4006_v29  ;;  %v716_v15 = vmul.f32 %v666_v11, %v4011_v36  ;;  %v5412_v10 = vmov 7   ;;  %v3746_v11 = vmov 8  }
  0xdb   : > { %742 = vrot.lane.b32.xlu0 %v716_v15, %s3741_s25  ;;  %744 = vrot.lane.b32.xlu1 %v717_v12, %s3741_s25 }
  0xdc   : > { %v674_v17 = vpop.permute.xlu1 %673  ;;  %v678_v20 = vpop.permute.xlu0 %677 }
  0xdd   : > { %v718_v21 = vmul.f32 %v674_v17, %v4009_v35  ;;  %v719_v25 = vmul.f32 %v678_v20, %v4019_v42 }
  0xdf   : > { %746 = vrot.lane.b32.xlu0 %v718_v21, %s3741_s25  ;;  %748 = vrot.lane.b32.xlu1 %v719_v25, %s3741_s25 }
  0xe0   : > { %v682_v30 = vpop.permute.xlu1 %681  ;;  %v686_v31 = vpop.permute.xlu0 %685 }
  0xe1   : > { %v720_v29 = vmul.f32 %v682_v30, %v4017_v41  ;;  %v721_v36 = vmul.f32 %v686_v31, %v4027_v48 }
  0xe3   : > { %750 = vrot.lane.b32.xlu0 %v720_v29, %s3741_s25  ;;  %752 = vrot.lane.b32.xlu1 %v721_v36, %s3741_s25 }
  0xe4   : > { %v690_v32 = vpop.permute.xlu1 %689  ;;  %v694_v33 = vpop.permute.xlu0 %693 }
  0xe5   : > { %v722_v38 = vmul.f32 %v690_v32, %v4025_v47  ;;  %v723_v39 = vmul.f32 %v694_v33, %v4035_v54 }
  0xe7   : > { %754 = vrot.lane.b32.xlu0 %v722_v38, %s3741_s25  ;;  %756 = vrot.lane.b32.xlu1 %v723_v39, %s3741_s25 }
  0xe8   : > { %v698_v40 = vpop.permute.xlu1 %697  ;;  %v702_v43 = vpop.permute.xlu0 %701 }
  0xe9   : > { %v724_v46 = vmul.f32 %v698_v40, %v4033_v53  ;;  %v725_v49 = vmul.f32 %v702_v43, %v4043_v60  ;;  %v3742_v60 = vmov 4  }
  0xeb   : > { %758 = vrot.lane.b32.xlu0 %v724_v46, %s3741_s25  ;;  %760 = vrot.lane.b32.xlu1 %v725_v49, %s3741_s25  ;;  %v371_v46 = vld [vmem:[%s3843_s15 + $0x60] sm:$0xf]  ;;  %s3747_s15 = smov 36  }
  0xec   : > { %v706_v51 = vpop.permute.xlu1 %705  ;;  %v710_v56 = vpop.permute.xlu0 %709  ;;  %386 = vst.msk [vmem:[#allocation2 + $0x78] sm:$0xf] %vm385_vm10, %v371_v46  ;;  %vm1664_vm10 = vcmask 880384  }
  0xed   : > { %v726_v57 = vmul.f32 %v706_v51, %v4041_v59  ;;  %v727_v58 = vmul.f32 %v710_v56, %v4112_v50 }
  0xef   : > { %762 = vrot.lane.b32.xlu0 %v726_v57, %s3741_s25  ;;  %764 = vrot.lane.b32.xlu1 %v727_v58, %s3741_s25 }
  0xf0   : > { %v714_v63 = vpop.permute.xlu1 %713 }
  0xf1   : > { %v728_v0 = vmul.f32 %v714_v63, %v663_v61 }
  0xf3   : > { %766 = vrot.lane.b32.xlu0 %v728_v0, %s3741_s25  ;;  %818 = vperm.xlu1 %3460, %v3880_v1  }
  0xf5   : > { %v4157_v12 = vpop.permute.xlu1 %810 }
  0xf7   : > { %814 = vperm.xlu0 %3461, %v3897_v5   ;;  %822 = vperm.xlu1 %3460, %v3892_v4  }
  0xfb   : > { %826 = vperm.xlu0 %3461, %v3907_v7   ;;  %830 = vperm.xlu1 %3460, %v3902_v6  }
  0xff   : > { %834 = vperm.xlu0 %3461, %v3933_v16   ;;  %838 = vperm.xlu1 %3460, %v3924_v13  }
 0x103   : > { %842 = vperm.xlu0 %3461, %v3949_v19   ;;  %846 = vperm.xlu1 %3460, %v3944_v18  }
 0x107   : > { %850 = vperm.xlu0 %3461, %v3965_v23   ;;  %3462 = vset.pattern.permute.xlu1 %v3742_v60 }
 0x108   : > { %955 = vperm.xlu1 %3462, %v3885_v2  }
 0x10b   : > { %3463 = vset.pattern.permute.xlu0 %v3742_v60 }
 0x10c   : > { %959 = vperm.xlu0 %3463, %v3897_v5   ;;  %3464 = vset.pattern.permute.xlu1 %v3743_v3 }
 0x10d   : > { %1100 = vperm.xlu1 %3464, %v3885_v2  }
 0x110   : > { %963 = vperm.xlu0 %3463, %v3880_v1  }
 0x111   : > { %1104 = vperm.xlu1 %3464, %v3897_v5  }
 0x114   : > { %971 = vperm.xlu0 %3463, %v3907_v7  }
 0x115   : > { %3465 = vset.pattern.permute.xlu1 %v3744_v8 }
 0x116   : > { %1249 = vperm.xlu1 %3465, %v3897_v5  }
 0x118   : > { %999 = vperm.xlu0 %3463, %v3960_v22  }
 0x11a   : > { %3466 = vset.pattern.permute.xlu1 %v5412_v10 }
 0x11b   : > { %1390 = vperm.xlu1 %3466, %v3885_v2  }
 0x11c   : > { %979 = vperm.xlu0 %3463, %v3933_v16  }
 0x11f   : > { %3467 = vset.pattern.permute.xlu1 %v3746_v11 }
 0x120   : > { %3489 = vset.pattern.permute.xlu0 %v3743_v3  ;;  %1535 = vperm.xlu1 %3467, %v3885_v2  }
 0x121   : > { %1112 = vperm.xlu0 %3489, %v3892_v4  }
 0x124   : > { %1539 = vperm.xlu1 %3467, %v3897_v5  }
 0x125   : > { %1136 = vperm.xlu0 %3489, %v3944_v18  }
 0x128   : > { %3468 = vset.pattern.permute.xlu1 %v3742_v60 }
 0x129   : > { %1116 = vperm.xlu0 %3489, %v3907_v7   ;;  %967 = vperm.xlu1 %3468, %v3892_v4  }
 0x12d   : > { %1140 = vperm.xlu0 %3489, %v3965_v23   ;;  %3469 = vset.pattern.permute.xlu1 %v3743_v3 }
 0x12e   : > { %1108 = vperm.xlu1 %3469, %v3880_v1  }
 0x130   : > { %v598_v15 = vpop.permute.xlu1 %597 }
 0x131   : > { %637 = vst.msk [vmem:[#allocation3] sm:$0xff] %vm636_vm7, %v598_v15  ;;  %1124 = vperm.xlu0 %3489, %v3933_v16  }
 0x132   : > { %3470 = vset.pattern.permute.xlu1 %v3742_v60 }
 0x133   : > { %987 = vperm.xlu1 %3470, %v3949_v19  }
 0x134   : > { %v600_v17 = vpop.permute.xlu0 %599  ;;  %v602_v20 = vpop.permute.xlu1 %601 }
 0x135   : > { %638 = vst.msk [vmem:[#allocation3 + $0x8] sm:$0xff] %vm636_vm7, %v600_v17  ;;  %639 = vst.msk [vmem:[#allocation3 + $0x10] sm:$0xff] %vm636_vm7, %v602_v20  ;;  %3492 = vset.pattern.permute.xlu0 %v3744_v8 }
 0x136   : > { %1245 = vperm.xlu0 %3492, %v3885_v2  }
 0x137   : > { %991 = vperm.xlu1 %3470, %v3944_v18  }
 0x138   : > { %v604_v21 = vpop.permute.xlu0 %603  ;;  %v606_v25 = vpop.permute.xlu1 %605 }
 0x139   : > { %640 = vst.msk [vmem:[#allocation3 + $0x18] sm:$0xff] %vm636_vm7, %v604_v21  ;;  %641 = vst.msk [vmem:[#allocation3 + $0x20] sm:$0xff] %vm636_vm7, %v606_v25 }
 0x13a   : > { %1253 = vperm.xlu0 %3492, %v3880_v1  }
 0x13b   : > { %3471 = vset.pattern.permute.xlu1 %v3744_v8 }
 0x13c   : > { %v608_v30 = vpop.permute.xlu0 %607  ;;  %1257 = vperm.xlu1 %3471, %v3892_v4   ;;  %v610_v31 = vpop.permute.xlu1 %609 }
 0x13d   : > { %642 = vst.msk [vmem:[#allocation3 + $0x28] sm:$0xff] %vm636_vm7, %v608_v30  ;;  %643 = vst.msk [vmem:[#allocation3 + $0x30] sm:$0xff] %vm636_vm7, %v610_v31 }
 0x13e   : > { %1277 = vperm.xlu0 %3492, %v3949_v19  }
 0x140   : > { %v612_v2 = vpop.permute.xlu0 %611  ;;  %3472 = vset.pattern.permute.xlu1 %v3743_v3  ;;  %v614_v29 = vpop.permute.xlu1 %613 }
 0x141   : > { %644 = vst.msk [vmem:[#allocation3 + $0x38] sm:$0xff] %vm636_vm7, %v612_v2  ;;  %645 = vst.msk [vmem:[#allocation3 + $0x40] sm:$0xff] %vm636_vm7, %v614_v29  ;;  %1132 = vperm.xlu1 %3472, %v3949_v19  }
 0x142   : > { %1269 = vperm.xlu0 %3492, %v3933_v16  }
 0x144   : > { %v616_v36 = vpop.permute.xlu0 %615  ;;  %v618_v32 = vpop.permute.xlu1 %617 }
 0x145   : > { %646 = vst.msk [vmem:[#allocation3 + $0x48] sm:$0xff] %vm636_vm7, %v616_v36  ;;  %647 = vst.msk [vmem:[#allocation3 + $0x50] sm:$0xff] %vm636_vm7, %v618_v32  ;;  %3473 = vset.pattern.permute.xlu1 %v5412_v10 }
 0x146   : > { %3495 = vset.pattern.permute.xlu0 %v5412_v10  ;;  %1398 = vperm.xlu1 %3473, %v3880_v1  }
 0x147   : > { %1394 = vperm.xlu0 %3495, %v3897_v5  }
 0x148   : > { %v620_v33 = vpop.permute.xlu0 %619  ;;  %v622_v38 = vpop.permute.xlu1 %621 }
 0x149   : > { %648 = vst.msk [vmem:[#allocation3 + $0x58] sm:$0xff] %vm636_vm7, %v620_v33  ;;  %vm1229_vm7 = vcmask 585184  }
 0x14a   : > { %650 = vst.msk [vmem:[#allocation3 + $0x60] sm:$0xf] %vm649_vm8, %v622_v38  ;;  %1402 = vperm.xlu1 %3473, %v3892_v4   ;;  %vm1374_vm8 = vcmask 683584  }
 0x14b   : > { %1410 = vperm.xlu0 %3495, %v3902_v6  }
 0x14d   : > { %v743_v39 = vpop.permute.xlu0 %742  ;;  %v745_v40 = vpop.permute.xlu1 %744 }
 0x14e   : > { %782 = vst.msk [vmem:[#allocation3] sm:$0xff] %vm781_vm9, %v743_v39  ;;  %783 = vst.msk [vmem:[#allocation3 + $0x8] sm:$0xff] %vm781_vm9, %v745_v40  ;;  %3474 = vset.pattern.permute.xlu1 %v3744_v8 }
 0x14f   : > { %1281 = vperm.xlu1 %3474, %v3944_v18   ;;  %1434 = vperm.xlu0 %3495, %v3960_v22  }
 0x151   : > { %v747_v5 = vpop.permute.xlu0 %746  ;;  %v749_v43 = vpop.permute.xlu1 %748 }
 0x152   : > { %784 = vst.msk [vmem:[#allocation3 + $0x10] sm:$0xff] %vm781_vm9, %v747_v5  ;;  %785 = vst.msk [vmem:[#allocation3 + $0x18] sm:$0xff] %vm781_vm9, %v749_v43 }
 0x153   : > { %3475 = vset.pattern.permute.xlu1 %v3746_v11  ;;  %1414 = vperm.xlu0 %3495, %v3933_v16  }
 0x154   : > { %1543 = vperm.xlu1 %3475, %v3880_v1  }
 0x155   : > { %v751_v49 = vpop.permute.xlu0 %750  ;;  %v753_v51 = vpop.permute.xlu1 %752 }
 0x156   : > { %786 = vst.msk [vmem:[#allocation3 + $0x20] sm:$0xff] %vm781_vm9, %v751_v49  ;;  %787 = vst.msk [vmem:[#allocation3 + $0x28] sm:$0xff] %vm781_vm9, %v753_v51 }
 0x157   : > { %3498 = vset.pattern.permute.xlu0 %v3746_v11 }
 0x158   : > { %3476 = vset.pattern.permute.xlu1 %v5412_v10  ;;  %1547 = vperm.xlu0 %3498, %v3892_v4  }
 0x159   : > { %v755_v56 = vpop.permute.xlu0 %754  ;;  %1422 = vperm.xlu1 %3476, %v3949_v19   ;;  %v757_v57 = vpop.permute.xlu1 %756 }
 0x15a   : > { %788 = vst.msk [vmem:[#allocation3 + $0x30] sm:$0xff] %vm781_vm9, %v755_v56  ;;  %789 = vst.msk [vmem:[#allocation3 + $0x38] sm:$0xff] %vm781_vm9, %v757_v57 }
 0x15c   : > { %1567 = vperm.xlu0 %3498, %v3949_v19  }
 0x15d   : > { %v759_v1 = vpop.permute.xlu0 %758  ;;  %1426 = vperm.xlu1 %3476, %v3944_v18   ;;  %v761_v58 = vpop.permute.xlu1 %760 }
 0x15e   : > { %790 = vst.msk [vmem:[#allocation3 + $0x40] sm:$0xff] %vm781_vm9, %v759_v1  ;;  %791 = vst.msk [vmem:[#allocation3 + $0x48] sm:$0xff] %vm781_vm9, %v761_v58 }
 0x160   : > { %1551 = vperm.xlu0 %3498, %v3907_v7  }
 0x161   : > { %v763_v4 = vpop.permute.xlu0 %762  ;;  %3477 = vset.pattern.permute.xlu1 %v3746_v11  ;;  %v765_v61 = vpop.permute.xlu1 %764 }
 0x162   : > { %792 = vst.msk [vmem:[#allocation3 + $0x50] sm:$0xff] %vm781_vm9, %v763_v4  ;;  %793 = vst.msk [vmem:[#allocation3 + $0x58] sm:$0xff] %vm781_vm9, %v765_v61  ;;  %1571 = vperm.xlu1 %3477, %v3944_v18   ;;  %vm1519_vm9 = vcmask 781984  }
 0x164   : > { %1559 = vperm.xlu0 %3498, %v3933_v16  }
 0x165   : > { %v767_v19 = vpop.permute.xlu0 %766 }
 0x166   : > { %795 = vst.msk [vmem:[#allocation3 + $0x60] sm:$0xf] %vm794_vm11, %v767_v19  ;;  %3478 = vset.pattern.permute.xlu1 %v3742_v60  ;;  %vm2722_vm11 = vcmask 64512  }
 0x167   : > { %975 = vperm.xlu1 %3478, %v3902_v6  }
 0x168   : > { %1583 = vperm.xlu0 %3498, %v3972_v24  }
 0x16b   : > { %3479 = vset.pattern.permute.xlu1 %v3739_v28 }
 0x16c   : > { %854 = vperm.xlu1 %3479, %v3960_v22  }
 0x170   : > { %3480 = vset.pattern.permute.xlu1 %v3743_v3 }
 0x171   : > { %1120 = vperm.xlu1 %3480, %v3902_v6  }
 0x172   : > { %v4229_v18 = vpop.permute.xlu1 %818 }
 0x175   : > { %3481 = vset.pattern.permute.xlu1 %v3742_v60 }
 0x176   : > { %995 = vperm.xlu1 %3481, %v3965_v23   ;;  %v4233_v16 = vpop.permute.xlu1 %822  ;;  %v815_v63 = vpop.permute.xlu0 %814 }
 0x177   : > { %v862_v0 = vmul.f32 %v815_v63, %v4055_v26 }
 0x179   : > { %889 = vrot.lane.b32.xlu0 %v862_v0, %s3747_s15 }
 0x17a   : > { %3482 = vset.pattern.permute.xlu1 %v3744_v8  ;;  %v4238_v9 = vpop.permute.xlu1 %830  ;;  %v4240_v15 = vpop.permute.xlu0 %826 }
 0x17b   : > { %1261 = vperm.xlu1 %3482, %v3907_v7  }
 0x17e   : > { %v4243_v17 = vpop.permute.xlu1 %838  ;;  %v4245_v20 = vpop.permute.xlu0 %834 }
 0x17f   : > { %1265 = vperm.xlu1 %3482, %v3902_v6  }
 0x182   : > { %v4248_v21 = vpop.permute.xlu1 %846  ;;  %v4250_v25 = vpop.permute.xlu0 %842 }
 0x183   : > { %3483 = vset.pattern.permute.xlu1 %v3743_v3 }
 0x184   : > { %1144 = vperm.xlu1 %3483, %v3960_v22  }
 0x186   : > { %v4254_v30 = vpop.permute.xlu0 %850 }
 0x187   : > { %v4256_v31 = vpop.permute.xlu1 %955 }
 0x188   : > { %3484 = vset.pattern.permute.xlu1 %v5412_v10 }
 0x189   : > { %1406 = vperm.xlu1 %3484, %v3907_v7  }
 0x18b   : > { %v960_v2 = vpop.permute.xlu0 %959 }
 0x18c   : > { %v1007_v29 = vmul.f32 %v960_v2, %v4019_v42  ;;  %v4261_v36 = vpop.permute.xlu1 %1100 }
 0x18d   : > { %3485 = vset.pattern.permute.xlu1 %v3744_v8 }
 0x18e   : > { %1285 = vperm.xlu1 %3485, %v3965_v23   ;;  %1034 = vrot.lane.b32.xlu0 %v1007_v29, %s3748_s26 }
 0x18f   : > { %v4266_v32 = vpop.permute.xlu0 %963 }
 0x190   : > { %v1105_v33 = vpop.permute.xlu1 %1104 }
 0x191   : > { %v1152_v38 = vmul.f32 %v1105_v33, %v4057_v27 }
 0x192   : > { %1289 = vperm.xlu1 %3485, %v3960_v22  }
 0x193   : > { %1179 = vrot.lane.b32.xlu0 %v1152_v38, %s3749_s27  ;;  %v4271_v7 = vpop.permute.xlu0 %971 }
 0x195   : > { %v1250_v42 = vpop.permute.xlu1 %1249 }
 0x196   : > { %v1297_v39 = vmul.f32 %v1250_v42, %v4027_v48  ;;  %3486 = vset.pattern.permute.xlu1 %v3746_v11 }
 0x197   : > { %1555 = vperm.xlu1 %3486, %v3902_v6   ;;  %v4276_v40 = vpop.permute.xlu0 %999 }
 0x198   : > { %1324 = vrot.lane.b32.xlu0 %v1297_v39, %s3750_s28 }
 0x19a   : > { %v4279_v5 = vpop.permute.xlu1 %1390 }
 0x19b   : > { %3487 = vset.pattern.permute.xlu1 %v5412_v10  ;;  %v4282_v43 = vpop.permute.xlu0 %979 }
 0x19c   : > { %1430 = vperm.xlu1 %3487, %v3965_v23  }
 0x19f   : > { %v4285_v46 = vpop.permute.xlu1 %1535 }
 0x1a0   : > { %3488 = vset.pattern.permute.xlu1 %v3746_v11  ;;  %v1113_v49 = vpop.permute.xlu0 %1112 }
 0x1a1   : > { %1575 = vperm.xlu1 %3488, %v3965_v23  }
 0x1a3   : > { %v1540_v6 = vpop.permute.xlu1 %1539 }
 0x1a4   : > { %v4289_v51 = vpop.permute.xlu0 %1136 }
 0x1a5   : > { %1579 = vperm.xlu1 %3488, %v3960_v22  }
 0x1a8   : > { %v968_v56 = vpop.permute.xlu1 %967  ;;  %v4292_v57 = vpop.permute.xlu0 %1116 }
 0x1a9   : > { %3490 = vset.pattern.permute.xlu1 %v3742_v60 }
 0x1aa   : > { %983 = vperm.xlu1 %3490, %v3924_v13  }
 0x1ac   : > { %v4296_v1 = vpop.permute.xlu0 %1140 }
 0x1ad   : > { %v4298_v58 = vpop.permute.xlu1 %1108 }
 0x1ae   : > { %3491 = vset.pattern.permute.xlu1 %v3739_v28 }
 0x1af   : > { %858 = vperm.xlu1 %3491, %v3972_v24  }
 0x1b0   : > { %v4302_v23 = vpop.permute.xlu0 %1124 }
 0x1b2   : > { %v4304_v4 = vpop.permute.xlu1 %987 }
 0x1b3   : > { %3493 = vset.pattern.permute.xlu1 %v3743_v3 }
 0x1b4   : > { %1128 = vperm.xlu1 %3493, %v3924_v13  }
 0x1b5   : > { %v4308_v22 = vpop.permute.xlu0 %1245 }
 0x1b6   : > { %v992_v61 = vpop.permute.xlu1 %991 }
 0x1b8   : > { %3494 = vset.pattern.permute.xlu1 %v3742_v60 }
 0x1b9   : > { %1003 = vperm.xlu1 %3494, %v3972_v24   ;;  %v4312_v19 = vpop.permute.xlu0 %1253 }
 0x1bb   : > { %v1258_v28 = vpop.permute.xlu1 %1257 }
 0x1bd   : > { %3496 = vset.pattern.permute.xlu1 %v3744_v8  ;;  %v4315_v63 = vpop.permute.xlu0 %1277 }
 0x1be   : > { %1273 = vperm.xlu1 %3496, %v3924_v13  }
 0x1c0   : > { %v4318_v0 = vpop.permute.xlu1 %1132 }
 0x1c1   : > { %v4320_v2 = vpop.permute.xlu0 %1269 }
 0x1c2   : > { %5413 = vst [vmem:[#allocation6_spill] sm:$0xff] %v4320_v2  ;;  %3497 = vset.pattern.permute.xlu1 %v3743_v3  ;;  %v1587_v3 = vmul.f32 %v1540_v6, %v4025_v47  ;;  %v870_v2 = vmul.f32 %v4248_v21, %v4087_v62  ;;  %v1006_v21 = vmul.f32 %v4256_v31, %v4009_v35  ;;  %v3504_v35 = vld [vmem:[%s5403_s1 + $0x8] sm:$0xff]  }
 0x1c3   : > { %1148 = vperm.xlu1 %3497, %v3972_v24   ;;  %v1151_v31 = vmul.f32 %v4261_v36, %v4055_v26  ;;  %v3505_v26 = vld [vmem:[%s5403_s1 + $0x10] sm:$0xff]   ;;  %v4404_v36 = vld [vmem:[#allocation2 + $0x64] sm:$0xff] }
 0x1c5   : > { %v4324_v60 = vpop.permute.xlu1 %1398 }
 0x1c6   : > { %v1395_v29 = vpop.permute.xlu0 %1394 }
 0x1c7   : > { %v1442_v33 = vmul.f32 %v1395_v29, %v4065_v37  ;;  %3499 = vset.pattern.permute.xlu1 %v5412_v10 }
 0x1c8   : > { %1418 = vperm.xlu1 %3499, %v3924_v13  }
 0x1c9   : > { %1469 = vrot.lane.b32.xlu0 %v1442_v33, %s3751_s29  ;;  %v4330_v38 = vpop.permute.xlu1 %1402  ;;  %v864_v33 = vmul.f32 %v4233_v16, %v4063_v34 }
 0x1ca   : > { %v4332_v42 = vpop.permute.xlu0 %1410 }
 0x1cc   : > { %3500 = vset.pattern.permute.xlu1 %v3744_v8  ;;  %v1009_v8 = vmul.f32 %v968_v56, %v4027_v48  ;;  %v1154_v56 = vmul.f32 %v1113_v49, %v4065_v37 }
 0x1cd   : > { %1293 = vperm.xlu1 %3500, %v3972_v24   ;;  %1614 = vrot.lane.b32.xlu0 %v1587_v3, %s3752_s11  ;;  %v5414_v3 = vmov 7  }
 0x1ce   : > { %v4338_v39 = vpop.permute.xlu1 %1281  ;;  %v4340_v29 = vpop.permute.xlu0 %1434 }
 0x1d1   : > { %3501 = vset.pattern.permute.xlu1 %v3746_v11  ;;  %893 = vrot.lane.b32.xlu0 %v864_v33, %s3747_s15 }
 0x1d2   : > { %1563 = vperm.xlu1 %3501, %v3924_v13   ;;  %v4347_v6 = vpop.permute.xlu0 %1414  ;;  %v861_v13 = vmul.f32 %v4157_v12, %v4051_v14  ;;  %v3753_v14 = vmov 0.0   ;;  %v1015_v12 = vmul.f32 %v992_v61, %v4112_v50  ;;  %v1296_v61 = vmul.f32 %v4308_v22, %v4017_v41 }
 0x1d3   : > { %v4350_v10 = vpop.permute.xlu1 %1543  ;;  %3293 = vmatprep.subr.bf16.mxu0 %v3753_v14  ;;  %3388 = vmatprep.subr.bf16.mxu1 %v3753_v14 }
 0x1d4   : > { %3307 = vmatprep.mubr.msk.bf16.mxu0 %vm3754_vm14, %v3753_v14  ;;  %3323 = vmatprep.mubr.msk.bf16.mxu1 %vm3754_vm14, %v3753_v14 }
 0x1d5   : > { %1038 = vrot.lane.b32.xlu0 %v1009_v8, %s3748_s26 }
 0x1d6   : > { %3502 = vset.pattern.permute.xlu1 %v5414_v3  ;;  %v1299_v3 = vmul.f32 %v1258_v28, %v4035_v54  ;;  %v1160_v28 = vmul.f32 %v4289_v51, %v4404_v36  ;;  %v1444_v51 = vmul.f32 %v4330_v38, %v4073_v45  ;;  %v4435_v38 = vld [vmem:[#allocation2 + $0x70] sm:$0xff] }
 0x1d7   : > { %1438 = vperm.xlu1 %3502, %v3972_v24   ;;  %v4357_v11 = vpop.permute.xlu0 %1547  ;;  %v3503_v24 = vld [vmem:[%s5403_s1] sm:$0xff]  }
 0x1d8   : > { %v4359_v16 = vpop.permute.xlu1 %1422  ;;  %3294 = vmatpush3.bf16.msra.mxu0 %v3503_v24  ;;  %3395 = vmatpush3.bf16.msra.mxu1 %v3503_v24  ;;  %v3506_v24 = vld [vmem:[%s5403_s1 + $0x18] sm:$0xff]  }
 0x1d9   : > { %905 = vrot.lane.b32.xlu0 %v870_v2, %s3747_s15  ;;  %3295 = vmatprep.subr.bf16.mxu0 %v3753_v14 }
 0x1da   : > { %3389 = vmatprep.subr.bf16.mxu1 %v3753_v14 }
 0x1db   : > { %887 = vrot.lane.b32.xlu1 %v861_v13, %s3747_s15  ;;  %v4366_v33 = vpop.permute.xlu0 %1567 }
 0x1dc   : > { %v4368_v8 = vpop.permute.xlu1 %1426  ;;  %3296 = vmatpush3.bf16.msra.mxu0 %v3504_v35  ;;  %3396 = vmatpush3.bf16.msra.mxu1 %v3504_v35 }
 0x1dd   : > { %1183 = vrot.lane.b32.xlu0 %v1154_v56, %s3749_s27  ;;  %3297 = vmatprep.subr.bf16.mxu0 %v3753_v14 }
 0x1de   : > { %3390 = vmatprep.subr.bf16.mxu1 %v3753_v14 }
 0x1df   : > { %1032 = vrot.lane.b32.xlu1 %v1006_v21, %s3748_s26  ;;  %v4380_v49 = vpop.permute.xlu0 %1551  ;;  %v1441_v21 = vmul.f32 %v4279_v5, %v4063_v34  ;;  %v3507_v5 = vld [vmem:[%s5403_s1 + $0x20] sm:$0xff]  }
 0x1e0   : > { %3298 = vmatpush3.bf16.msra.mxu0 %v3505_v26  ;;  %3397 = vmatpush3.bf16.msra.mxu1 %v3505_v26  ;;  %v3508_v26 = vld [vmem:[%s5403_s1 + $0x28] sm:$0xff]  }
 0x1e1   : > { %1050 = vrot.lane.b32.xlu0 %v1015_v12, %s3748_s26  ;;  %v4389_v2 = vpop.permute.xlu1 %1571  ;;  %3299 = vmatprep.subr.bf16.mxu0 %v3753_v14 }
 0x1e2   : > { %3391 = vmatprep.subr.bf16.mxu1 %v3753_v14 }
 0x1e3   : > { %1177 = vrot.lane.b32.xlu1 %v1151_v31, %s3749_s27  ;;  %v4396_v13 = vpop.permute.xlu0 %1559  ;;  %v1586_v31 = vmul.f32 %v4285_v46, %v4027_v48  ;;  %v863_v48 = vmul.f32 %v4229_v18, %v4057_v27  ;;  %v1589_v46 = vmul.f32 %v4357_v11, %v4033_v53  ;;  %v1008_v53 = vmul.f32 %v4266_v32, %v4017_v41 }
 0x1e4   : > { %3300 = vmatpush3.bf16.msra.mxu0 %v3506_v24  ;;  %3398 = vmatpush3.bf16.msra.mxu1 %v3506_v24  ;;  %v4466_v24 = vld [vmem:[#allocation2 + $0x78] sm:$0xff]  ;;  %v869_v41 = vmul.f32 %v4250_v25, %v4081_v55  ;;  %v866_v25 = vmul.f32 %v4238_v9, %v4071_v44  ;;  %v1298_v9 = vmul.f32 %v4312_v19, %v4025_v47 }
 0x1e5   : > { %1328 = vrot.lane.b32.xlu0 %v1299_v3, %s3750_s28  ;;  %3301 = vmatprep.subr.bf16.mxu0 %v3753_v14 }
 0x1e6   : > { %v4406_v22 = vpop.permute.xlu1 %975  ;;  %3392 = vmatprep.subr.bf16.mxu1 %v3753_v14 }
 0x1e7   : > { %1322 = vrot.lane.b32.xlu1 %v1296_v61, %s3750_s28  ;;  %v4411_v56 = vpop.permute.xlu0 %1583  ;;  %v1305_v61 = vmul.f32 %v4338_v39, %v4435_v38  ;;  %v3509_v39 = vld [vmem:[%s5403_s1 + $0x30] sm:$0x3f]  }
 0x1e8   : > { %3302 = vmatpush3.bf16.msra.mxu0 %v3507_v5  ;;  %3399 = vmatpush3.bf16.msra.mxu1 %v3507_v5  ;;  %v1772_v18 = vsel %vm1770_vm13, %v3509_v39, 0  ;;  %v1014_v5 = vmul.f32 %v4304_v4, %v4041_v59  ;;  %vm2789_vm13 = vcmask 97312  }
 0x1e9   : > { %1195 = vrot.lane.b32.xlu0 %v1160_v28, %s3749_s27  ;;  %3303 = vmatprep.subr.bf16.mxu0 %v3753_v14  ;;  %v4455_v28 = vld [vmem:[#allocation2 + $0x74] sm:$0xff] }
 0x1ea   : > { %3393 = vmatprep.subr.bf16.mxu1 %v3753_v14  ;;  %v1450_v11 = vmul.f32 %v4368_v8, %v4455_v28  ;;  %v1595_v8 = vmul.f32 %v4389_v2, %v4466_v24 }
 0x1eb   : > { %1467 = vrot.lane.b32.xlu1 %v1441_v21, %s3751_s29  ;;  %v4424_v12 = vpop.permute.xlu1 %854  ;;  %v890_v35 = vpop.permute.xlu0 %889  ;;  %v1153_v21 = vmul.f32 %v4298_v58, %v4063_v34  ;;  %v1011_v34 = vmul.f32 %v4406_v22, %v4035_v54  ;;  %v1159_v22 = vmul.f32 %v4318_v0, %v4087_v62  ;;  %v1017_v0 = vmul.f32 %v4276_v40, %v4435_v38 }
 0x1ec   : > { %928 = vst.msk [vmem:[#allocation3 + $0x8] sm:$0xff] %vm926_vm12, %v890_v35  ;;  %3304 = vmatpush3.bf16.msra.mxu0 %v3508_v26  ;;  %3400 = vmatpush3.bf16.msra.mxu1 %v3508_v26  ;;  %v4515_v26 = vld [vmem:[#allocation2 + $0x68] sm:$0xff] }
 0x1ed   : > { %1473 = vrot.lane.b32.xlu0 %v1444_v51, %s3751_s29  ;;  %3305 = vmatprep.subr.bf16.mxu0 %v3753_v14 }
 0x1ee   : > { %3394 = vmatprep.subr.bf16.mxu1 %v3753_v14 }
 0x1ef   : > { %1612 = vrot.lane.b32.xlu1 %v1586_v31, %s3752_s11  ;;  %v4496_v31 = vld [vmem:[#allocation2 + $0x6c] sm:$0xff] }
 0x1f0   : > { %v1121_v3 = vpop.permute.xlu1 %1120  ;;  %3306 = vmatpush3.bf16.msra.mxu0 %v1772_v18  ;;  %3401 = vmatpush3.bf16.msra.mxu1 %v1772_v18  ;;  %v872_v59 = vmul.f32 %v4496_v31, %v4424_v12  ;;  %v1443_v12 = vmul.f32 %v4324_v60, %v4071_v44  ;;  %v1588_v60 = vmul.f32 %v4350_v10, %v4035_v54  ;;  %v4539_v10 = vld [vmem:[#allocation2 + $0x80] sm:$0xff] }
 0x1f1   : > { %1340 = vrot.lane.b32.xlu0 %v1305_v61, %s3750_s28  ;;  %v1156_v19 = vmul.f32 %v1121_v3, %v4073_v45  ;;  %v1304_v45 = vmul.f32 %v4315_v63, %v4515_v26  ;;  %v1446_v63 = vmul.f32 %v4332_v42, %v4081_v55  ;;  %v1594_v18 = vmul.f32 %v4366_v33, %v4435_v38  ;;  %v1387_v33 = vld [vmem:[#allocation2 + $0x84] sm:$0xff] }
 0x1f2   : > { %v865_v55 = vmul.f32 %v4240_v15, %v4065_v37  ;;  %v871_v37 = vmul.f32 %v4254_v30, %v4404_v36 }
 0x1f3   : > { %891 = vrot.lane.b32.xlu1 %v863_v48, %s3747_s15  ;;  %v1236_v48 = vld [vmem:[#allocation2 + $0x50] sm:$0xff] }
 0x1f5   : > { %1618 = vrot.lane.b32.xlu0 %v1589_v46, %s3752_s11  ;;  %v4460_v27 = vpop.permute.xlu1 %995 }
 0x1f6   : > { %v1016_v30 = vmul.f32 %v4515_v26, %v4460_v27  ;;  %v1161_v27 = vmul.f32 %v4296_v1, %v4496_v31 }
 0x1f7   : > { %1036 = vrot.lane.b32.xlu1 %v1008_v53, %s3748_s26  ;;  %v1449_v53 = vmul.f32 %v4359_v16, %v4496_v31  ;;  %v1526_v16 = vld [vmem:[#allocation2 + $0x58] sm:$0xff] }
 0x1f9   : > { %1485 = vrot.lane.b32.xlu0 %v1450_v11, %s3751_s29 }
 0x1fa   : > { %v4475_v32 = vpop.permute.xlu1 %1261 }
 0x1fb   : > { %903 = vrot.lane.b32.xlu1 %v869_v41, %s3747_s15  ;;  %v3718_v41 = vld [vmem:[#allocation2 + $0x38] sm:$0xff] }
 0x1fd   : > { %1630 = vrot.lane.b32.xlu0 %v1595_v8, %s3752_s11  ;;  %v1010_v8 = vmul.f32 %v3718_v41, %v4271_v7  ;;  %v5415_v41 = vld [vmem:[#allocation6_spill] sm:$0xff] }
 0x1fe   : > { %v1266_v51 = vpop.permute.xlu1 %1265 }
 0x1ff   : > { %1181 = vrot.lane.b32.xlu1 %v1153_v21, %s3749_s27  ;;  %v1301_v46 = vmul.f32 %v1266_v51, %v1236_v48  ;;  %v1452_v21 = vmul.f32 %v4340_v29, %v1387_v33  ;;  %v1532_v51 = vld [vmem:[#allocation2 + $0x88] sm:$0xff]  ;;  %v868_v29 = vmul.f32 %v4243_v17, %v4079_v52  ;;  %v1157_v17 = vmul.f32 %v4302_v23, %v4079_v52 }
 0x200   : > { %v1035_v35 = vpop.permute.xlu0 %1034 }
 0x201   : > { %1073 = vst.msk [vmem:[#allocation3 + $0x8] sm:$0xff] %vm1071_vm15, %v1035_v35  ;;  %897 = vrot.lane.b32.xlu0 %v866_v25, %s3747_s15  ;;  %v1155_v35 = vmul.f32 %v4292_v57, %v4071_v44  ;;  %v953_v57 = vld [vmem:[#allocation2 + $0x78] sm:$0xf] }
 0x203   : > { %1048 = vrot.lane.b32.xlu1 %v1014_v5, %s3748_s26  ;;  %v1145_v58 = vpop.permute.xlu1 %1144  ;;  %v1235_v5 = vld [vmem:[#allocation2 + $0x48] sm:$0xff] }
 0x204   : > { %v1162_v40 = vmul.f32 %v4455_v28, %v1145_v58  ;;  %v1300_v44 = vmul.f32 %v4475_v32, %v1235_v5  ;;  %v3723_v5 = vld [vmem:[#allocation2 + $0x60] sm:$0xff] }
 0x205   : > { %v1180_v2 = vpop.permute.xlu0 %1179  ;;  %1042 = vrot.lane.b32.xlu0 %v1011_v34, %s3748_s26 }
 0x206   : > { %1218 = vst.msk [vmem:[#allocation3 + $0x8] sm:$0xff] %vm1216_vm0, %v1180_v2 }
 0x207   : > { %1326 = vrot.lane.b32.xlu1 %v1298_v9, %s3750_s28 }
 0x208   : > { %v4502_v4 = vpop.permute.xlu1 %1406 }
 0x209   : > { %909 = vrot.lane.b32.xlu0 %v872_v59, %s3747_s15  ;;  %v1445_v32 = vmul.f32 %v4502_v4, %v4079_v52  ;;  %v1447_v52 = vmul.f32 %v4347_v6, %v4087_v62  ;;  %v1243_v62 = vld [vmem:[#allocation2 + $0x88] sm:$0xf] }
 0x20a   : > { %v1325_v47 = vpop.permute.xlu0 %1324 }
 0x20b   : > { %1363 = vst.msk [vmem:[#allocation3 + $0x8] sm:$0xff] %vm1361_vm1, %v1325_v47  ;;  %1193 = vrot.lane.b32.xlu1 %v1159_v22, %s3749_s27 }
 0x20d   : > { %1187 = vrot.lane.b32.xlu0 %v1156_v19, %s3749_s27  ;;  %v4513_v61 = vpop.permute.xlu1 %1285 }
 0x20e   : > { %v1306_v1 = vmul.f32 %v4466_v24, %v4513_v61 }
 0x20f   : > { %1471 = vrot.lane.b32.xlu1 %v1443_v12, %s3751_s29  ;;  %v1386_v12 = vld [vmem:[#allocation2 + $0x7c] sm:$0xff] }
 0x211   : > { %1054 = vrot.lane.b32.xlu0 %v1017_v0, %s3748_s26  ;;  %v1290_v3 = vpop.permute.xlu1 %1289 }
 0x212   : > { %v1307_v28 = vmul.f32 %v1290_v3, %v4539_v10 }
 0x213   : > { %1338 = vrot.lane.b32.xlu1 %v1304_v45, %s3750_s28 }
 0x215   : > { %1332 = vrot.lane.b32.xlu0 %v1301_v46, %s3750_s28  ;;  %v3720_v46 = vld [vmem:[#allocation2 + $0x44] sm:$0xff] }
 0x216   : > { %v1556_v39 = vpop.permute.xlu1 %1555 }
 0x217   : > { %1616 = vrot.lane.b32.xlu1 %v1588_v60, %s3752_s11  ;;  %v1591_v42 = vmul.f32 %v1556_v39, %v1526_v16  ;;  %v867_v60 = vmul.f32 %v3720_v46, %v4245_v20 }
 0x219   : > { %1199 = vrot.lane.b32.xlu0 %v1162_v40, %s3749_s27 }
 0x21b   : > { %1483 = vrot.lane.b32.xlu1 %v1449_v53, %s3751_s29  ;;  %v4537_v54 = vpop.permute.xlu1 %1430  ;;  %v1533_v53 = vld [vmem:[#allocation2 + $0x90] sm:$0xf] }
 0x21c   : > { %v1451_v61 = vmul.f32 %v4537_v54, %v1386_v12 }
 0x21d   : > { %1477 = vrot.lane.b32.xlu0 %v1446_v63, %s3751_s29 }
 0x21f   : > { %1628 = vrot.lane.b32.xlu1 %v1594_v18, %s3752_s11  ;;  %v3721_v18 = vld [vmem:[#allocation2 + $0x48] sm:$0xff] }
 0x220   : > { %v4544_v11 = vpop.permute.xlu1 %1575  ;;  %v1012_v54 = vmul.f32 %v3721_v18, %v4282_v43 }
 0x221   : > { %1344 = vrot.lane.b32.xlu0 %v1307_v28, %s3750_s28  ;;  %v808_v28 = vld [vmem:[#allocation2 + $0x74] sm:$0xf] }
 0x223   : > { %895 = vrot.lane.b32.xlu1 %v865_v55, %s3747_s15 }
 0x224   : > { %v1580_v38 = vpop.permute.xlu1 %1579 }
 0x225   : > { %1622 = vrot.lane.b32.xlu0 %v1591_v42, %s3752_s11  ;;  %v1597_v25 = vmul.f32 %v1580_v38, %v1532_v51  ;;  %v3722_v38 = vld [vmem:[#allocation2 + $0x58] sm:$0xff] }
 0x227   : > { %1040 = vrot.lane.b32.xlu1 %v1010_v8, %s3748_s26  ;;  %v1302_v8 = vmul.f32 %v3722_v38, %v5415_v41 }
 0x229   : > { %1489 = vrot.lane.b32.xlu0 %v1452_v21, %s3751_s29  ;;  %v984_v15 = vpop.permute.xlu1 %983  ;;  %v1098_v21 = vld [vmem:[#allocation2 + $0x7c] sm:$0xf] }
 0x22a   : > { %v1013_v34 = vmul.f32 %v1236_v48, %v984_v15 }
 0x22b   : > { %907 = vrot.lane.b32.xlu1 %v871_v37, %s3747_s15 }
 0x22d   : > { %1634 = vrot.lane.b32.xlu0 %v1597_v25, %s3752_s11 }
 0x22e   : > { %v4561_v7 = vpop.permute.xlu1 %858 }
 0x22f   : > { %1185 = vrot.lane.b32.xlu1 %v1155_v35, %s3749_s27  ;;  %v873_v20 = vmul.f32 %v4561_v7, %v808_v28 }
 0x231   : > { %901 = vrot.lane.b32.xlu0 %v868_v29, %s3747_s15 }
 0x233   : > { %1052 = vrot.lane.b32.xlu1 %v1016_v30, %s3748_s26  ;;  %v4570_v58 = vpop.permute.xlu1 %1128 }
 0x235   : > { %1046 = vrot.lane.b32.xlu0 %v1013_v34, %s3748_s26  ;;  %v1592_v34 = vmul.f32 %v3723_v5, %v4396_v13 }
 0x237   : > { %1330 = vrot.lane.b32.xlu1 %v1300_v44, %s3750_s28 }
 0x238   : > { %v1004_v9 = vpop.permute.xlu1 %1003 }
 0x239   : > { %1189 = vrot.lane.b32.xlu0 %v1157_v17, %s3749_s27  ;;  %v1018_v2 = vmul.f32 %v1004_v9, %v953_v57 }
 0x23b   : > { %v1470_v59 = vpop.permute.xlu0 %1469  ;;  %1197 = vrot.lane.b32.xlu1 %v1161_v27, %s3749_s27 }
 0x23c   : > { %1508 = vst.msk [vmem:[#allocation3 + $0x8] sm:$0xff] %vm1506_vm2, %v1470_v59 }
 0x23d   : > { %1056 = vrot.lane.b32.xlu0 %v1018_v2, %s3748_s26  ;;  %v1274_v23 = vpop.permute.xlu1 %1273 }
 0x23e   : > { %v1303_v22 = vmul.f32 %v1274_v23, %v4112_v50  ;;  %v3719_v50 = vld [vmem:[#allocation2 + $0x50] sm:$0xff] }
 0x23f   : > { %v1615_v47 = vpop.permute.xlu0 %1614  ;;  %1475 = vrot.lane.b32.xlu1 %v1445_v32, %s3751_s29  ;;  %v1590_v19 = vmul.f32 %v3719_v50, %v4380_v49  ;;  %v1596_v49 = vmul.f32 %v4544_v11, %v4539_v10  ;;  %v1598_v10 = vmul.f32 %v4411_v56, %v1533_v53 }
 0x240   : > { %1653 = vst.msk [vmem:[#allocation3 + $0x8] sm:$0xff] %vm1651_vm3, %v1615_v47 }
 0x241   : > { %1336 = vrot.lane.b32.xlu0 %v1303_v22, %s3750_s28 }
 0x242   : > { %v4591_v31 = vpop.permute.xlu1 %1148 }
 0x243   : > { %v894_v4 = vpop.permute.xlu0 %893  ;;  %1342 = vrot.lane.b32.xlu1 %v1306_v1, %s3750_s28  ;;  %v1163_v15 = vmul.f32 %v4591_v31, %v1098_v21 }
 0x244   : > { %930 = vst.msk [vmem:[#allocation3 + $0x18] sm:$0xff] %vm926_vm12, %v894_v4 }
 0x245   : > { %1479 = vrot.lane.b32.xlu0 %v1447_v52, %s3751_s29 }
 0x247   : > { %v1039_v0 = vpop.permute.xlu0 %1038  ;;  %1620 = vrot.lane.b32.xlu1 %v1590_v19, %s3752_s11  ;;  %v1419_v24 = vpop.permute.xlu1 %1418  ;;  %v1667_v2 = vld [vmem:[#allocation3 + $0x8] sm:$0xff] }
 0x248   : > { %1075 = vst.msk [vmem:[#allocation3 + $0x18] sm:$0xff] %vm1071_vm15, %v1039_v0  ;;  %v1448_v7 = vmul.f32 %v1419_v24, %v4404_v36 }
 0x24b   : > { %v906_v6 = vpop.permute.xlu0 %905  ;;  %1487 = vrot.lane.b32.xlu1 %v1451_v61, %s3751_s29 }
 0x24c   : > { %936 = vst.msk [vmem:[#allocation3 + $0x48] sm:$0xff] %vm926_vm12, %v906_v6  ;;  %v1294_v48 = vpop.permute.xlu1 %1293 }
 0x24d   : > { %v1308_v45 = vmul.f32 %v1294_v48, %v1243_v62 }
 0x24f   : > { %v1184_v3 = vpop.permute.xlu0 %1183  ;;  %1632 = vrot.lane.b32.xlu1 %v1596_v49, %s3752_s11  ;;  %1346 = vrot.lane.b32.xlu0 %v1308_v45, %s3750_s28 }
 0x250   : > { %1220 = vst.msk [vmem:[#allocation3 + $0x18] sm:$0xff] %vm1216_vm0, %v1184_v3 }
 0x251   : > { %v1564_v39 = vpop.permute.xlu1 %1563 }
 0x252   : > { %v1593_v40 = vmul.f32 %v1564_v39, %v4515_v26  ;;  %v1093_v26 = vld [vmem:[#allocation2 + $0x54] sm:$0xff] }
 0x253   : > { %v1051_v63 = vpop.permute.xlu0 %1050  ;;  %899 = vrot.lane.b32.xlu1 %v867_v60, %s3747_s15  ;;  %v1158_v43 = vmul.f32 %v4570_v58, %v1093_v26  ;;  %v1388_v58 = vld [vmem:[#allocation2 + $0x8c] sm:$0xf] }
 0x254   : > { %1081 = vst.msk [vmem:[#allocation3 + $0x48] sm:$0xff] %vm1071_vm15, %v1051_v63  ;;  %1626 = vrot.lane.b32.xlu0 %v1593_v40, %s3752_s11 }
 0x256   : > { %v1439_v16 = vpop.permute.xlu1 %1438 }
 0x257   : > { %v1329_v11 = vpop.permute.xlu0 %1328  ;;  %1044 = vrot.lane.b32.xlu1 %v1012_v54, %s3748_s26  ;;  %v1453_v36 = vmul.f32 %v1439_v16, %v1388_v58  ;;  %s3768_s26 = smov (!%p3267_p5), 40  }
 0x258   : > { %1365 = vst.msk [vmem:[#allocation3 + $0x18] sm:$0xff] %vm1361_vm1, %v1329_v11  ;;  %1636 = vrot.lane.b32.xlu0 %v1598_v10, %s3752_s11 }
 0x25a   : > { %v888_v55 = vpop.permute.xlu1 %887 }
 0x25b   : > { %927 = vst.msk [vmem:[#allocation3] sm:$0xff] %vm926_vm12, %v888_v55  ;;  %v1196_v42 = vpop.permute.xlu0 %1195  ;;  %911 = vrot.lane.b32.xlu1 %v873_v20, %s3747_s15 }
 0x25c   : > { %1226 = vst.msk [vmem:[#allocation3 + $0x48] sm:$0xff] %vm1216_vm0, %v1196_v42 }
 0x25e   : > { %v1033_v56 = vpop.permute.xlu1 %1032 }
 0x25f   : > { %1072 = vst.msk [vmem:[#allocation3] sm:$0xff] %vm1071_vm15, %v1033_v56  ;;  %v1474_v33 = vpop.permute.xlu0 %1473  ;;  %1191 = vrot.lane.b32.xlu1 %v1158_v43, %s3749_s27 }
 0x260   : > { %1510 = vst.msk [vmem:[#allocation3 + $0x18] sm:$0xff] %vm1506_vm2, %v1474_v33 }
 0x262   : > { %v1178_v51 = vpop.permute.xlu1 %1177 }
 0x263   : > { %1217 = vst.msk [vmem:[#allocation3] sm:$0xff] %vm1216_vm0, %v1178_v51  ;;  %v1341_v37 = vpop.permute.xlu0 %1340  ;;  %1334 = vrot.lane.b32.xlu1 %v1302_v8, %s3750_s28  ;;  %s3763_s28 = smov (!%p3267_p5), 8  }
 0x264   : > { %1371 = vst.msk [vmem:[#allocation3 + $0x48] sm:$0xff] %vm1361_vm1, %v1341_v37 }
 0x266   : > { %v1323_v25 = vpop.permute.xlu1 %1322 }
 0x267   : > { %1362 = vst.msk [vmem:[#allocation3] sm:$0xff] %vm1361_vm1, %v1323_v25  ;;  %v1619_v35 = vpop.permute.xlu0 %1618  ;;  %1201 = vrot.lane.b32.xlu1 %v1163_v15, %s3749_s27  ;;  %s3755_s27 = smov 112  }
 0x268   : > { %1655 = vst.msk [vmem:[#allocation3 + $0x18] sm:$0xff] %vm1651_vm3, %v1619_v35 }
 0x26a   : > { %v1468_v29 = vpop.permute.xlu1 %1467 }
 0x26b   : > { %1507 = vst.msk [vmem:[#allocation3] sm:$0xff] %vm1506_vm2, %v1468_v29  ;;  %v1486_v30 = vpop.permute.xlu0 %1485  ;;  %1481 = vrot.lane.b32.xlu1 %v1448_v7, %s3751_s29 }
 0x26c   : > { %1516 = vst.msk [vmem:[#allocation3 + $0x48] sm:$0xff] %vm1506_vm2, %v1486_v30 }
 0x26e   : > { %v1613_v44 = vpop.permute.xlu1 %1612 }
 0x26f   : > { %1652 = vst.msk [vmem:[#allocation3] sm:$0xff] %vm1651_vm3, %v1613_v44  ;;  %v1631_v17 = vpop.permute.xlu0 %1630  ;;  %1624 = vrot.lane.b32.xlu1 %v1592_v34, %s3752_s11  ;;  %v1669_v3 = vld [vmem:[#allocation3 + $0x18] sm:$0xff] }
 0x270   : > { %1661 = vst.msk [vmem:[#allocation3 + $0x48] sm:$0xff] %vm1651_vm3, %v1631_v17 }
 0x272   : > { %v892_v57 = vpop.permute.xlu1 %891 }
 0x273   : > { %929 = vst.msk [vmem:[#allocation3 + $0x10] sm:$0xff] %vm926_vm12, %v892_v57  ;;  %v898_v9 = vpop.permute.xlu0 %897  ;;  %1491 = vrot.lane.b32.xlu1 %v1453_v36, %s3751_s29 }
 0x274   : > { %932 = vst.msk [vmem:[#allocation3 + $0x28] sm:$0xff] %vm926_vm12, %v898_v9 }
 0x276   : > { %v1037_v27 = vpop.permute.xlu1 %1036  ;;  %v1666_v13 = vld [vmem:[#allocation3] sm:$0xff] }
 0x277   : > { %1074 = vst.msk [vmem:[#allocation3 + $0x10] sm:$0xff] %vm1071_vm15, %v1037_v27  ;;  %v1043_v59 = vpop.permute.xlu0 %1042  ;;  %v1679_v32 = vpack.c.bf16 %v1667_v2, %v1666_v13  ;;  %v1675_v10 = vld [vmem:[#allocation3 + $0x48] sm:$0xff] }
 0x278   : > { %1077 = vst.msk [vmem:[#allocation3 + $0x28] sm:$0xff] %vm1071_vm15, %v1043_v59 }
 0x279   : > { %3308 = vmatmul.mubr.msk.bf16.vlgmr.msra.gmra.mrb[0].mxu0 %vm1748_vm4, %v1679_v32 }
 0x27a   : > { %v904_v23 = vpop.permute.xlu1 %903  ;;  %3311 = vmatprep.mubr.msk.bf16.mxu0 %vm3754_vm14, %v3753_v14 }
 0x27b   : > { %935 = vst.msk [vmem:[#allocation3 + $0x40] sm:$0xff] %vm926_vm12, %v904_v23  ;;  %v910_v22 = vpop.permute.xlu0 %909 }
 0x27c   : > { %938 = vst.msk [vmem:[#allocation3 + $0x58] sm:$0xff] %vm926_vm12, %v910_v22 }
 0x27e   : > { %v1182_v47 = vpop.permute.xlu1 %1181 }
 0x27f   : > { %1219 = vst.msk [vmem:[#allocation3 + $0x10] sm:$0xff] %vm1216_vm0, %v1182_v47  ;;  %v1188_v1 = vpop.permute.xlu0 %1187 }
 0x280   : > { %1222 = vst.msk [vmem:[#allocation3 + $0x28] sm:$0xff] %vm1216_vm0, %v1188_v1  ;;  %v4712_v1 = vld [vmem:[%s5404_s2] ss:$0 sm:$0xff] }
 0x282   : > { %v1049_v31 = vpop.permute.xlu1 %1048 }
 0x283   : > { %1080 = vst.msk [vmem:[#allocation3 + $0x40] sm:$0xff] %vm1071_vm15, %v1049_v31  ;;  %v1055_v52 = vpop.permute.xlu0 %1054 }
 0x284   : > { %1083 = vst.msk [vmem:[#allocation3 + $0x58] sm:$0xff] %vm1071_vm15, %v1055_v52 }
 0x286   : > { %v1327_v4 = vpop.permute.xlu1 %1326 }
 0x287   : > { %1364 = vst.msk [vmem:[#allocation3 + $0x10] sm:$0xff] %vm1361_vm1, %v1327_v4  ;;  %v1333_v50 = vpop.permute.xlu0 %1332 }
 0x288   : > { %1367 = vst.msk [vmem:[#allocation3 + $0x28] sm:$0xff] %vm1361_vm1, %v1333_v50 }
 0x28a   : > { %v1194_v19 = vpop.permute.xlu1 %1193 }
 0x28b   : > { %1225 = vst.msk [vmem:[#allocation3 + $0x40] sm:$0xff] %vm1216_vm0, %v1194_v19  ;;  %v1200_v12 = vpop.permute.xlu0 %1199 }
 0x28c   : > { %1228 = vst.msk [vmem:[#allocation3 + $0x58] sm:$0xff] %vm1216_vm0, %v1200_v12 }
 0x28e   : > { %v1472_v0 = vpop.permute.xlu1 %1471 }
 0x28f   : > { %1509 = vst.msk [vmem:[#allocation3 + $0x10] sm:$0xff] %vm1506_vm2, %v1472_v0  ;;  %v1478_v24 = vpop.permute.xlu0 %1477 }
 0x290   : > { %1512 = vst.msk [vmem:[#allocation3 + $0x28] sm:$0xff] %vm1506_vm2, %v1478_v24 }
 0x292   : > { %v1339_v61 = vpop.permute.xlu1 %1338 }
 0x293   : > { %1370 = vst.msk [vmem:[#allocation3 + $0x40] sm:$0xff] %vm1361_vm1, %v1339_v61  ;;  %v1345_v62 = vpop.permute.xlu0 %1344 }
 0x294   : > { %1373 = vst.msk [vmem:[#allocation3 + $0x58] sm:$0xff] %vm1361_vm1, %v1345_v62 }
 0x296   : > { %v1617_v6 = vpop.permute.xlu1 %1616 }
 0x297   : > { %1654 = vst.msk [vmem:[#allocation3 + $0x10] sm:$0xff] %vm1651_vm3, %v1617_v6  ;;  %v1623_v48 = vpop.permute.xlu0 %1622 }
 0x298   : > { %1657 = vst.msk [vmem:[#allocation3 + $0x28] sm:$0xff] %vm1651_vm3, %v1623_v48 }
 0x29a   : > { %v1484_v49 = vpop.permute.xlu1 %1483 }
 0x29b   : > { %1515 = vst.msk [vmem:[#allocation3 + $0x40] sm:$0xff] %vm1506_vm2, %v1484_v49  ;;  %v1490_v45 = vpop.permute.xlu0 %1489 }
 0x29c   : > { %1518 = vst.msk [vmem:[#allocation3 + $0x58] sm:$0xff] %vm1506_vm2, %v1490_v45 }
 0x29e   : > { %v1629_v46 = vpop.permute.xlu1 %1628  ;;  %v1668_v60 = vld [vmem:[#allocation3 + $0x10] sm:$0xff] }
 0x29f   : > { %1660 = vst.msk [vmem:[#allocation3 + $0x40] sm:$0xff] %vm1651_vm3, %v1629_v46  ;;  %v1635_v39 = vpop.permute.xlu0 %1634  ;;  %v1680_v40 = vpack.c.bf16 %v1669_v3, %v1668_v60  ;;  %v1671_v21 = vld [vmem:[#allocation3 + $0x28] sm:$0xff] }
 0x2a0   : > { %1663 = vst.msk [vmem:[#allocation3 + $0x58] sm:$0xff] %vm1651_vm3, %v1635_v39 }
 0x2a1   : > { %3312 = vmatmul.mubr.msk.bf16.gmra.mrb[4].mxu0 %vm1748_vm4, %v1680_v40 }
 0x2a2   : > { %v896_v53 = vpop.permute.xlu1 %895  ;;  %3315 = vmatprep.mubr.msk.bf16.mxu0 %vm3754_vm14, %v3753_v14 }
 0x2a3   : > { %931 = vst.msk [vmem:[#allocation3 + $0x20] sm:$0xff] %vm926_vm12, %v896_v53  ;;  %v902_v63 = vpop.permute.xlu0 %901 }
 0x2a4   : > { %934 = vst.msk [vmem:[#allocation3 + $0x38] sm:$0xff] %vm926_vm12, %v902_v63 }
 0x2a6   : > { %v1041_v18 = vpop.permute.xlu1 %1040  ;;  %v1674_v54 = vld [vmem:[#allocation3 + $0x40] sm:$0xff] }
 0x2a7   : > { %1076 = vst.msk [vmem:[#allocation3 + $0x20] sm:$0xff] %vm1071_vm15, %v1041_v18  ;;  %v1047_v28 = vpop.permute.xlu0 %1046  ;;  %v1683_v16 = vpack.c.bf16 %v1675_v10, %v1674_v54  ;;  %v1677_v29 = vld [vmem:[#allocation3 + $0x58] sm:$0xff] }
 0x2a8   : > { %1079 = vst.msk [vmem:[#allocation3 + $0x38] sm:$0xff] %vm1071_vm15, %v1047_v28 }
 0x2a9   : > { %3324 = vmatmul.mubr.msk.bf16.vlgmr.msra.gmra.mrb[0].mxu1 %vm1748_vm4, %v1683_v16 }
 0x2aa   : > { %v908_v11 = vpop.permute.xlu1 %907  ;;  %3327 = vmatprep.mubr.msk.bf16.mxu1 %vm3754_vm14, %v3753_v14 }
 0x2ab   : > { %937 = vst.msk [vmem:[#allocation3 + $0x50] sm:$0xff] %vm926_vm12, %v908_v11  ;;  %v1190_v51 = vpop.permute.xlu0 %1189 }
 0x2ae   : > { %v1186_v20 = vpop.permute.xlu1 %1185 }
 0x2af   : > { %1221 = vst.msk [vmem:[#allocation3 + $0x20] sm:$0xff] %vm1216_vm0, %v1186_v20  ;;  %v1057_v25 = vpop.permute.xlu0 %1056 }
 0x2b2   : > { %v1053_v26 = vpop.permute.xlu1 %1052 }
 0x2b3   : > { %1082 = vst.msk [vmem:[#allocation3 + $0x50] sm:$0xff] %vm1071_vm15, %v1053_v26  ;;  %v1337_v34 = vpop.permute.xlu0 %1336 }
 0x2b6   : > { %v1331_v55 = vpop.permute.xlu1 %1330 }
 0x2b7   : > { %1366 = vst.msk [vmem:[#allocation3 + $0x20] sm:$0xff] %vm1361_vm1, %v1331_v55  ;;  %v1480_v44 = vpop.permute.xlu0 %1479 }
 0x2ba   : > { %v1198_v42 = vpop.permute.xlu1 %1197 }
 0x2bb   : > { %1227 = vst.msk [vmem:[#allocation3 + $0x50] sm:$0xff] %vm1216_vm0, %v1198_v42 }
 0x2be   : > { %v1476_v43 = vpop.permute.xlu1 %1475 }
 0x2bf   : > { %1511 = vst.msk [vmem:[#allocation3 + $0x20] sm:$0xff] %vm1506_vm2, %v1476_v43 }
 0x2c1   : > { %v1347_v36 = vpop.permute.xlu0 %1346 }
 0x2c2   : > { %v1343_v56 = vpop.permute.xlu1 %1342 }
 0x2c3   : > { %1372 = vst.msk [vmem:[#allocation3 + $0x50] sm:$0xff] %vm1361_vm1, %v1343_v56 }
 0x2c6   : > { %v1621_v33 = vpop.permute.xlu1 %1620  ;;  %v1627_v9 = vpop.permute.xlu0 %1626 }
 0x2c7   : > { %1656 = vst.msk [vmem:[#allocation3 + $0x20] sm:$0xff] %vm1651_vm3, %v1621_v33 }
 0x2ca   : > { %v1488_v38 = vpop.permute.xlu1 %1487  ;;  %v1637_v2 = vpop.permute.xlu0 %1636 }
 0x2cb   : > { %1517 = vst.msk [vmem:[#allocation3 + $0x50] sm:$0xff] %vm1506_vm2, %v1488_v38 }
 0x2ce   : > { %v1633_v41 = vpop.permute.xlu1 %1632  ;;  %v1670_v8 = vld [vmem:[#allocation3 + $0x20] sm:$0xff] }
 0x2cf   : > { %1662 = vst.msk [vmem:[#allocation3 + $0x50] sm:$0xff] %vm1651_vm3, %v1633_v41  ;;  %v1681_v37 = vpack.c.bf16 %v1671_v21, %v1670_v8 }
 0x2d1   : > { %3316 = vmatmul.mubr.msk.bf16.gmra.mrb[8].mxu0 %vm1748_vm4, %v1681_v37 }
 0x2d2   : > { %v900_v15 = vpop.permute.xlu1 %899  ;;  %3319 = vmatprep.mubr.msk.bf16.mxu0 %vm3754_vm14, %v3753_v14 }
 0x2d3   : > { %933 = vst.msk [vmem:[#allocation3 + $0x30] sm:$0xff] %vm926_vm12, %v900_v15  ;;  %vm2735_vm12 = vcmask 60416  }
 0x2d6   : > { %v1045_v35 = vpop.permute.xlu1 %1044  ;;  %v1676_v7 = vld [vmem:[#allocation3 + $0x50] sm:$0xff] }
 0x2d7   : > { %1078 = vst.msk [vmem:[#allocation3 + $0x30] sm:$0xff] %vm1071_vm15, %v1045_v35  ;;  %v1684_v30 = vpack.c.bf16 %v1677_v29, %v1676_v7  ;;  %vm2830_vm15 = vcmask (!%p3267_p5), 126016  }
 0x2d8   : > { %1223 = vst.msk [vmem:[#allocation3 + $0x30] sm:$0xff] %vm1216_vm0, %v1190_v51 }
 0x2d9   : > { %3328 = vmatmul.mubr.msk.bf16.gmra.mrb[4].mxu1 %vm1748_vm4, %v1684_v30 }
 0x2da   : > { %v912_v5 = vpop.permute.xlu1 %911  ;;  %3331 = vmatprep.mubr.msk.bf16.mxu1 %vm3754_vm14, %v3753_v14  ;;  %vm2802_vm14 = vcmask 93216  }
 0x2db   : > { %940 = vst.msk [vmem:[#allocation3 + $0x60] sm:$0xf] %vm939_vm5, %v912_v5  ;;  %vm2864_vm5 = vcmask (!%p3267_p5), 519616  }
 0x2dc   : > { %1085 = vst.msk [vmem:[#allocation3 + $0x60] sm:$0xf] %vm1084_vm6, %v1057_v25  ;;  %vm2870_vm6 = vcmask (!%p3267_p5), 585216  }
 0x2de   : > { %v1192_v58 = vpop.permute.xlu1 %1191 }
 0x2df   : > { %1224 = vst.msk [vmem:[#allocation3 + $0x38] sm:$0xff] %vm1216_vm0, %v1192_v58  ;;  %vm2836_vm0 = vcmask (!%p3267_p5), 191616  }
 0x2e0   : > { %1369 = vst.msk [vmem:[#allocation3 + $0x38] sm:$0xff] %vm1361_vm1, %v1337_v34 }
 0x2e2   : > { %v1335_v17 = vpop.permute.xlu1 %1334 }
 0x2e3   : > { %1368 = vst.msk [vmem:[#allocation3 + $0x30] sm:$0xff] %vm1361_vm1, %v1335_v17  ;;  %vm2840_vm1 = vcmask (!%p3267_p5), 257216  }
 0x2e4   : > { %1513 = vst.msk [vmem:[#allocation3 + $0x30] sm:$0xff] %vm1506_vm2, %v1480_v44 }
 0x2e6   : > { %v1202_v57 = vpop.permute.xlu1 %1201 }
 0x2e7   : > { %1230 = vst.msk [vmem:[#allocation3 + $0x60] sm:$0xf] %vm1229_vm7, %v1202_v57  ;;  %vm2876_vm7 = vcmask (!%p3267_p5), 650816  }
 0x2e8   : > { %1375 = vst.msk [vmem:[#allocation3 + $0x60] sm:$0xf] %vm1374_vm8, %v1347_v36  ;;  %v3215_v36 = vld [vmem:[%s5405_s3 + $0x68] sm:$0xff]  ;;  %vm2882_vm8 = vcmask (!%p3267_p5), 716416  }
 0x2ea   : > { %v1482_v14 = vpop.permute.xlu1 %1481 }
 0x2eb   : > { %1514 = vst.msk [vmem:[#allocation3 + $0x38] sm:$0xff] %vm1506_vm2, %v1482_v14  ;;  %v1862_v14 = vld [vmem:[#allocation4] sm:$0xff]  ;;  %vm2846_vm2 = vcmask (!%p3267_p5), 322816  }
 0x2ec   : > { %1659 = vst.msk [vmem:[#allocation3 + $0x38] sm:$0xff] %vm1651_vm3, %v1627_v9  ;;  %v2006_v9 = vmul.f32 %v3215_v36, %v1862_v14 }
 0x2ee   : > { %v1625_v27 = vpop.permute.xlu1 %1624 }
 0x2ef   : > { %1658 = vst.msk [vmem:[#allocation3 + $0x30] sm:$0xff] %vm1651_vm3, %v1625_v27  ;;  %v3217_v27 = vld [vmem:[%s5405_s3 + $0x78] sm:$0xff]  ;;  %vm2852_vm3 = vcmask (!%p3267_p5), 388416  }
 0x2f2   : > { %v1492_v13 = vpop.permute.xlu1 %1491 }
 0x2f3   : > { %1520 = vst.msk [vmem:[#allocation3 + $0x60] sm:$0xf] %vm1519_vm9, %v1492_v13  ;;  %v1673_v32 = vld [vmem:[#allocation3 + $0x38] sm:$0xff]  ;;  %vm2888_vm9 = vcmask (!%p3267_p5), 782016  }
 0x2f4   : > { %1665 = vst.msk [vmem:[#allocation3 + $0x60] sm:$0xf] %vm1664_vm10, %v1637_v2  ;;  %v4783_v2 = vld [vmem:[#allocation4 + $0x10] sm:$0xff]  ;;  %vm2894_vm10 = vcmask (!%p3267_p5), 847616  }
 0x2f6   : > { %v1672_v59 = vld [vmem:[#allocation3 + $0x30] sm:$0xff] }
 0x2f7   : > { %v1682_v23 = vpack.c.bf16 %v1673_v32, %v1672_v59  ;;  %v2008_v59 = vmul.f32 %v3217_v27, %v4783_v2  ;;  %v3216_v32 = vld [vmem:[%s5405_s3 + $0x70] sm:$0xff] }
 0x2f9   : > { %3320 = vmatmul.mubr.msk.bf16.gmra.mrb[12].mxu0 %vm1748_vm4, %v1682_v23  ;;  %v3219_v23 = vld [vmem:[%s5405_s3 + $0x88] sm:$0xff] }
 0x2fb   : > { %v1678_v22 = vld [vmem:[#allocation3 + $0x60] sm:$0xf] }
 0x2fc   : > { %v1685_v47 = vpack.c.bf16 %v1678_v22, %v1678_v22 }
 0x2fe   : > { %3332 = vmatmul.mubr.msk.bf16.gmra.mrb[8].mxu1 %vm1748_vm4, %v1685_v47  ;;  %v1863_v47 = vld [vmem:[#allocation4 + $0x8] sm:$0xff]  ;;  %vm2858_vm4 = vcmask (!%p3267_p5), 454016  }
 0x34c   : > { %v1808_v31 = vpop.f32.mrb[0].mxu0 }
 0x34d   : > { %v4715_v52 = vadd.f32 %v4712_v1, %v1808_v31  ;;  %v3309_v4 = vpop.f32.mrb[1].mxu0  ;;  %v2007_v31 = vmul.f32 %v3216_v32, %v1863_v47 }
 0x34e   : > { %v1811_v50 = vpop.f32.mrb[2].mxu0 }
 0x34f   : > { %3510 = vtanh.f32 %v4715_v52  ;;  %v4719_v19 = vadd.f32 %v4712_v1, %v1811_v50  ;;  %v3310_v12 = vpop.f32.mrb[3].mxu0  ;;  %v3218_v50 = vld [vmem:[%s5405_s3 + $0x80] sm:$0xff] }
 0x350   : > { %v3221_v12 = vld [vmem:[%s5405_s3 + $0x98] sm:$0xff] }
 0x351   : > { %3512 = vtanh.f32 %v4719_v19 }
 0x359   : > { %v3511_v0 = vpop.eup %3510 }
 0x35a   : > { %2253 = vrot.lane.b32.xlu1 %v3511_v0, %s3755_s27  ;;  %v4805_v0 = vld [vmem:[#allocation4 + $0x18] sm:$0xff] }
 0x35b   : > { %v3513_v24 = vpop.eup %3512 }
 0x35c   : > { %2255 = vrot.lane.b32.xlu0 %v3513_v24, %s3755_s27  ;;  %v4807_v24 = vld [vmem:[#allocation4 + $0x30] sm:$0xff] }
 0x374   : > { %v1816_v61 = vpop.f32.mrb[4].mxu0 }
 0x375   : > { %v3313_v62 = vpop.f32.mrb[5].mxu0  ;;  %v4732_v39 = vadd.f32 %v4712_v1, %v1816_v61  ;;  %v2009_v61 = vmul.f32 %v3218_v50, %v4805_v0 }
 0x376   : > { %v1819_v6 = vpop.f32.mrb[6].mxu0  ;;  %v2012_v62 = vmul.f32 %v3221_v12, %v4807_v24 }
 0x377   : > { %v4725_v48 = vadd.f32 %v4712_v1, %v1819_v6  ;;  %v3314_v49 = vpop.f32.mrb[7].mxu0  ;;  %v3220_v6 = vld [vmem:[%s5405_s3 + $0x90] sm:$0xff] }
 0x378   : > { %v3223_v49 = vld [vmem:[%s5405_s3 + $0xa8] sm:$0xff] }
 0x379   : > { %3514 = vtanh.f32 %v4725_v48 }
 0x37c   : > { %v1840_v45 = vpop.f32.mrb[0].mxu1 }
 0x37d   : > { %v4729_v3 = vadd.f32 %v4712_v1, %v1840_v45  ;;  %v3325_v46 = vpop.f32.mrb[1].mxu1  ;;  %v4819_v45 = vld [vmem:[#allocation4 + $0x28] sm:$0xff] }
 0x37e   : > { %v1843_v60 = vpop.f32.mrb[2].mxu1  ;;  %v1870_v46 = vld [vmem:[#allocation4 + $0x40] sm:$0xff] }
 0x37f   : > { %3516 = vtanh.f32 %v4729_v3  ;;  %v4736_v40 = vadd.f32 %v4712_v1, %v1843_v60  ;;  %v3326_v53 = vpop.f32.mrb[3].mxu1  ;;  %v2011_v60 = vmul.f32 %v3220_v6, %v4819_v45 }
 0x380   : > { %v2014_v53 = vmul.f32 %v3223_v49, %v1870_v46 }
 0x381   : > { %3518 = vtanh.f32 %v4736_v40 }
 0x382   : > { %3520 = vtanh.f32 %v4732_v39 }
 0x383   : > { %v3515_v63 = vpop.eup %3514 }
 0x384   : > { %2259 = vrot.lane.b32.xlu0 %v3515_v63, %s3755_s27  ;;  %v3222_v63 = vld [vmem:[%s5405_s3 + $0xa0] sm:$0xff] }
 0x389   : > { %v3517_v18 = vpop.eup %3516 }
 0x38a   : > { %2269 = vrot.lane.b32.xlu1 %v3517_v18, %s3755_s27  ;;  %v3225_v18 = vld [vmem:[%s5405_s3 + $0xb8] sm:$0xff] }
 0x38b   : > { %v3519_v54 = vpop.eup %3518 }
 0x38c   : > { %2271 = vrot.lane.b32.xlu0 %v3519_v54, %s3755_s27  ;;  %v3521_v10 = vpop.eup %3520  ;;  %v4830_v54 = vld [vmem:[#allocation4 + $0x38] sm:$0xff] }
 0x38e   : > { %2257 = vrot.lane.b32.xlu1 %v3521_v10, %s3755_s27  ;;  %v1872_v10 = vld [vmem:[#allocation4 + $0x50] sm:$0xff] }
 0x3a4   : > { %v1824_v28 = vpop.f32.mrb[8].mxu0 }
 0x3a5   : > { %v3317_v16 = vpop.f32.mrb[9].mxu0  ;;  %v4752_v33 = vadd.f32 %v4712_v1, %v1824_v28  ;;  %v2013_v28 = vmul.f32 %v3222_v63, %v4830_v54 }
 0x3a6   : > { %v1827_v11 = vpop.f32.mrb[10].mxu0  ;;  %v2016_v16 = vmul.f32 %v3225_v18, %v1872_v10  ;;  %v3244_v18 = vld [vmem:[%s5405_s3 + $0xe8] sm:$0xff] }
 0x3a7   : > { %v4745_v20 = vadd.f32 %v4712_v1, %v1827_v11  ;;  %v3318_v26 = vpop.f32.mrb[11].mxu0  ;;  %v3224_v11 = vld [vmem:[%s5405_s3 + $0xb0] sm:$0xff] }
 0x3a8   : > { %v3227_v26 = vld [vmem:[%s5405_s3 + $0xc8] sm:$0xf] }
 0x3a9   : > { %3522 = vtanh.f32 %v4745_v20 }
 0x3ac   : > { %v1848_v55 = vpop.f32.mrb[4].mxu1 }
 0x3ad   : > { %v4749_v42 = vadd.f32 %v4712_v1, %v1848_v55  ;;  %v3329_v43 = vpop.f32.mrb[5].mxu1  ;;  %v1871_v55 = vld [vmem:[#allocation4 + $0x48] sm:$0xff] }
 0x3ae   : > { %v1851_v56 = vpop.f32.mrb[6].mxu1  ;;  %v4841_v43 = vld [vmem:[#allocation4 + $0x60] sm:$0xf] }
 0x3af   : > { %3524 = vtanh.f32 %v4749_v42  ;;  %v4756_v38 = vadd.f32 %v4712_v1, %v1851_v56  ;;  %v3330_v41 = vpop.f32.mrb[7].mxu1  ;;  %v2015_v56 = vmul.f32 %v3224_v11, %v1871_v55 }
 0x3b0   : > { %v2018_v41 = vmul.f32 %v3227_v26, %v4841_v43  ;;  %v3241_v26 = vld [vmem:[%s5405_s3 + $0xd0] sm:$0xff] }
 0x3b1   : > { %3526 = vtanh.f32 %v4756_v38 }
 0x3b2   : > { %3528 = vtanh.f32 %v4752_v33 }
 0x3b3   : > { %v3523_v8 = vpop.eup %3522 }
 0x3b4   : > { %2263 = vrot.lane.b32.xlu0 %v3523_v8, %s3755_s27  ;;  %v3226_v8 = vld [vmem:[%s5405_s3 + $0xc0] sm:$0xff] }
 0x3b9   : > { %v3525_v21 = vpop.eup %3524 }
 0x3ba   : > { %2273 = vrot.lane.b32.xlu1 %v3525_v21, %s3755_s27  ;;  %v1873_v21 = vld [vmem:[#allocation4 + $0x58] sm:$0xff] }
 0x3bb   : > { %v3527_v51 = vpop.eup %3526 }
 0x3bc   : > { %2275 = vrot.lane.b32.xlu0 %v3527_v51, %s3755_s27  ;;  %v3529_v37 = vpop.eup %3528  ;;  %v2017_v51 = vmul.f32 %v3226_v8, %v1873_v21 }
 0x3be   : > { %2261 = vrot.lane.b32.xlu1 %v3529_v37, %s3755_s27  ;;  %v1875_v37 = vld [vmem:[%s5405_s3] sm:$0xff] }
 0x3cc   : > { %v1832_v15 = vpop.f32.mrb[12].mxu0 }
 0x3cd   : > { %v3321_v25 = vpop.f32.mrb[13].mxu0  ;;  %v4772_v44 = vadd.f32 %v4712_v1, %v1832_v15  ;;  %v1888_v15 = vmul.f32 %v1875_v37, %v1862_v14 }
 0x3ce   : > { %v1835_v35 = vpop.f32.mrb[14].mxu0  ;;  %v1883_v25 = vld [vmem:[%s5405_s3 + $0x40] sm:$0xff] }
 0x3cf   : > { %v4765_v7 = vadd.f32 %v4712_v1, %v1835_v35  ;;  %v3322_v29 = vpop.f32.mrb[15].mxu0  ;;  %v1901_v35 = vadd.f32 %v1888_v15, %v4715_v52  ;;  %v3248_v15 = vld [vmem:[%s5405_s3 + $0x108] sm:$0xff] }
 0x3d0   : > { %v1896_v29 = vmul.f32 %v1883_v25, %v1870_v46 }
 0x3d1   : > { %3530 = vtanh.f32 %v4765_v7  ;;  %v1856_v30 = vpop.f32.mrb[8].mxu1 }
 0x3d2   : > { %v4769_v5 = vadd.f32 %v4712_v1, %v1856_v30  ;;  %v3333_v34 = vpop.f32.mrb[9].mxu1  ;;  %v4794_v1 = vld [vmem:[#allocation4 + $0x20] sm:$0xff]  ;;  %v1877_v30 = vld [vmem:[%s5405_s3 + $0x10] sm:$0xff]  ;;  %v1909_v36 = vadd.f32 %v1896_v29, %v4729_v3  ;;  %v2254_v29 = vpop.permute.xlu1 %2253 }
 0x3d3   : > { %v1859_v58 = vpop.f32.mrb[10].mxu1  ;;  %v2010_v4 = vmul.f32 %v3219_v23, %v4794_v1  ;;  %v3202_v34 = vmul.f32 -1.442695, %v1901_v35 }
 0x3d4   : > { %3532 = vtanh.f32 %v4769_v5  ;;  %v3334_v17 = vpop.f32.mrb[11].mxu1  ;;  %v1876_v58 = vld [vmem:[%s5405_s3 + $0x8] sm:$0xff]  ;;  %v3210_v27 = vmul.f32 -1.442695, %v1909_v36 }
 0x3d5   : > { %3534 = vtanh.f32 %v4772_v44  ;;  %v1890_v17 = vmul.f32 %v1877_v30, %v4783_v2 }
 0x3d6   : > { %3536 = vpow2.f32 %v3202_v34 }
 0x3d7   : > { %3538 = vpow2.f32 %v3210_v27 }
 0x3db   : > { %v3531_v57 = vpop.eup %3530 }
 0x3dc   : > { %2267 = vrot.lane.b32.xlu0 %v3531_v57, %s3755_s27  ;;  %v1885_v57 = vld [vmem:[%s5405_s3 + $0x50] sm:$0xff] }
 0x3de   : > { %v3533_v13 = vpop.eup %3532 }
 0x3df   : > { %2277 = vrot.lane.b32.xlu1 %v3533_v13, %s3755_s27  ;;  %v3535_v22 = vpop.eup %3534  ;;  %v1884_v13 = vld [vmem:[%s5405_s3 + $0x48] sm:$0xff] }
 0x3e0   : > { %2032 = vrot.lane.b32.xlu0 %v2006_v9, %s3756_s14  ;;  %v1903_v9 = vadd.f32 %v1890_v17, %v4732_v39  ;;  %v1897_v23 = vmul.f32 %v1884_v13, %v1871_v55  ;;  %v3250_v17 = vld [vmem:[%s5405_s3 + $0x118] sm:$0xff] }
 0x3e1   : > { %v1882_v13 = vld [vmem:[%s5405_s3 + $0x38] sm:$0xff] }
 0x3e3   : > { %2265 = vrot.lane.b32.xlu1 %v3535_v22, %s3755_s27  ;;  %v3204_v22 = vmul.f32 -1.442695, %v1903_v9  ;;  %s3762_s27 = smov (!%p3267_p5), 112  }
 0x3e4   : > { %2036 = vrot.lane.b32.xlu0 %v2008_v59, %s3756_s14  ;;  %v1879_v59 = vld [vmem:[%s5405_s3 + $0x20] sm:$0xff] }
 0x3e5   : > { %3540 = vpow2.f32 %v3204_v22 }
 0x3e7   : > { %2034 = vrot.lane.b32.xlu1 %v2007_v31, %s3756_s14  ;;  %v1892_v31 = vmul.f32 %v1879_v59, %v4794_v1 }
 0x3e8   : > { %2040 = vrot.lane.b32.xlu0 %v2010_v4, %s3756_s14 }
 0x3e9   : > { %v1905_v6 = vadd.f32 %v1892_v31, %v4752_v33  ;;  %v1895_v31 = vmul.f32 %v1882_v13, %v4830_v54 }
 0x3eb   : > { %2038 = vrot.lane.b32.xlu1 %v2009_v61, %s3756_s14  ;;  %v1910_v61 = vadd.f32 %v1897_v23, %v4736_v40 }
 0x3ec   : > { %2044 = vrot.lane.b32.xlu0 %v2012_v62, %s3756_s14  ;;  %v3242_v62 = vld [vmem:[%s5405_s3 + $0xd8] sm:$0xff] }
 0x3ef   : > { %2042 = vrot.lane.b32.xlu1 %v2011_v60, %s3756_s14  ;;  %v3211_v60 = vmul.f32 -1.442695, %v1910_v61 }
 0x3f0   : > { %2048 = vrot.lane.b32.xlu0 %v2014_v53, %s3756_s14  ;;  %v1880_v53 = vld [vmem:[%s5405_s3 + $0x28] sm:$0xff] }
 0x3f1   : > { %v1893_v11 = vmul.f32 %v1880_v53, %v4819_v45 }
 0x3f3   : > { %2046 = vrot.lane.b32.xlu1 %v2013_v28, %s3756_s14  ;;  %v3206_v28 = vmul.f32 -1.442695, %v1905_v6  ;;  %v2256_v6 = vpop.permute.xlu0 %2255 }
 0x3f4   : > { %2052 = vrot.lane.b32.xlu0 %v2016_v16, %s3756_s14 }
 0x3f7   : > { %2050 = vrot.lane.b32.xlu1 %v2015_v56, %s3756_s14 }
 0x3f8   : > { %2056 = vrot.lane.b32.xlu0 %v2018_v41, %s3756_s14  ;;  %v3246_v41 = vld [vmem:[%s5405_s3 + $0xf8] sm:$0xff] }
 0x3fb   : > { %2054 = vrot.lane.b32.xlu1 %v2017_v51, %s3756_s14  ;;  %v3243_v51 = vld [vmem:[%s5405_s3 + $0xe0] sm:$0xff] }
 0x3fc   : > { %2190 = vrot.lane.b32.xlu0 %v1863_v47, %s3756_s14  ;;  %v2270_v9 = vpop.permute.xlu1 %2269 }
 0x3ff   : > { %2188 = vrot.lane.b32.xlu1 %v1862_v14, %s3756_s14  ;;  %v1889_v14 = vmul.f32 %v1876_v58, %v1863_v47  ;;  %v1878_v47 = vld [vmem:[%s5405_s3 + $0x18] sm:$0xff]  ;;  %v3245_v58 = vld [vmem:[%s5405_s3 + $0xf0] sm:$0xff] }
 0x400   : > { %2194 = vrot.lane.b32.xlu0 %v4805_v0, %s3756_s14  ;;  %v1891_v12 = vmul.f32 %v1878_v47, %v4805_v0  ;;  %v2258_v61 = vpop.permute.xlu1 %2257 }
 0x401   : > { %v1902_v32 = vadd.f32 %v1889_v14, %v4719_v19 }
 0x402   : > { %v1904_v0 = vadd.f32 %v1891_v12, %v4725_v48 }
 0x403   : > { %2192 = vrot.lane.b32.xlu1 %v4783_v2, %s3756_s14  ;;  %v1898_v2 = vmul.f32 %v1885_v57, %v1872_v10  ;;  %v3203_v50 = vmul.f32 -1.442695, %v1902_v32 }
 0x404   : > { %2198 = vrot.lane.b32.xlu0 %v4819_v45, %s3756_s14 }
 0x405   : > { %v1911_v4 = vadd.f32 %v1898_v2, %v4749_v42  ;;  %3542 = vpow2.f32 %v3203_v50  ;;  %v3247_v2 = vld [vmem:[%s5405_s3 + $0x100] sm:$0xff]  ;;  %v3249_v50 = vld [vmem:[%s5405_s3 + $0x110] sm:$0xff] }
 0x407   : > { %2196 = vrot.lane.b32.xlu1 %v4794_v1, %s3756_s14  ;;  %v3212_v49 = vmul.f32 -1.442695, %v1911_v4  ;;  %v1886_v1 = vld [vmem:[%s5405_s3 + $0x58] sm:$0xff]  ;;  %v1887_v4 = vld [vmem:[%s5405_s3 + $0x60] sm:$0xf] }
 0x408   : > { %2202 = vrot.lane.b32.xlu0 %v4830_v54, %s3756_s14  ;;  %v1899_v63 = vmul.f32 %v1886_v1, %v1873_v21  ;;  %v1881_v54 = vld [vmem:[%s5405_s3 + $0x30] sm:$0xff] }
 0x409   : > { %3544 = vpow2.f32 %v3212_v49  ;;  %v1900_v49 = vmul.f32 %v1887_v4, %v4841_v43 }
 0x40a   : > { %3546 = vpow2.f32 %v3211_v60  ;;  %v1912_v56 = vadd.f32 %v1899_v63, %v4756_v38  ;;  %v3251_v60 = vld [vmem:[%s5405_s3 + $0x120] sm:$0xff]  ;;  %v1894_v63 = vmul.f32 %v1881_v54, %v4807_v24  ;;  %v3253_v54 = vld [vmem:[%s5405_s3 + $0x130] sm:$0xf] }
 0x40b   : > { %2200 = vrot.lane.b32.xlu1 %v4807_v24, %s3756_s14  ;;  %3548 = vpow2.f32 %v3206_v28 }
 0x40c   : > { %2206 = vrot.lane.b32.xlu0 %v1871_v55, %s3756_s14  ;;  %v3205_v55 = vmul.f32 -1.442695, %v1904_v0  ;;  %v3213_v37 = vmul.f32 -1.442695, %v1912_v56  ;;  %v1908_v0 = vadd.f32 %v1895_v31, %v4765_v7 }
 0x40f   : > { %2204 = vrot.lane.b32.xlu1 %v1870_v46, %s3756_s14  ;;  %v3537_v46 = vpop.eup %3536 }
 0x410   : > { %2210 = vrot.lane.b32.xlu0 %v1873_v21, %s3756_s14  ;;  %v1953_v16 = vadd.f32 1.0, %v3537_v46  ;;  %v1906_v21 = vadd.f32 %v1893_v11, %v4745_v20 }
 0x412   : > { %3550 = vrcp.f32 %v1953_v16  ;;  %v3207_v34 = vmul.f32 -1.442695, %v1906_v21  ;;  %v1913_v16 = vadd.f32 %v1900_v49, %v4769_v5 }
 0x413   : > { %2208 = vrot.lane.b32.xlu1 %v1872_v10, %s3756_s14  ;;  %v3539_v10 = vpop.eup %3538  ;;  %3552 = vpow2.f32 %v3205_v55 }
 0x414   : > { %2399 = vrot.lane.b32.xlu0 %v3242_v62, %s3756_s14  ;;  %v1961_v8 = vadd.f32 1.0, %v3539_v10  ;;  %v3541_v45 = vpop.eup %3540  ;;  %v2260_v10 = vpop.permute.xlu0 %2259  ;;  %v3214_v24 = vmul.f32 -1.442695, %v1913_v16 }
 0x415   : > { %v3543_v25 = vpop.eup %3542  ;;  %v1955_v35 = vadd.f32 1.0, %v3541_v45  ;;  %v1907_v45 = vadd.f32 %v1894_v63, %v4772_v44 }
 0x416   : > { %3554 = vrcp.f32 %v1961_v8  ;;  %v3545_v30 = vpop.eup %3544  ;;  %v1954_v36 = vadd.f32 1.0, %v3543_v25 }
 0x417   : > { %2212 = vrot.lane.b32.xlu1 %v4841_v43, %s3756_s14  ;;  %3556 = vpow2.f32 %v3213_v37  ;;  %v3547_v57 = vpop.eup %3546  ;;  %v1963_v14 = vadd.f32 1.0, %v3545_v30 }
 0x418   : > { %2403 = vrot.lane.b32.xlu0 %v3244_v18, %s3756_s14  ;;  %3558 = vrcp.f32 %v1955_v35  ;;  %v3549_v27 = vpop.eup %3548  ;;  %v1962_v32 = vadd.f32 1.0, %v3547_v57  ;;  %v2272_v21 = vpop.permute.xlu0 %2271 }
 0x419   : > { %3560 = vpow2.f32 %v3207_v34  ;;  %v1957_v47 = vadd.f32 1.0, %v3549_v27 }
 0x41a   : > { %3562 = vrcp.f32 %v1954_v36 }
 0x41b   : > { %2397 = vrot.lane.b32.xlu1 %v3241_v26, %s3756_s14  ;;  %3564 = vrcp.f32 %v1963_v14  ;;  %v3209_v26 = vmul.f32 -1.442695, %v1908_v0 }
 0x41c   : > { %2407 = vrot.lane.b32.xlu0 %v3246_v41, %s3756_s14  ;;  %v3551_v59 = vpop.eup %3550  ;;  %3566 = vrcp.f32 %v1962_v32 }
 0x41d   : > { %v2292_v23 = vmul.f32 %v3551_v59, %v2254_v29  ;;  %v3553_v22 = vpop.eup %3552  ;;  %3568 = vrcp.f32 %v1957_v47  ;;  %v3208_v29 = vmul.f32 -1.442695, %v1907_v45 }
 0x41e   : > { %v1956_v62 = vadd.f32 1.0, %v3553_v22 }
 0x41f   : > { %2401 = vrot.lane.b32.xlu1 %v3243_v51, %s3756_s14 }
 0x420   : > { %2411 = vrot.lane.b32.xlu0 %v3248_v15, %s3756_s14  ;;  %v3555_v12 = vpop.eup %3554  ;;  %3570 = vrcp.f32 %v1956_v62 }
 0x421   : > { %v2300_v1 = vmul.f32 %v3555_v12, %v2270_v9  ;;  %v3557_v46 = vpop.eup %3556 }
 0x422   : > { %v3559_v53 = vpop.eup %3558  ;;  %v1964_v43 = vadd.f32 1.0, %v3557_v46 }
 0x423   : > { %2405 = vrot.lane.b32.xlu1 %v3245_v58, %s3756_s14  ;;  %v3561_v28 = vpop.eup %3560  ;;  %v2294_v11 = vmul.f32 %v3559_v53, %v2258_v61 }
 0x424   : > { %2415 = vrot.lane.b32.xlu0 %v3250_v17, %s3756_s14  ;;  %v3563_v55 = vpop.eup %3562  ;;  %v1958_v41 = vadd.f32 1.0, %v3561_v28  ;;  %3572 = vrcp.f32 %v1964_v43 }
 0x425   : > { %v3565_v56 = vpop.eup %3564  ;;  %v2293_v8 = vmul.f32 %v3563_v55, %v2256_v6  ;;  %3574 = vpow2.f32 %v3209_v26 }
 0x426   : > { %v3567_v15 = vpop.eup %3566  ;;  %3576 = vrcp.f32 %v1958_v41  ;;  %v2264_v30 = vpop.permute.xlu0 %2263 }
 0x427   : > { %2409 = vrot.lane.b32.xlu1 %v3247_v2, %s3756_s14  ;;  %v3569_v25 = vpop.eup %3568  ;;  %v2301_v35 = vmul.f32 %v3567_v15, %v2272_v21  ;;  %3578 = vpow2.f32 %v3214_v24 }
 0x428   : > { %2318 = vrot.lane.b32.xlu0 %v2292_v23, %s3756_s14  ;;  %3580 = vpow2.f32 %v3208_v29 }
 0x42a   : > { %v3571_v58 = vpop.eup %3570 }
 0x42b   : > { %2413 = vrot.lane.b32.xlu1 %v3249_v50, %s3756_s14  ;;  %v2295_v17 = vmul.f32 %v3571_v58, %v2260_v10 }
 0x42c   : > { %2334 = vrot.lane.b32.xlu0 %v2300_v1, %s3756_s14  ;;  %v2274_v18 = vpop.permute.xlu1 %2273 }
 0x42d   : > { %v2302_v51 = vmul.f32 %v3565_v56, %v2274_v18 }
 0x42e   : > { %v2276_v36 = vpop.permute.xlu0 %2275  ;;  %v3573_v57 = vpop.eup %3572 }
 0x42f   : > { %2417 = vrot.lane.b32.xlu1 %v3251_v60, %s3756_s14  ;;  %v3575_v14 = vpop.eup %3574  ;;  %v2303_v9 = vmul.f32 %v3573_v57, %v2276_v36  ;;  %v3252_v60 = vld [vmem:[%s5405_s3 + $0x128] sm:$0xff] }
 0x430   : > { %2322 = vrot.lane.b32.xlu0 %v2294_v11, %s3756_s14  ;;  %v2262_v37 = vpop.permute.xlu1 %2261  ;;  %v3577_v27 = vpop.eup %3576  ;;  %v1960_v2 = vadd.f32 1.0, %v3575_v14 }
 0x431   : > { %v2296_v34 = vmul.f32 %v3569_v25, %v2262_v37  ;;  %v3579_v13 = vpop.eup %3578  ;;  %v2297_v59 = vmul.f32 %v3577_v27, %v2264_v30 }
 0x432   : > { %v1965_v32 = vadd.f32 1.0, %v3579_v13  ;;  %v3581_v23 = vpop.eup %3580  ;;  %3582 = vrcp.f32 %v1960_v2 }
 0x433   : > { %2320 = vrot.lane.b32.xlu1 %v2293_v8, %s3756_s14  ;;  %v1959_v22 = vadd.f32 1.0, %v3581_v23 }
 0x434   : > { %2338 = vrot.lane.b32.xlu0 %v2302_v51, %s3756_s14  ;;  %3584 = vrcp.f32 %v1965_v32 }
 0x435   : > { %3586 = vrcp.f32 %v1959_v22 }
 0x437   : > { %2336 = vrot.lane.b32.xlu1 %v2301_v35, %s3756_s14 }
 0x438   : > { %2326 = vrot.lane.b32.xlu0 %v2296_v34, %s3756_s14 }
 0x43b   : > { %2324 = vrot.lane.b32.xlu1 %v2295_v17, %s3756_s14 }
 0x43c   : > { %v3583_v47 = vpop.eup %3582 }
 0x43e   : > { %v3585_v50 = vpop.eup %3584 }
 0x43f   : > { %2340 = vrot.lane.b32.xlu1 %v2303_v9, %s3756_s14  ;;  %v3587_v6 = vpop.eup %3586 }
 0x443   : > { %2328 = vrot.lane.b32.xlu1 %v2297_v59, %s3756_s14 }
 0x44e   : > { %v2268_v31 = vpop.permute.xlu0 %2267 }
 0x44f   : > { %v2299_v4 = vmul.f32 %v3583_v47, %v2268_v31 }
 0x451   : > { %v2278_v12 = vpop.permute.xlu1 %2277  ;;  %2332 = vrot.lane.b32.xlu1 %v2299_v4, %s3756_s14 }
 0x452   : > { %v2304_v61 = vmul.f32 %v3585_v50, %v2278_v12  ;;  %v2033_v62 = vpop.permute.xlu0 %2032 }
 0x453   : > { %v2071_v58 = vadd.f32 %v2033_v62, %v4715_v52 }
 0x454   : > { %2342 = vrot.lane.b32.xlu0 %v2304_v61, %s3756_s14 }
 0x455   : > { %v2266_v49 = vpop.permute.xlu1 %2265  ;;  %2421 = vrot.lane.b32.xlu1 %v3253_v54, %s3756_s14  ;;  %v3228_v14 = vmul.f32 -1.442695, %v2071_v58 }
 0x456   : > { %v2298_v1 = vmul.f32 %v3587_v6, %v2266_v49  ;;  %v2037_v46 = vpop.permute.xlu0 %2036 }
 0x457   : > { %v2073_v22 = vadd.f32 %v2037_v46, %v4732_v39 }
 0x458   : > { %2330 = vrot.lane.b32.xlu0 %v2298_v1, %s3756_s14 }
 0x459   : > { %v2035_v0 = vpop.permute.xlu1 %2034  ;;  %v3230_v54 = vmul.f32 -1.442695, %v2073_v22 }
 0x45a   : > { %v2041_v53 = vpop.permute.xlu0 %2040  ;;  %v2072_v50 = vadd.f32 %v2035_v0, %v4719_v19 }
 0x45b   : > { %v2075_v0 = vadd.f32 %v2041_v53, %v4752_v33 }
 0x45c   : > { %2419 = vrot.lane.b32.xlu0 %v3252_v60, %s3756_s14  ;;  %v3229_v1 = vmul.f32 -1.442695, %v2072_v50  ;;  %s3757_s14 = smov 16  }
 0x45d   : > { %v2039_v63 = vpop.permute.xlu1 %2038 }
 0x45e   : > { %v2045_v18 = vpop.permute.xlu0 %2044 }
 0x45f   : > { %v2077_v28 = vadd.f32 %v2045_v18, %v4772_v44 }
 0x461   : > { %v3234_v43 = vmul.f32 -1.442695, %v2077_v28  ;;  %v4997_v16 = vpop.permute.xlu1 %2042  ;;  %v2074_v28 = vadd.f32 %v2039_v63, %v4725_v48 }
 0x462   : > { %v2049_v10 = vpop.permute.xlu0 %2048 }
 0x463   : > { %3588 = vpow2.f32 %v3234_v43  ;;  %v2079_v9 = vadd.f32 %v2049_v10, %v4729_v3 }
 0x465   : > { %v2047_v11 = vpop.permute.xlu1 %2046  ;;  %v3236_v47 = vmul.f32 -1.442695, %v2079_v9 }
 0x466   : > { %v2078_v26 = vadd.f32 %v2047_v11, %v4765_v7  ;;  %v2053_v55 = vpop.permute.xlu0 %2052 }
 0x467   : > { %v2081_v6 = vadd.f32 %v2053_v55, %v4749_v42 }
 0x468   : > { %v3235_v56 = vmul.f32 -1.442695, %v2078_v26 }
 0x469   : > { %v2051_v41 = vpop.permute.xlu1 %2050  ;;  %v3238_v43 = vmul.f32 -1.442695, %v2081_v6 }
 0x46a   : > { %3590 = vpow2.f32 %v3235_v56  ;;  %v2057_v8 = vpop.permute.xlu0 %2056  ;;  %v2080_v46 = vadd.f32 %v2051_v41, %v4736_v40  ;;  %v3231_v41 = vmul.f32 -1.442695, %v2074_v28 }
 0x46b   : > { %v2083_v45 = vadd.f32 %v2057_v8, %v4769_v5  ;;  %v3232_v8 = vmul.f32 -1.442695, %v2075_v0 }
 0x46c   : > { %v3237_v11 = vmul.f32 -1.442695, %v2080_v46 }
 0x46d   : > { %v3589_v24 = vpop.eup %3588  ;;  %v3240_v21 = vmul.f32 -1.442695, %v2083_v45  ;;  %v2055_v51 = vpop.permute.xlu1 %2054 }
 0x46e   : > { %v2082_v37 = vadd.f32 %v2055_v51, %v4756_v38  ;;  %v5002_v15 = vpop.permute.xlu0 %2190  ;;  %v2129_v25 = vadd.f32 1.0, %v3589_v24 }
 0x46f   : > { %3592 = vpow2.f32 %v3240_v21 }
 0x470   : > { %v3239_v35 = vmul.f32 -1.442695, %v2082_v37 }
 0x471   : > { %v5004_v29 = vpop.permute.xlu1 %2188 }
 0x472   : > { %3594 = vpow2.f32 %v3239_v35  ;;  %v5006_v30 = vpop.permute.xlu0 %2194 }
 0x473   : > { %3596 = vrcp.f32 %v2129_v25  ;;  %v2076_v25 = vadd.f32 %v4997_v16, %v4745_v20 }
 0x474   : > { %v3591_v34 = vpop.eup %3590 }
 0x475   : > { %v2130_v17 = vadd.f32 1.0, %v3591_v34  ;;  %v5009_v36 = vpop.permute.xlu1 %2192  ;;  %v3233_v9 = vmul.f32 -1.442695, %v2076_v25 }
 0x476   : > { %v5011_v57 = vpop.permute.xlu0 %2198 }
 0x477   : > { %3598 = vrcp.f32 %v2130_v17 }
 0x478   : > { %3600 = vpow2.f32 %v3228_v14 }
 0x479   : > { %v5014_v27 = vpop.permute.xlu1 %2196  ;;  %v3593_v2 = vpop.eup %3592 }
 0x47a   : > { %v2203_v13 = vpop.permute.xlu0 %2202  ;;  %v2135_v32 = vadd.f32 1.0, %v3593_v2 }
 0x47c   : > { %v3595_v59 = vpop.eup %3594  ;;  %3602 = vrcp.f32 %v2135_v32 }
 0x47d   : > { %v3597_v23 = vpop.eup %3596  ;;  %v2134_v31 = vadd.f32 1.0, %v3595_v59  ;;  %v2201_v4 = vpop.permute.xlu1 %2200 }
 0x47e   : > { %v5018_v12 = vmul.f32 %v3597_v23, %v2201_v4  ;;  %v5020_v61 = vpop.permute.xlu0 %2206 }
 0x47f   : > { %3604 = vrcp.f32 %v2134_v31 }
 0x480   : > { %3606 = vpow2.f32 %v3236_v47 }
 0x481   : > { %v3599_v62 = vpop.eup %3598  ;;  %v2205_v49 = vpop.permute.xlu1 %2204  ;;  %3608 = vpow2.f32 %v3230_v54 }
 0x482   : > { %v5024_v60 = vmul.f32 %v3599_v62, %v2203_v13  ;;  %v2211_v18 = vpop.permute.xlu0 %2210  ;;  %3610 = vpow2.f32 %v3229_v1  ;;  %v3601_v55 = vpop.eup %3600 }
 0x483   : > { %3612 = vpow2.f32 %v3238_v43  ;;  %v2123_v21 = vadd.f32 1.0, %v3601_v55 }
 0x484   : > { %3614 = vpow2.f32 %v3237_v11 }
 0x485   : > { %v5028_v10 = vpop.permute.xlu1 %2208  ;;  %3616 = vpow2.f32 %v3232_v8 }
 0x486   : > { %v5030_v26 = vpop.permute.xlu0 %2399  ;;  %v3603_v56 = vpop.eup %3602  ;;  %3618 = vpow2.f32 %v3231_v41 }
 0x487   : > { %3620 = vrcp.f32 %v2123_v21 }
 0x489   : > { %v3605_v45 = vpop.eup %3604  ;;  %v2213_v24 = vpop.permute.xlu1 %2212 }
 0x48a   : > { %v5032_v53 = vmul.f32 %v3605_v45, %v2211_v18  ;;  %v5034_v51 = vmul.f32 %v3603_v56, %v2213_v24  ;;  %v5036_v63 = vpop.permute.xlu0 %2403  ;;  %v3607_v37 = vpop.eup %3606 }
 0x48b   : > { %v2131_v34 = vadd.f32 1.0, %v3607_v37  ;;  %v3609_v17 = vpop.eup %3608 }
 0x48c   : > { %v3611_v14 = vpop.eup %3610  ;;  %v2125_v2 = vadd.f32 1.0, %v3609_v17 }
 0x48d   : > { %v2398_v35 = vpop.permute.xlu1 %2397  ;;  %3622 = vrcp.f32 %v2131_v34  ;;  %v3613_v32 = vpop.eup %3612  ;;  %v2124_v23 = vadd.f32 1.0, %v3611_v14 }
 0x48e   : > { %v5040_v58 = vpop.permute.xlu0 %2407  ;;  %v3615_v22 = vpop.eup %3614  ;;  %3624 = vpow2.f32 %v3233_v9  ;;  %v2133_v16 = vadd.f32 1.0, %v3613_v32 }
 0x48f   : > { %v3617_v31 = vpop.eup %3616  ;;  %3626 = vrcp.f32 %v2125_v2  ;;  %v2132_v62 = vadd.f32 1.0, %v3615_v22 }
 0x490   : > { %v3619_v50 = vpop.eup %3618  ;;  %3628 = vrcp.f32 %v2124_v23  ;;  %v2127_v46 = vadd.f32 1.0, %v3617_v31 }
 0x491   : > { %v2402_v13 = vpop.permute.xlu1 %2401  ;;  %v3621_v54 = vpop.eup %3620  ;;  %3630 = vrcp.f32 %v2133_v16  ;;  %v2126_v0 = vadd.f32 1.0, %v3619_v50 }
 0x492   : > { %v5042_v59 = vpop.permute.xlu0 %2411  ;;  %v2227_v6 = vmul.f32 %v3621_v54, %v5004_v29  ;;  %3632 = vrcp.f32 %v2132_v62 }
 0x493   : > { %3634 = vrcp.f32 %v2127_v46 }
 0x494   : > { %3636 = vrcp.f32 %v2126_v0 }
 0x495   : > { %v2406_v47 = vpop.permute.xlu1 %2405 }
 0x496   : > { %v2416_v4 = vpop.permute.xlu0 %2415 }
 0x497   : > { %v3623_v43 = vpop.eup %3622 }
 0x498   : > { %v2235_v11 = vmul.f32 %v3623_v43, %v2205_v49  ;;  %v3625_v45 = vpop.eup %3624 }
 0x499   : > { %v5045_v1 = vpop.permute.xlu1 %2409  ;;  %v3627_v29 = vpop.eup %3626  ;;  %v2128_v34 = vadd.f32 1.0, %v3625_v45 }
 0x49a   : > { %v2319_v18 = vpop.permute.xlu0 %2318  ;;  %v3629_v24 = vpop.eup %3628  ;;  %v2229_v21 = vmul.f32 %v3627_v29, %v5009_v36 }
 0x49b   : > { %v5047_v28 = vadd.f32 %v2319_v18, %v2227_v6  ;;  %v3631_v17 = vpop.eup %3630  ;;  %v2228_v14 = vmul.f32 %v3629_v24, %v5002_v15  ;;  %3638 = vrcp.f32 %v2128_v34 }
 0x49c   : > { %v3633_v9 = vpop.eup %3632  ;;  %v2237_v2 = vmul.f32 %v3631_v17, %v5028_v10 }
 0x49d   : > { %v2436_v55 = vmul.f32 %v2398_v35, %v5047_v28  ;;  %v2414_v56 = vpop.permute.xlu1 %2413  ;;  %v3635_v16 = vpop.eup %3634  ;;  %v2236_v50 = vmul.f32 %v3633_v9, %v5020_v61 }
 0x49e   : > { %v2335_v8 = vpop.permute.xlu0 %2334  ;;  %v3637_v62 = vpop.eup %3636  ;;  %v2231_v10 = vmul.f32 %v3635_v16, %v5014_v27 }
 0x49f   : > { %v5050_v41 = vadd.f32 %v2335_v8, %v2235_v11  ;;  %2462 = vrot.lane.b32.xlu0 %v2436_v55, %s3757_s14  ;;  %v2230_v61 = vmul.f32 %v3637_v62, %v5006_v30 }
 0x4a1   : > { %v2444_v37 = vmul.f32 %v2414_v56, %v5050_v41  ;;  %v2418_v25 = vpop.permute.xlu1 %2417 }
 0x4a2   : > { %v2323_v49 = vpop.permute.xlu0 %2322 }
 0x4a3   : > { %v5055_v35 = vadd.f32 %v2323_v49, %v2229_v21  ;;  %2478 = vrot.lane.b32.xlu0 %v2444_v37, %s3757_s14 }
 0x4a5   : > { %v2438_v32 = vmul.f32 %v2402_v13, %v5055_v35  ;;  %v2321_v23 = vpop.permute.xlu1 %2320  ;;  %v3639_v55 = vpop.eup %3638 }
 0x4a6   : > { %v5061_v22 = vadd.f32 %v2321_v23, %v2228_v14  ;;  %v2339_v36 = vpop.permute.xlu0 %2338  ;;  %v2232_v30 = vmul.f32 %v3639_v55, %v5011_v57 }
 0x4a7   : > { %v5063_v31 = vadd.f32 %v2339_v36, %v2237_v2  ;;  %2466 = vrot.lane.b32.xlu0 %v2438_v32, %s3757_s14 }
 0x4a8   : > { %v2437_v15 = vmul.f32 %v5030_v26, %v5061_v22  ;;  %3640 = vtanh.f32 %v5061_v22 }
 0x4a9   : > { %v2446_v13 = vmul.f32 %v2418_v25, %v5063_v31  ;;  %v2337_v54 = vpop.permute.xlu1 %2336 }
 0x4aa   : > { %v5071_v6 = vadd.f32 %v2337_v54, %v2236_v50  ;;  %v2327_v46 = vpop.permute.xlu0 %2326  ;;  %2464 = vrot.lane.b32.xlu1 %v2437_v15, %s3757_s14 }
 0x4ab   : > { %v5074_v18 = vadd.f32 %v2327_v46, %v2231_v10  ;;  %2482 = vrot.lane.b32.xlu0 %v2446_v13, %s3757_s14 }
 0x4ac   : > { %v2445_v0 = vmul.f32 %v2416_v4, %v5071_v6 }
 0x4ad   : > { %v2440_v26 = vmul.f32 %v2406_v47, %v5074_v18  ;;  %v2325_v43 = vpop.permute.xlu1 %2324 }
 0x4ae   : > { %v5080_v27 = vadd.f32 %v2325_v43, %v2230_v61  ;;  %2480 = vrot.lane.b32.xlu1 %v2445_v0, %s3757_s14 }
 0x4af   : > { %2470 = vrot.lane.b32.xlu0 %v2440_v26, %s3757_s14 }
 0x4b0   : > { %v2439_v11 = vmul.f32 %v5036_v63, %v5080_v27  ;;  %3642 = vtanh.f32 %v5080_v27 }
 0x4b1   : > { %v2341_v56 = vpop.permute.xlu1 %2340  ;;  %3644 = vtanh.f32 %v5047_v28 }
 0x4b2   : > { %2468 = vrot.lane.b32.xlu1 %v2439_v11, %s3757_s14  ;;  %v2368_v57 = vadd.f32 %v2341_v56, %v5032_v53  ;;  %3646 = vtanh.f32 %v5071_v6 }
 0x4b3   : > { %3648 = vtanh.f32 %v5055_v35 }
 0x4b5   : > { %v2329_v8 = vpop.permute.xlu1 %2328 }
 0x4b6   : > { %v5088_v4 = vadd.f32 %v2329_v8, %v2232_v30 }
 0x4b8   : > { %v2441_v47 = vmul.f32 %v5040_v58, %v5088_v4  ;;  %3650 = vtanh.f32 %v5088_v4 }
 0x4b9   : > { %3652 = vtanh.f32 %v5074_v18 }
 0x4c3   : > { %v2333_v45 = vpop.permute.xlu1 %2332 }
 0x4c4   : > { %v5093_v29 = vadd.f32 %v2333_v45, %v5024_v60 }
 0x4c6   : > { %v2443_v24 = vmul.f32 %v5042_v59, %v5093_v29  ;;  %v2343_v63 = vpop.permute.xlu0 %2342  ;;  %3654 = vtanh.f32 %v5093_v29 }
 0x4c7   : > { %v2369_v25 = vadd.f32 %v2343_v63, %v5034_v51  ;;  %v2422_v58 = vpop.permute.xlu1 %2421  ;;  %3656 = vtanh.f32 %v5050_v41 }
 0x4c8   : > { %3658 = vtanh.f32 %v2368_v57 }
 0x4c9   : > { %v2448_v60 = vmul.f32 %v2422_v58, %v2369_v25  ;;  %3660 = vtanh.f32 %v5063_v31 }
 0x4ca   : > { %v2331_v21 = vpop.permute.xlu0 %2330 }
 0x4cb   : > { %v2363_v37 = vadd.f32 %v2331_v21, %v5018_v12  ;;  %v3641_v12 = vpop.eup %3640 }
 0x4cc   : > { %v3643_v53 = vpop.eup %3642 }
 0x4cd   : > { %v2442_v49 = vmul.f32 %v5045_v1, %v2363_v37  ;;  %v3645_v51 = vpop.eup %3644  ;;  %3662 = vtanh.f32 %v2363_v37 }
 0x4ce   : > { %v2420_v34 = vpop.permute.xlu0 %2419  ;;  %v3647_v59 = vpop.eup %3646  ;;  %3664 = vtanh.f32 %v2369_v25 }
 0x4cf   : > { %v2447_v17 = vmul.f32 %v2420_v34, %v2368_v57  ;;  %2474 = vrot.lane.b32.xlu0 %v2442_v49, %s3757_s14  ;;  %v3649_v1 = vpop.eup %3648 }
 0x4d0   : > { %v3651_v14 = vpop.eup %3650 }
 0x4d1   : > { %2484 = vrot.lane.b32.xlu1 %v2447_v17, %s3757_s14  ;;  %v3653_v9 = vpop.eup %3652 }
 0x4d2   : > { %v3655_v2 = vpop.eup %3654 }
 0x4d3   : > { %2486 = vrot.lane.b32.xlu0 %v2448_v60, %s3757_s14  ;;  %v3657_v32 = vpop.eup %3656 }
 0x4d4   : > { %v3659_v23 = vpop.eup %3658 }
 0x4d5   : > { %2472 = vrot.lane.b32.xlu1 %v2441_v47, %s3757_s14  ;;  %v3661_v36 = vpop.eup %3660 }
 0x4d7   : > { %2620 = vrot.lane.b32.xlu0 %v3641_v12, %s3757_s14  ;;  %v3663_v16 = vpop.eup %3662 }
 0x4d8   : > { %v3665_v50 = vpop.eup %3664 }
 0x4d9   : > { %2476 = vrot.lane.b32.xlu1 %v2443_v24, %s3757_s14 }
 0x4db   : > { %2624 = vrot.lane.b32.xlu0 %v3643_v53, %s3757_s14 }
 0x4dd   : > { %2618 = vrot.lane.b32.xlu1 %v3645_v51, %s3757_s14 }
 0x4df   : > { %2636 = vrot.lane.b32.xlu0 %v3647_v59, %s3757_s14 }
 0x4e1   : > { %2622 = vrot.lane.b32.xlu1 %v3649_v1, %s3757_s14 }
 0x4e3   : > { %2628 = vrot.lane.b32.xlu0 %v3651_v14, %s3757_s14 }
 0x4e5   : > { %2626 = vrot.lane.b32.xlu1 %v3653_v9, %s3757_s14 }
 0x4e7   : > { %2632 = vrot.lane.b32.xlu0 %v3655_v2, %s3757_s14 }
 0x4e9   : > { %2634 = vrot.lane.b32.xlu1 %v3657_v32, %s3757_s14 }
 0x4eb   : > { %2640 = vrot.lane.b32.xlu0 %v3659_v23, %s3757_s14 }
 0x4ed   : > { %2638 = vrot.lane.b32.xlu1 %v3661_v36, %s3757_s14 }
 0x4ef   : > { %2683 = vrot.lane.b32.xlu0 %v5047_v28, %s3758_s18 }
 0x4f1   : > { %2630 = vrot.lane.b32.xlu1 %v3663_v16, %s3757_s14 }
 0x4f3   : > { %2687 = vrot.lane.b32.xlu0 %v5055_v35, %s3758_s18 }
 0x4f5   : > { %2642 = vrot.lane.b32.xlu1 %v3665_v50, %s3757_s14  ;;  %s3766_s14 = smov (!%p3267_p5), 24  }
 0x4f7   : > { %2691 = vrot.lane.b32.xlu0 %v5074_v18, %s3758_s18 }
 0x4f9   : > { %2685 = vrot.lane.b32.xlu1 %v5061_v22, %s3758_s18 }
 0x4fb   : > { %2695 = vrot.lane.b32.xlu0 %v2363_v37, %s3758_s18 }
 0x4fd   : > { %2689 = vrot.lane.b32.xlu1 %v5080_v27, %s3758_s18 }
 0x4ff   : > { %2699 = vrot.lane.b32.xlu0 %v5050_v41, %s3758_s18 }
 0x501   : > { %2693 = vrot.lane.b32.xlu1 %v5088_v4, %s3758_s18 }
 0x503   : > { %2703 = vrot.lane.b32.xlu0 %v5063_v31, %s3758_s18 }
 0x505   : > { %2697 = vrot.lane.b32.xlu1 %v5093_v29, %s3758_s18 }
 0x507   : > { %2707 = vrot.lane.b32.xlu0 %v2369_v25, %s3758_s18 }
 0x509   : > { %2701 = vrot.lane.b32.xlu1 %v5071_v6, %s3758_s18 }
 0x50d   : > { %2705 = vrot.lane.b32.xlu1 %v2368_v57, %s3758_s18 }
 0x511   : > { %v2463_v35 = vpop.permute.xlu0 %2462 }
 0x512   : > { %v2501_v13 = vadd.f32 %v2463_v35, %v4715_v52 }
 0x514   : > { %v3254_v31 = vmul.f32 -1.442695, %v2501_v13 }
 0x515   : > { %v2479_v10 = vpop.permute.xlu0 %2478 }
 0x519   : > { %v2467_v46 = vpop.permute.xlu0 %2466 }
 0x51a   : > { %v2503_v52 = vadd.f32 %v2467_v46, %v4732_v39 }
 0x51c   : > { %v2465_v28 = vpop.permute.xlu1 %2464 }
 0x51d   : > { %v2502_v15 = vadd.f32 %v2465_v28, %v4719_v19  ;;  %v2483_v0 = vpop.permute.xlu0 %2482  ;;  %v2509_v19 = vadd.f32 %v2479_v10, %v4729_v3 }
 0x51e   : > { %v2511_v55 = vadd.f32 %v2483_v0, %v4749_v42 }
 0x51f   : > { %v3255_v62 = vmul.f32 -1.442695, %v2502_v15  ;;  %v3262_v27 = vmul.f32 -1.442695, %v2509_v19 }
 0x520   : > { %v2481_v22 = vpop.permute.xlu1 %2480  ;;  %v3264_v4 = vmul.f32 -1.442695, %v2511_v55 }
 0x521   : > { %3666 = vpow2.f32 %v3255_v62  ;;  %v2510_v41 = vadd.f32 %v2481_v22, %v4736_v40  ;;  %v2471_v11 = vpop.permute.xlu0 %2470 }
 0x522   : > { %3668 = vpow2.f32 %v3254_v31  ;;  %v2505_v47 = vadd.f32 %v2471_v11, %v4752_v33 }
 0x523   : > { %v3263_v18 = vmul.f32 -1.442695, %v2510_v41 }
 0x524   : > { %v2469_v54 = vpop.permute.xlu1 %2468  ;;  %v3258_v39 = vmul.f32 -1.442695, %v2505_v47 }
 0x525   : > { %v2504_v61 = vadd.f32 %v2469_v54, %v4725_v48  ;;  %3670 = vpow2.f32 %v3263_v18  ;;  %v3256_v48 = vmul.f32 -1.442695, %v2503_v52 }
 0x527   : > { %v3257_v6 = vmul.f32 -1.442695, %v2504_v61 }
 0x529   : > { %3672 = vpow2.f32 %v3257_v6 }
 0x52b   : > { %v3667_v26 = vpop.eup %3666 }
 0x52c   : > { %v2554_v43 = vadd.f32 1.0, %v3667_v26  ;;  %v3669_v40 = vpop.eup %3668 }
 0x52d   : > { %v2553_v30 = vadd.f32 1.0, %v3669_v40 }
 0x52e   : > { %3674 = vrcp.f32 %v2554_v43 }
 0x52f   : > { %v3671_v56 = vpop.eup %3670  ;;  %3676 = vpow2.f32 %v3262_v27 }
 0x530   : > { %v2562_v45 = vadd.f32 1.0, %v3671_v56  ;;  %3678 = vpow2.f32 %v3256_v48 }
 0x531   : > { %3680 = vrcp.f32 %v2553_v30 }
 0x532   : > { %3682 = vpow2.f32 %v3264_v4 }
 0x533   : > { %v3673_v29 = vpop.eup %3672  ;;  %3684 = vrcp.f32 %v2562_v45 }
 0x534   : > { %v2556_v42 = vadd.f32 1.0, %v3673_v29  ;;  %3686 = vpow2.f32 %v3258_v39 }
 0x536   : > { %3688 = vrcp.f32 %v2556_v42 }
 0x538   : > { %v3675_v25 = vpop.eup %3674 }
 0x539   : > { %v3677_v33 = vpop.eup %3676 }
 0x53a   : > { %v3679_v51 = vpop.eup %3678 }
 0x53b   : > { %v3681_v1 = vpop.eup %3680 }
 0x53c   : > { %v3683_v9 = vpop.eup %3682 }
 0x53d   : > { %v2563_v28 = vadd.f32 1.0, %v3683_v9 }
 0x541   : > { %v2475_v8 = vpop.permute.xlu0 %2474 }
 0x542   : > { %v2507_v21 = vadd.f32 %v2475_v8, %v4772_v44 }
 0x543   : > { %v2485_v3 = vpop.permute.xlu1 %2484 }
 0x544   : > { %v2512_v63 = vadd.f32 %v2485_v3, %v4756_v38  ;;  %v3260_v60 = vmul.f32 -1.442695, %v2507_v21 }
 0x545   : > { %v2487_v24 = vpop.permute.xlu0 %2486 }
 0x546   : > { %v3265_v58 = vmul.f32 -1.442695, %v2512_v63  ;;  %v2513_v38 = vadd.f32 %v2487_v24, %v4769_v5  ;;  %v3685_v5 = vpop.eup %3684 }
 0x547   : > { %v2473_v37 = vpop.permute.xlu1 %2472  ;;  %v3687_v50 = vpop.eup %3686 }
 0x548   : > { %v2506_v57 = vadd.f32 %v2473_v37, %v4745_v20  ;;  %v2561_v20 = vadd.f32 1.0, %v3677_v33  ;;  %v3266_v2 = vmul.f32 -1.442695, %v2513_v38  ;;  %v3689_v35 = vpop.eup %3688  ;;  %v2557_v54 = vadd.f32 1.0, %v3687_v50 }
 0x549   : > { %v2621_v49 = vpop.permute.xlu0 %2620 }
 0x54a   : > { %v3259_v34 = vmul.f32 -1.442695, %v2506_v57  ;;  %v5150_v17 = vmul.f32 %v3675_v25, %v2621_v49 }
 0x54b   : > { %v2477_v12 = vpop.permute.xlu1 %2476 }
 0x54c   : > { %3690 = vpow2.f32 %v3259_v34  ;;  %v2508_v53 = vadd.f32 %v2477_v12, %v4765_v7  ;;  %2752 = vrot.lane.b32.xlu0 %v5150_v17, %s3759_s19  ;;  %v2555_v7 = vadd.f32 1.0, %v3679_v51 }
 0x54d   : > { %v2625_v44 = vpop.permute.xlu0 %2624  ;;  %3692 = vpow2.f32 %v3265_v58 }
 0x54e   : > { %v3261_v59 = vmul.f32 -1.442695, %v2508_v53  ;;  %3694 = vpow2.f32 %v3260_v60  ;;  %v5164_v62 = vmul.f32 %v3689_v35, %v2625_v44 }
 0x54f   : > { %v2619_v14 = vpop.permute.xlu1 %2618 }
 0x550   : > { %3696 = vpow2.f32 %v3261_v59  ;;  %v5156_v32 = vmul.f32 %v3681_v1, %v2619_v14 }
 0x551   : > { %3698 = vrcp.f32 %v2561_v20  ;;  %v2637_v23 = vpop.permute.xlu0 %2636 }
 0x552   : > { %v5158_v36 = vmul.f32 %v3685_v5, %v2637_v23  ;;  %2750 = vrot.lane.b32.xlu1 %v5156_v32, %s3759_s19  ;;  %3700 = vpow2.f32 %v3266_v2 }
 0x553   : > { %v2623_v16 = vpop.permute.xlu1 %2622  ;;  %3702 = vrcp.f32 %v2555_v7 }
 0x554   : > { %2768 = vrot.lane.b32.xlu0 %v5158_v36, %s3759_s19  ;;  %3704 = vrcp.f32 %v2563_v28 }
 0x555   : > { %v2629_v15 = vpop.permute.xlu0 %2628 }
 0x556   : > { %v3691_v22 = vpop.eup %3690 }
 0x557   : > { %v2558_v10 = vadd.f32 1.0, %v3691_v22  ;;  %v2627_v13 = vpop.permute.xlu1 %2626  ;;  %v3693_v41 = vpop.eup %3692 }
 0x558   : > { %2756 = vrot.lane.b32.xlu0 %v5164_v62, %s3759_s19  ;;  %v3695_v31 = vpop.eup %3694  ;;  %v2564_v6 = vadd.f32 1.0, %v3693_v41  ;;  %v5232_v41 = vmax.f32 (!%p3267_p5), %v5150_v17, 0.0  ;;  %v2960_v17 = vld [vmem:[%s5407_s5 + $0x10] sm:$0xff] (!%p3267_p5) }
 0x559   : > { %3706 = vrcp.f32 %v2558_v10  ;;  %v2633_v46 = vpop.permute.xlu0 %2632  ;;  %v2559_v43 = vadd.f32 1.0, %v3695_v31 }
 0x55a   : > { %v3697_v18 = vpop.eup %3696  ;;  %3708 = vrcp.f32 %v2557_v54 }
 0x55b   : > { %v3699_v61 = vpop.eup %3698  ;;  %v2560_v0 = vadd.f32 1.0, %v3697_v18  ;;  %v2635_v26 = vpop.permute.xlu1 %2634  ;;  %v2961_v18 = vld [vmem:[%s5407_s5 + $0x18] sm:$0xff] (!%p3267_p5) }
 0x55c   : > { %v5168_v19 = vmul.f32 %v3699_v61, %v2635_v26  ;;  %v3701_v52 = vpop.eup %3700  ;;  %v3764_v26 = vmov (!%p3267_p5), 0.0|0.0  }
 0x55d   : > { %3710 = vrcp.f32 %v2560_v0  ;;  %v2641_v27 = vpop.permute.xlu0 %2640  ;;  %v3703_v11 = vpop.eup %3702  ;;  %v2565_v56 = vadd.f32 1.0, %v3701_v52  ;;  %3346 = vmatprep.subr.bf16.mxu0 (!%p3267_p5), %v3764_v26  ;;  %3382 = vmatprep.subr.bf16.mxu1 (!%p3267_p5), %v3764_v26  ;;  %v2963_v52 = vld [vmem:[%s5407_s5 + $0x28] sm:$0xff] (!%p3267_p5) }
 0x55e   : > { %2766 = vrot.lane.b32.xlu1 %v5168_v19, %s3759_s19  ;;  %3712 = vrcp.f32 %v2564_v6  ;;  %v5172_v55 = vmul.f32 %v3703_v11, %v2623_v16  ;;  %v3705_v30 = vpop.eup %3704  ;;  %v2811_v6 = vmax.f32 (!%p3267_p5), %v5164_v62, 0.0  ;;  %v2816_v11 = vmax.f32 (!%p3267_p5), %v5168_v19, 0.0 }
 0x55f   : > { %v2639_v40 = vpop.permute.xlu1 %2638  ;;  %3714 = vrcp.f32 %v2559_v43  ;;  %v3350_v43 = vpack.c.bf16 (!%p3267_p5), %v2961_v18, %v2960_v17 }
 0x560   : > { %v5179_v45 = vmul.f32 %v3705_v30, %v2639_v40  ;;  %3716 = vrcp.f32 %v2565_v56  ;;  %v2810_v31 = vmax.f32 (!%p3267_p5), %v5172_v55, 0.0  ;;  %v2860_v62 = vcombine.high (!%p3267_p5), %v2811_v6, %v2811_v6  ;;  %v2965_v56 = vld [vmem:[%s5407_s5 + $0x38] sm:$0xff] (!%p3267_p5) }
 0x561   : > { %v2684_v48 = vpop.permute.xlu0 %2683  ;;  %v2919_v19 = vcombine.high (!%p3267_p5), %v2816_v11, %v2816_v11 }
 0x562   : > { %2723 = vst.msk [vmem:[#allocation4] sm:$0xff] %vm2722_vm11, %v2684_v48  ;;  %2754 = vrot.lane.b32.xlu1 %v5172_v55, %s3759_s19  ;;  %v2848_v61 = vcombine.high (!%p3267_p5), %v2810_v31, %v2810_v31  ;;  %v2964_v55 = vld [vmem:[%s5407_s5 + $0x30] sm:$0xff] (!%p3267_p5) }
 0x563   : > { %v3707_v8 = vpop.eup %3706  ;;  %v2631_v4 = vpop.permute.xlu1 %2630  ;;  %v3356_v30 = vpack.c.bf16 (!%p3267_p5), %v2965_v56, %v2964_v55 }
 0x564   : > { %v5177_v47 = vmul.f32 %v3707_v8, %v2629_v15  ;;  %v3709_v29 = vpop.eup %3708  ;;  %v2966_v8 = vld [vmem:[%s5407_s5 + $0x40] sm:$0xff] (!%p3267_p5) }
 0x565   : > { %v2688_v3 = vpop.permute.xlu0 %2687  ;;  %v5186_v63 = vmul.f32 %v3709_v29, %v2627_v13  ;;  %v2808_v13 = vmax.f32 (!%p3267_p5), %v5156_v32, 0.0  ;;  %v2959_v32 = vld [vmem:[%s5407_s5 + $0x8] sm:$0xff] (!%p3267_p5)  ;;  %v5285_v29 = vmax.f32 (!%p3267_p5), %v5158_v36, 0.0 }
 0x566   : > { %2725 = vst.msk [vmem:[#allocation4 + $0x10] sm:$0xff] %vm2722_vm11, %v2688_v3  ;;  %2760 = vrot.lane.b32.xlu0 %v5177_v47, %s3759_s19  ;;  %2770 = vrot.lane.b32.xlu1 %v5179_v45, %s3759_s19 }
 0x567   : > { %v3711_v24 = vpop.eup %3710  ;;  %v2643_v39 = vpop.permute.xlu1 %2642  ;;  %v2826_v54 = vcombine.high (!%p3267_p5), %v2808_v13, %v2808_v13  ;;  %v2812_v48 = vmax.f32 (!%p3267_p5), %v5186_v63, 0.0 }
 0x568   : > { %v5188_v42 = vmul.f32 %v3711_v24, %v2633_v46  ;;  %v3713_v21 = vpop.eup %3712  ;;  %v2958_v46 = vld [vmem:[%s5407_s5] sm:$0xff] (!%p3267_p5)  ;;  %v2813_v24 = vmax.f32 (!%p3267_p5), %v5177_v47, 0.0 }
 0x569   : > { %v2692_v37 = vpop.permute.xlu0 %2691  ;;  %v3715_v57 = vpop.eup %3714  ;;  %v5195_v49 = vmul.f32 %v3713_v21, %v2641_v27  ;;  %v3347_v0 = vpack.c.bf16 (!%p3267_p5), %v2959_v32, %v2958_v46  ;;  %v2962_v27 = vld [vmem:[%s5407_s5 + $0x20] sm:$0xff] (!%p3267_p5)  ;;  %v2872_v3 = vcombine.high (!%p3267_p5), %v2812_v48, %v2812_v48  ;;  %v2969_v21 = vld [vmem:[%s5407_s5 + $0x58] sm:$0xff] (!%p3267_p5) }
 0x56a   : > { %2727 = vst.msk [vmem:[#allocation4 + $0x20] sm:$0xff] %vm2722_vm11, %v2692_v37  ;;  %2764 = vrot.lane.b32.xlu0 %v5188_v42, %s3759_s19  ;;  %2758 = vrot.lane.b32.xlu1 %v5186_v63, %s3759_s19  ;;  %v5197_v33 = vmul.f32 %v3715_v57, %v2631_v4  ;;  %v3717_v34 = vpop.eup %3716  ;;  %v3353_v40 = vpack.c.bf16 (!%p3267_p5), %v2963_v52, %v2962_v27  ;;  %v2967_v4 = vld [vmem:[%s5407_s5 + $0x48] sm:$0xff] (!%p3267_p5)  ;;  %v2968_v63 = vld [vmem:[%s5407_s5 + $0x50] sm:$0xff] (!%p3267_p5) }
 0x56b   : > { %v2686_v25 = vpop.permute.xlu1 %2685  ;;  %v5205_v12 = vmul.f32 %v3717_v34, %v2643_v39  ;;  %3348 = vmatpush1.bf16.msra.mxu0 (!%p3267_p5), %v3347_v0  ;;  %v3359_v39 = vpack.c.bf16 (!%p3267_p5), %v2967_v4, %v2966_v8  ;;  %v2884_v36 = vcombine.high (!%p3267_p5), %v2813_v24, %v2813_v24  ;;  %v3362_v47 = vpack.c.bf16 (!%p3267_p5), %v2969_v21, %v2968_v63  ;;  %v2970_v37 = vld [vmem:[%s5407_s5 + $0x60] sm:$0xff] (!%p3267_p5)  ;;  %v2971_v57 = vld [vmem:[%s5407_s5 + $0x68] sm:$0xff] (!%p3267_p5)  ;;  %v3069_v21 = vld [vmem:[%s5409_s7 + $0x18] sm:$0xff] (!%p3267_p5) }
 0x56c   : > { %2724 = vst.msk [vmem:[#allocation4 + $0x8] sm:$0xff] %vm2722_vm11, %v2686_v25  ;;  %3349 = vmatprep.subr.bf16.mxu0 (!%p3267_p5), %v3764_v26  ;;  %v2818_v25 = vmax.f32 (!%p3267_p5), %v5179_v45, 0.0  ;;  %v3365_v34 = vpack.c.bf16 (!%p3267_p5), %v2971_v57, %v2970_v37 }
 0x56d   : > { %v2696_v58 = vpop.permute.xlu0 %2695 }
 0x56e   : > { %2729 = vst.msk [vmem:[#allocation4 + $0x30] sm:$0xff] %vm2722_vm11, %v2696_v58  ;;  %2772 = vrot.lane.b32.xlu0 %v5195_v49, %s3759_s19  ;;  %2762 = vrot.lane.b32.xlu1 %v5197_v33, %s3759_s19  ;;  %v2814_v58 = vmax.f32 (!%p3267_p5), %v5197_v33, 0.0 }
 0x56f   : > { %v2690_v60 = vpop.permute.xlu1 %2689  ;;  %3351 = vmatpush1.bf16.msra.mxu0 (!%p3267_p5), %v3350_v43 }
 0x570   : > { %2726 = vst.msk [vmem:[#allocation4 + $0x18] sm:$0xff] %vm2722_vm11, %v2690_v60  ;;  %3352 = vmatprep.subr.bf16.mxu0 (!%p3267_p5), %v3764_v26  ;;  %v2972_v60 = vld [vmem:[%s5407_s5 + $0x70] sm:$0xff] (!%p3267_p5)  ;;  %v2896_v45 = vcombine.high (!%p3267_p5), %v2814_v58, %v2814_v58 }
 0x571   : > { %v2700_v38 = vpop.permute.xlu0 %2699 }
 0x572   : > { %2731 = vst.msk [vmem:[#allocation4 + $0x40] sm:$0xff] %vm2722_vm11, %v2700_v38  ;;  %2774 = vrot.lane.b32.xlu1 %v5205_v12, %s3759_s19  ;;  %2822 = vrot.lane.b32.xlu0 (!%p3267_p5), %v2808_v13, %s3760_s20  ;;  %v2973_v38 = vld [vmem:[%s5407_s5 + $0x78] sm:$0xff] (!%p3267_p5)  ;;  %v2838_v13 = vcombine.high (!%p3267_p5), %v5232_v41, %v5232_v41 }
 0x573   : > { %v2694_v53 = vpop.permute.xlu1 %2693  ;;  %3354 = vmatpush1.bf16.msra.mxu0 (!%p3267_p5), %v3353_v40  ;;  %v3368_v33 = vpack.c.bf16 (!%p3267_p5), %v2973_v38, %v2972_v60 }
 0x574   : > { %2728 = vst.msk [vmem:[#allocation4 + $0x28] sm:$0xff] %vm2722_vm11, %v2694_v53  ;;  %3355 = vmatprep.subr.bf16.mxu0 (!%p3267_p5), %v3764_v26  ;;  %v2937_v53 = vcombine.high (!%p3267_p5), %v2818_v25, %v2818_v25 }
 0x575   : > { %v2704_v20 = vpop.permute.xlu0 %2703 }
 0x576   : > { %2733 = vst.msk [vmem:[#allocation4 + $0x50] sm:$0xff] %vm2722_vm11, %v2704_v20  ;;  %2833 = vrot.lane.b32.xlu1 (!%p3267_p5), %v5232_v41, %s3761_s21  ;;  %2827 = vrot.lane.b32.xlu0 (!%p3267_p5), %v2826_v54, %s3762_s27  ;;  %v2974_v20 = vld [vmem:[%s5407_s5 + $0x80] sm:$0xff] (!%p3267_p5) }
 0x577   : > { %v2698_v44 = vpop.permute.xlu1 %2697  ;;  %3357 = vmatpush1.bf16.msra.mxu0 (!%p3267_p5), %v3356_v30 }
 0x578   : > { %2730 = vst.msk [vmem:[#allocation4 + $0x38] sm:$0xff] %vm2722_vm11, %v2698_v44  ;;  %3358 = vmatprep.subr.bf16.mxu0 (!%p3267_p5), %v3764_v26  ;;  %v2975_v44 = vld [vmem:[%s5407_s5 + $0x88] sm:$0xff] (!%p3267_p5) }
 0x579   : > { %v2708_v51 = vpop.permute.xlu0 %2707 }
 0x57a   : > { %2736 = vst.msk [vmem:[#allocation4 + $0x60] sm:$0xf] %vm2735_vm12, %v2708_v51  ;;  %2843 = vrot.lane.b32.xlu1 (!%p3267_p5), %v2810_v31, %s3763_s28  ;;  %2849 = vrot.lane.b32.xlu0 (!%p3267_p5), %v2848_v61, %s3765_s17  ;;  %v2819_v51 = vmax.f32 (!%p3267_p5), %v5195_v49, 0.0 }
 0x57b   : > { %v2702_v59 = vpop.permute.xlu1 %2701  ;;  %3360 = vmatpush1.bf16.msra.mxu0 (!%p3267_p5), %v3359_v39  ;;  %v3068_v39 = vld [vmem:[%s5409_s7 + $0x10] sm:$0xff] (!%p3267_p5) }
 0x57c   : > { %2732 = vst.msk [vmem:[#allocation4 + $0x48] sm:$0xff] %vm2722_vm11, %v2702_v59  ;;  %3361 = vmatprep.subr.bf16.mxu0 (!%p3267_p5), %v3764_v26  ;;  %v2815_v59 = vmax.f32 (!%p3267_p5), %v5188_v42, 0.0 }
 0x57e   : > { %2855 = vrot.lane.b32.xlu1 (!%p3267_p5), %v2811_v6, %s3766_s14  ;;  %2861 = vrot.lane.b32.xlu0 (!%p3267_p5), %v2860_v62, %s3767_s10  ;;  %v2908_v49 = vcombine.high (!%p3267_p5), %v2815_v59, %v2815_v59  ;;  %v2929_v6 = vcombine.high (!%p3267_p5), %v5285_v29, %v5285_v29 }
 0x57f   : > { %v2706_v1 = vpop.permute.xlu1 %2705  ;;  %3363 = vmatpush1.bf16.msra.mxu0 (!%p3267_p5), %v3362_v47  ;;  %v3268_v47 = vld [vmem:[%s5408_s6] ss:$0 sm:$0xff] (!%p3267_p5) }
 0x580   : > { %2734 = vst.msk [vmem:[#allocation4 + $0x58] sm:$0xff] %vm2722_vm11, %v2706_v1  ;;  %3364 = vmatprep.subr.bf16.mxu0 (!%p3267_p5), %v3764_v26  ;;  %v3371_v1 = vpack.c.bf16 (!%p3267_p5), %v2975_v44, %v2974_v20  ;;  %vm2900_vm11 = vcmask (!%p3267_p5), 913216  }
 0x582   : > { %2915 = vrot.lane.b32.xlu1 (!%p3267_p5), %v2816_v11, %s3760_s20  ;;  %2867 = vrot.lane.b32.xlu0 (!%p3267_p5), %v2812_v48, %s3768_s26  ;;  %s3772_s20 = smov (!%p3267_p5), 72  }
 0x583   : > { %3366 = vmatpush1.bf16.msra.mxu0 (!%p3267_p5), %v3365_v34  ;;  %v3270_v34 = vld [vmem:[%s5410_s8] ss:$0 sm:$0xff] (!%p3267_p5) }
 0x584   : > { %3367 = vmatprep.subr.bf16.mxu0 (!%p3267_p5), %v3764_v26 }
 0x586   : > { %2920 = vrot.lane.b32.xlu1 (!%p3267_p5), %v2919_v19, %s3762_s27  ;;  %2873 = vrot.lane.b32.xlu0 (!%p3267_p5), %v2872_v3, %s3769_s16  ;;  %s3773_s27 = smov (!%p3267_p5), 80  }
 0x587   : > { %3369 = vmatpush1.bf16.msra.mxu0 (!%p3267_p5), %v3368_v33 }
 0x588   : > { %3370 = vmatprep.subr.bf16.mxu0 (!%p3267_p5), %v3764_v26 }
 0x58a   : > { %2925 = vrot.lane.b32.xlu1 (!%p3267_p5), %v5285_v29, %s3761_s21  ;;  %2879 = vrot.lane.b32.xlu0 (!%p3267_p5), %v2813_v24, %s3770_s23  ;;  %v3066_v29 = vld [vmem:[%s5409_s7] sm:$0xff] (!%p3267_p5)  ;;  %v3067_v24 = vld [vmem:[%s5409_s7 + $0x8] sm:$0xff] (!%p3267_p5) }
 0x58b   : > { %3372 = vmatpush1.bf16.msra.mxu0 (!%p3267_p5), %v3371_v1  ;;  %v3383_v63 = vpack.c.bf16 (!%p3267_p5), %v3067_v24, %v3066_v29 }
 0x58c   : > { %3373 = vmatprep.subr.bf16.mxu0 (!%p3267_p5), %v3764_v26 }
 0x58d   : > { %3384 = vmatpush3.bf16.msra.mxu1 (!%p3267_p5), %v3383_v63 }
 0x58e   : > { %2885 = vrot.lane.b32.xlu1 (!%p3267_p5), %v2884_v36, %s3771_s24  ;;  %2933 = vrot.lane.b32.xlu0 (!%p3267_p5), %v2818_v25, %s3763_s28  ;;  %v3386_v36 = vpack.c.bf16 (!%p3267_p5), %v3069_v21, %v3068_v39 }
 0x58f   : > { %3385 = vmatprep.subr.bf16.mxu1 (!%p3267_p5), %v3764_v26 }
 0x591   : > { %3387 = vmatpush3.bf16.msra.mxu1 (!%p3267_p5), %v3386_v36 }
 0x592   : > { %2891 = vrot.lane.b32.xlu1 (!%p3267_p5), %v2814_v58, %s3772_s20  ;;  %2938 = vrot.lane.b32.xlu0 (!%p3267_p5), %v2937_v53, %s3765_s17  ;;  %s3774_s17 = smov (!%p3267_p5), 88  }
 0x596   : > { %2897 = vrot.lane.b32.xlu1 (!%p3267_p5), %v2896_v45, %s3773_s27  ;;  %2943 = vrot.lane.b32.xlu0 (!%p3267_p5), %v2819_v51, %s3766_s14 }
 0x59a   : > { %2903 = vrot.lane.b32.xlu1 (!%p3267_p5), %v2815_v59, %s3774_s17 }
 0x59e   : > { %2909 = vrot.lane.b32.xlu1 (!%p3267_p5), %v2908_v49, %s3775_s12 }
 0x5be   : > { %v2753_v14 = vpop.permute.xlu0 %2752 }
 0x5bf   : > { %2791 = vst.msk [vmem:[#allocation2 + $0x20] sm:$0xff] %vm2789_vm13, %v2753_v14  ;;  %v2976_v14 = vld [vmem:[%s5407_s5 + $0x90] sm:$0xff] (!%p3267_p5) }
 0x5c4   : > { %v2751_v9 = vpop.permute.xlu1 %2750 }
 0x5c5   : > { %2790 = vst.msk [vmem:[#allocation2 + $0x18] sm:$0xff] %vm2789_vm13, %v2751_v9  ;;  %v2977_v9 = vld [vmem:[%s5407_s5 + $0x98] sm:$0xff] (!%p3267_p5) }
 0x5c6   : > { %v2769_v2 = vpop.permute.xlu0 %2768  ;;  %v3374_v42 = vpack.c.bf16 (!%p3267_p5), %v2977_v9, %v2976_v14 }
 0x5c7   : > { %2799 = vst.msk [vmem:[#allocation2 + $0x60] sm:$0xff] %vm2789_vm13, %v2769_v2  ;;  %v2947_v2 = vcombine.high (!%p3267_p5), %v2819_v51, %v2819_v51 }
 0x5c8   : > { %3375 = vmatpush1.bf16.msra.mxu0 (!%p3267_p5), %v3374_v42 }
 0x5c9   : > { %2948 = vrot.lane.b32.xlu0 (!%p3267_p5), %v2947_v2, %s3767_s10  ;;  %3376 = vmatprep.subr.bf16.mxu0 (!%p3267_p5), %v3764_v26 }
 0x5ca   : > { %v2757_v5 = vpop.permute.xlu0 %2756 }
 0x5cb   : > { %2793 = vst.msk [vmem:[#allocation2 + $0x30] sm:$0xff] %vm2789_vm13, %v2757_v5  ;;  %v2978_v5 = vld [vmem:[%s5407_s5 + $0xa0] sm:$0xff] (!%p3267_p5) }
 0x5d0   : > { %v2767_v7 = vpop.permute.xlu1 %2766 }
 0x5d1   : > { %2798 = vst.msk [vmem:[#allocation2 + $0x58] sm:$0xff] %vm2789_vm13, %v2767_v7  ;;  %v2979_v7 = vld [vmem:[%s5407_s5 + $0xa8] sm:$0xff] (!%p3267_p5) }
 0x5d4   : > { %v2755_v23 = vpop.permute.xlu1 %2754 }
 0x5d5   : > { %2792 = vst.msk [vmem:[#allocation2 + $0x28] sm:$0xff] %vm2789_vm13, %v2755_v23  ;;  %v2820_v23 = vmax.f32 (!%p3267_p5), %v5205_v12, 0.0  ;;  %v3776_v12 = vmov (!%p3267_p5), 0.0  }
 0x5d7   : > { %2953 = vrot.lane.b32.xlu0 (!%p3267_p5), %v2820_v23, %s3768_s26 }
 0x5d8   : > { %v2761_v16 = vpop.permute.xlu0 %2760  ;;  %v2771_v50 = vpop.permute.xlu1 %2770 }
 0x5d9   : > { %2795 = vst.msk [vmem:[#allocation2 + $0x40] sm:$0xff] %vm2789_vm13, %v2761_v16  ;;  %2800 = vst.msk [vmem:[#allocation2 + $0x68] sm:$0xff] %vm2789_vm13, %v2771_v50  ;;  %v3377_v16 = vpack.c.bf16 (!%p3267_p5), %v2979_v7, %v2978_v5  ;;  %v2980_v50 = vld [vmem:[%s5407_s5 + $0xb0] sm:$0xff] (!%p3267_p5) }
 0x5db   : > { %3378 = vmatpush1.bf16.msra.mxu0 (!%p3267_p5), %v3377_v16 }
 0x5dc   : > { %v2765_v28 = vpop.permute.xlu0 %2764  ;;  %v2759_v35 = vpop.permute.xlu1 %2758  ;;  %3379 = vmatprep.subr.bf16.mxu0 (!%p3267_p5), %v3764_v26 }
 0x5dd   : > { %2797 = vst.msk [vmem:[#allocation2 + $0x50] sm:$0xff] %vm2789_vm13, %v2765_v28  ;;  %2794 = vst.msk [vmem:[#allocation2 + $0x38] sm:$0xff] %vm2789_vm13, %v2759_v35  ;;  %v2981_v28 = vld [vmem:[%s5407_s5 + $0xb8] sm:$0xff] (!%p3267_p5) }
 0x5de   : > { %v3380_v35 = vpack.c.bf16 (!%p3267_p5), %v2981_v28, %v2980_v50 }
 0x5df   : > { %2807 = sbr.rel (%p3267_p5) target bundleno = 2061 (0x80d), region = 64 }
 0x5e0   : > { %v2773_v15 = vpop.permute.xlu0 %2772  ;;  %v2763_v22 = vpop.permute.xlu1 %2762  ;;  %3381 = vmatpush1.bf16.msra.mxu0 (!%p3267_p5), %v3380_v35 }
 0x5e1   : > { %2801 = vst.msk [vmem:[#allocation2 + $0x70] sm:$0xff] %vm2789_vm13, %v2773_v15  ;;  %2796 = vst.msk [vmem:[#allocation2 + $0x48] sm:$0xff] %vm2789_vm13, %v2763_v22  ;;  %3043 = vmatprep.subr.mxu0 (!%p3267_p5), %v3776_v12  ;;  %v2982_v15 = vld [vmem:[%s5407_s5 + $0xc0] sm:$0xff] (!%p3267_p5)  ;;  %vm2912_vm13 = vcmask (!%p3267_p5), 1044416  }
 0x5e4   : > { %v2775_v10 = vpop.permute.xlu1 %2774  ;;  %3044 = vmatpush1.msra.mxu0 (!%p3267_p5), %v2982_v15  ;;  %v2823_v22 = vpop.permute.xlu0 (!%p3267_p5), %2822 }
 0x5e5   : > { %2803 = vst.msk [vmem:[#allocation2 + $0x78] sm:$0xf] %vm2802_vm14, %v2775_v10  ;;  %vm2992_vm14 = vcmask (!%p3267_p5), 588800  }
 0x5e6   : > { %2825 = vst.msk [vmem:[#allocation5] sm:$0xf] %vm2735_vm12, %v2823_v22 }
 0x5e8   : > { %v2834_v10 = vpop.permute.xlu1 %2833  ;;  %v2828_v54 = vpop.permute.xlu0 %2827 }
 0x5e9   : > { %2831 = vst.msk [vmem:[#allocation5] sm:$0xf] %vm2830_vm15, %v2828_v54 }
 0x5ea   : > { %2837 = vst.msk [vmem:[#allocation5] sm:$0xf] %vm2836_vm0, %v2834_v10 }
 0x5eb   : > { %2841 = vst.msk [vmem:[#allocation5] sm:$0xf] %vm2840_vm1, %v2838_v13 }
 0x5ec   : > { %v2844_v31 = vpop.permute.xlu1 %2843  ;;  %v2850_v46 = vpop.permute.xlu0 %2849 }
 0x5ed   : > { %2847 = vst.msk [vmem:[#allocation5] sm:$0xf] %vm2846_vm2, %v2844_v31 }
 0x5ee   : > { %2853 = vst.msk [vmem:[#allocation5] sm:$0xf] %vm2852_vm3, %v2850_v46 }
 0x5f0   : > { %v2856_v32 = vpop.permute.xlu1 %2855  ;;  %v2862_v41 = vpop.permute.xlu0 %2861 }
 0x5f1   : > { %2859 = vst.msk [vmem:[#allocation5] sm:$0xf] %vm2858_vm4, %v2856_v32 }
 0x5f2   : > { %2865 = vst.msk [vmem:[#allocation5] sm:$0xf] %vm2864_vm5, %v2862_v41 }
 0x5f4   : > { %v2916_v17 = vpop.permute.xlu1 %2915  ;;  %v2868_v18 = vpop.permute.xlu0 %2867 }
 0x5f5   : > { %2918 = vst.msk [vmem:[#allocation5 + $0x4] sm:$0xf] %vm2735_vm12, %v2916_v17  ;;  %vm2906_vm12 = vcmask 978816  }
 0x5f6   : > { %2871 = vst.msk [vmem:[#allocation5] sm:$0xf] %vm2870_vm6, %v2868_v18 }
 0x5f8   : > { %v2921_v61 = vpop.permute.xlu1 %2920  ;;  %v2874_v0 = vpop.permute.xlu0 %2873 }
 0x5f9   : > { %2923 = vst.msk [vmem:[#allocation5 + $0x4] sm:$0xf] %vm2830_vm15, %v2921_v61  ;;  %vm3777_vm15 = vmmov 0  }
 0x5fa   : > { %2877 = vst.msk [vmem:[#allocation5] sm:$0xf] %vm2876_vm7, %v2874_v0  ;;  %3343 = vmatprep.mubr.msk.f32.mxu1 %vm3777_vm15, %v3776_v12 }
 0x5fc   : > { %v2926_v43 = vpop.permute.xlu1 %2925  ;;  %v2880_v27 = vpop.permute.xlu0 %2879 }
 0x5fd   : > { %2928 = vst.msk [vmem:[#allocation5 + $0x4] sm:$0xf] %vm2836_vm0, %v2926_v43  ;;  %vm3077_vm0 = vcmask 261120  }
 0x5fe   : > { %2931 = vst.msk [vmem:[#allocation5 + $0x4] sm:$0xf] %vm2840_vm1, %v2929_v6  ;;  %vm3151_vm1 = vcmask 19456  }
 0x5ff   : > { %2883 = vst.msk [vmem:[#allocation5] sm:$0xf] %vm2882_vm8, %v2880_v27 }
 0x600   : > { %v2886_v52 = vpop.permute.xlu1 %2885  ;;  %v2934_v62 = vpop.permute.xlu0 %2933 }
 0x601   : > { %2889 = vst.msk [vmem:[#allocation5] sm:$0xf] %vm2888_vm9, %v2886_v52 }
 0x602   : > { %2936 = vst.msk [vmem:[#allocation5 + $0x4] sm:$0xf] %vm2846_vm2, %v2934_v62 }
 0x604   : > { %v2892_v11 = vpop.permute.xlu1 %2891  ;;  %v2939_v40 = vpop.permute.xlu0 %2938 }
 0x605   : > { %2895 = vst.msk [vmem:[#allocation5] sm:$0xf] %vm2894_vm10, %v2892_v11 }
 0x606   : > { %2941 = vst.msk [vmem:[#allocation5 + $0x4] sm:$0xf] %vm2852_vm3, %v2939_v40 }
 0x608   : > { %v2898_v55 = vpop.permute.xlu1 %2897  ;;  %v2944_v56 = vpop.permute.xlu0 %2943 }
 0x609   : > { %2901 = vst.msk [vmem:[#allocation5] sm:$0xf] %vm2900_vm11, %v2898_v55 }
 0x60a   : > { %2946 = vst.msk [vmem:[#allocation5 + $0x4] sm:$0xf] %vm2858_vm4, %v2944_v56 }
 0x60c   : > { %v2904_v48 = vpop.permute.xlu1 %2903 }
 0x60d   : > { %2907 = vst.msk [vmem:[#allocation5] sm:$0xf] %vm2906_vm12, %v2904_v48 }
 0x610   : > { %v2910_v30 = vpop.permute.xlu1 %2909 }
 0x611   : > { %2913 = vst.msk [vmem:[#allocation5] sm:$0xf] %vm2912_vm13, %v2910_v30 }
 0x63b   : > { %v2949_v19 = vpop.permute.xlu0 %2948 }
 0x63c   : > { %2951 = vst.msk [vmem:[#allocation5 + $0x4] sm:$0xf] %vm2864_vm5, %v2949_v19 }
 0x649   : > { %v2954_v8 = vpop.permute.xlu0 %2953 }
 0x64a   : > { %2956 = vst.msk [vmem:[#allocation5 + $0x4] sm:$0xf] %vm2870_vm6, %v2954_v8 }
 0x651   : > { %v2957_v4 = vld [vmem:[#allocation5] sm:$0xff] }
 0x652   : > { %v2991_v3 = vcombine.high %v2957_v4, %v2957_v4 }
 0x654   : > { %3269 = vmatprep.mubr.msk.f32.mxu0 %vm2992_vm14, %v2991_v3 }
 0x655   : > { %3060 = vmatmul.mubr.f32.vlgmr.msra.gmra.mrb[0].mxu0 %v2957_v4 }
 0x728   : > { %v3061_v37 = vpop.f32.mrb[0].mxu0 }
 0x729   : > { %v3062_v57 = vadd.f32 %v3268_v47, %v3061_v37  ;;  %v3063_v25 = vpop.f32.mrb[1].mxu0 }
 0x72b   : > { %3725 = vtanh.f32 %v3062_v57 }
 0x735   : > { %v3726_v58 = vpop.eup %3725 }
 0x736   : > { %3344 = vmatmul.mubr.msk.f32.vlgmr.msra.gmra.mrb[0].mxu1 %vm3077_vm0, %v3726_v58 }
 0x809   : > { %v3147_v60 = vpop.f32.mrb[0].mxu1 }
 0x80a   : > { %v3148_v38 = vadd.f32 %v3270_v34, %v3147_v60  ;;  %v3345_v26 = vpop.f32.mrb[1].mxu1 }
 0x80c   : > { %3152 = vst.msk [vmem:[%s5411_s9] sm:$0xf] %vm3151_vm1, %v3148_v38 }
 0x80d PF: > { %s19_s30 = sadd.s32 1, %s3733_s30  }
 0x80e   : > { %p16_p6 = scmp.ge.s32.totalorder %s19_s30, 4  }
 0x810   :  { %18 = sbr.rel (!%p16_p6) target bundleno = 1 (0x1), region = 92 }

</bundles_post_ra>
